<compile_context>
chip_gen: v7x
topology: tpu7x:2x2x1
jax: 0.10.0
libtpu: 0.0.40
codegen_flags: <defaults>
</compile_context>

<pallas_src>
import jax
import jax.numpy as jnp
from jax.experimental import pallas as pl
from jax.experimental.pallas import tpu as pltpu


EPS = 1e-5


def conv_bn_relu_kernel(w_ref, x_ref, gb_ref, o_ref):
    # w_ref:  (Cout, Cin)  bf16  1x1 conv weight (native PyTorch layout)
    # x_ref:  (Cin,  M)    bf16  input pixels: channels on sublanes, pixels on lanes
    # gb_ref: (Cout, 2)    f32   [:, 0] = gamma, [:, 1] = beta
    # o_ref:  (Cout, M)    f32   fused conv+BN+ReLU output
    w = w_ref[...]
    x = x_ref[...]

    # 1x1 conv == single MXU matmul, f32 accumulation.
    y = jnp.dot(w, x, preferred_element_type=jnp.float32)           # (Cout, M)

    m = y.shape[1]
    inv_m = 1.0 / float(m)

    # Two-pass (centered) BatchNorm statistics: training mode, biased variance.
    # y is VMEM-resident, so the second sweep is essentially free and avoids
    # the E[y^2] - E[y]^2 cancellation of the one-pass formula.
    mean = jnp.sum(y, axis=1, keepdims=True) * inv_m                 # (Cout, 1)
    centered = y - mean
    var = jnp.sum(centered * centered, axis=1, keepdims=True) * inv_m
    inv_std = jax.lax.rsqrt(var + EPS)                               # (Cout, 1)

    # Fold the per-channel affine into one scale + one shift vector.
    gb = gb_ref[...]
    gamma = gb[:, 0:1]                                               # (Cout, 1)
    beta = gb[:, 1:2]                                                # (Cout, 1)
    scale = inv_std * gamma
    shift = beta - mean * scale

    # Normalize + ReLU in a single sweep.
    o_ref[...] = jnp.maximum(y * scale + shift, 0.0).astype(o_ref.dtype)


def conv_bn_relu(x_nchw, conv_weight, gamma, beta):
    """x_nchw: (N, C_in, H, W) f32; conv_weight: (C_out, C_in, 1, 1) f32."""
    n, c_in, h, w = x_nchw.shape
    c_out = conv_weight.shape[0]
    m = n * h * w

    # NCHW -> (Cin, M).  For N == 1 this is a pure reshape (no HBM copy).
    x_mat = (
        jnp.transpose(x_nchw.reshape(n, c_in, h * w), (1, 0, 2))
        .reshape(c_in, m)
        .astype(jnp.bfloat16)
    )
    # (Cout, Cin, 1, 1) -> (Cout, Cin): native layout, no transpose needed.
    w_mat = conv_weight[:, :, 0, 0].astype(jnp.bfloat16)
    # Pack gamma/beta into a single small operand: one DMA, one VMEM tile.
    gb = jnp.stack([gamma, beta], axis=1).astype(jnp.float32)        # (Cout, 2)

    vmem_spec = pl.BlockSpec(memory_space=pltpu.MemorySpace.VMEM)

    # Advisory cost hint: helps XLA place/overlap this launch-bound custom call.
    bytes_accessed = (
        c_in * m * 2          # x (bf16)
        + c_out * c_in * 2    # w (bf16)
        + c_out * 2 * 4       # gamma/beta (f32)
        + c_out * m * 4       # output (f32)
    )
    cost = pl.CostEstimate(
        flops=2 * c_out * c_in * m,
        bytes_accessed=bytes_accessed,
        transcendentals=c_out,  # rsqrt per channel
    )

    # Single-block kernel: all operands + intermediates are ~1.7 MB, well
    # within VMEM on v5e/v6e/v7x; the op is launch/HBM-latency bound, so no
    # grid.  (M = 784 pads to 896 lanes; padding it upstream to a 128-multiple
    # would only pay off if that padding is free in the producer.)
    out_mat = pl.pallas_call(
        conv_bn_relu_kernel,
        out_shape=jax.ShapeDtypeStruct((c_out, m), x_nchw.dtype),
        in_specs=[vmem_spec, vmem_spec, vmem_spec],
        out_specs=vmem_spec,
        cost_estimate=cost,
    )(w_mat, x_mat, gb)

    # (Cout, M) -> (Cout, N, H, W) -> NCHW (free when N == 1).
    out = out_mat.reshape(c_out, n, h, w)
    return jnp.transpose(out, (1, 0, 2, 3))


def _reference(x_nchw, conv_weight, gamma, beta, cast_bf16):
    """Pure-JAX reference of the fused op (training-mode BN).

    cast_bf16=True mirrors the kernel's bf16 matmul operands (tight check);
    cast_bf16=False is the exact f32 module semantics (loose check, since the
    kernel rounds its matmul inputs to bf16).
    """
    n, c_in, h, w = x_nchw.shape
    c_out = conv_weight.shape[0]
    x_mat = jnp.transpose(x_nchw, (0, 2, 3, 1)).reshape(n * h * w, c_in)
    w_mat = jnp.transpose(conv_weight[:, :, 0, 0], (1, 0))
    if cast_bf16:
        x_mat = x_mat.astype(jnp.bfloat16)
        w_mat = w_mat.astype(jnp.bfloat16)
    y = jnp.dot(x_mat, w_mat, preferred_element_type=jnp.float32)    # (M, Cout)
    mean = jnp.mean(y, axis=0, keepdims=True)
    var = jnp.mean((y - mean) ** 2, axis=0, keepdims=True)
    out = (y - mean) * jax.lax.rsqrt(var + EPS) * gamma[None, :] + beta[None, :]
    out = jnp.maximum(out, 0.0)
    return jnp.transpose(out.reshape(n, h, w, c_out), (0, 3, 1, 2))


if __name__ == "__main__":
    key = jax.random.PRNGKey(0)
    k_x, k_w = jax.random.split(key)

    N, C, H, W = 1, 216, 28, 28  # shape implied by the module

    x = jax.random.normal(k_x, (N, C, H, W), dtype=jnp.float32)

    # Deterministic parameter init (PyTorch-default-like):
    # conv weight ~ U(-b, b) with b = 1/sqrt(fan_in), BN gamma=1, beta=0.
    fan_in = C * 1 * 1
    bound = 1.0 / (fan_in ** 0.5)
    conv_weight = jax.random.uniform(
        k_w, (C, C, 1, 1), minval=-bound, maxval=bound, dtype=jnp.float32
    )
    gamma = jnp.ones((C,), dtype=jnp.float32)
    beta = jnp.zeros((C,), dtype=jnp.float32)

    out = conv_bn_relu(x, conv_weight, gamma, beta)
    jax.block_until_ready(out)

    assert out.shape == (N, C, H, W)
    assert out.dtype == jnp.float32

    # Tight check: reference with the same bf16 matmul-operand rounding.
    ref_bf16 = _reference(x, conv_weight, gamma, beta, cast_bf16=True)
    jax.block_until_ready(ref_bf16)
    assert jnp.allclose(out, ref_bf16, atol=2e-3, rtol=2e-3), "mismatch vs bf16 reference"

    # Loose sanity check vs exact f32 module semantics (bf16 rounding only).
    ref_f32 = _reference(x, conv_weight, gamma, beta, cast_bf16=False)
    jax.block_until_ready(ref_f32)
    assert jnp.allclose(out, ref_f32, atol=5e-2, rtol=5e-2), "mismatch vs f32 reference"

    print("KERNEL_OK")
</pallas_src>

<mosaic_0001>
module attributes {stable_mosaic.version = 11 : i64} {
  func.func @conv_bn_relu_kernel(%arg0: memref<216x216xbf16, #tpu.memory_space<vmem>>, %arg1: memref<216x784xbf16, #tpu.memory_space<vmem>>, %arg2: memref<216x2xf32, #tpu.memory_space<vmem>>, %arg3: memref<216x784xf32, #tpu.memory_space<vmem>>) attributes {dimension_semantics = [], scalar_prefetch = 0 : i64, scratch_operands = 0 : i64, tpu.core_type = #tpu.core_type<tc>} {
    %c0 = arith.constant 0 : index
    %c0_0 = arith.constant 0 : index
    %0 = vector.load %arg0[%c0, %c0_0] : memref<216x216xbf16, #tpu.memory_space<vmem>>, vector<216x216xbf16>
    %c0_1 = arith.constant 0 : index
    %c0_2 = arith.constant 0 : index
    %1 = vector.load %arg1[%c0_1, %c0_2] : memref<216x784xbf16, #tpu.memory_space<vmem>>, vector<216x784xbf16>
    %cst = arith.constant dense<0.000000e+00> : vector<216x784xf32>
    %2 = tpu.matmul %0, %1, %cst {dimension_numbers = #tpu.dot_dimension_numbers<[1], [0], [0], [1], [0, 0, 1, 1], [], []>} : vector<216x216xbf16>, vector<216x784xbf16>, vector<216x784xf32> -> vector<216x784xf32>
    %cst_3 = arith.constant dense<0.000000e+00> : vector<216xf32>
    %3 = vector.multi_reduction <add>, %2, %cst_3 [1] : vector<216x784xf32> to vector<216xf32>
    %4 = vector.shape_cast %3 : vector<216xf32> to vector<216x1xf32>
    %cst_4 = arith.constant 0.00127551018 : f32
    %5 = vector.broadcast %cst_4 : f32 to vector<216x1xf32>
    %6 = arith.mulf %4, %5 : vector<216x1xf32>
    %7 = vector.broadcast %6 : vector<216x1xf32> to vector<216x784xf32>
    %8 = arith.subf %2, %7 : vector<216x784xf32>
    %9 = arith.mulf %8, %8 : vector<216x784xf32>
    %cst_5 = arith.constant dense<0.000000e+00> : vector<216xf32>
    %10 = vector.multi_reduction <add>, %9, %cst_5 [1] : vector<216x784xf32> to vector<216xf32>
    %11 = vector.shape_cast %10 : vector<216xf32> to vector<216x1xf32>
    %cst_6 = arith.constant 0.00127551018 : f32
    %12 = vector.broadcast %cst_6 : f32 to vector<216x1xf32>
    %13 = arith.mulf %11, %12 : vector<216x1xf32>
    %cst_7 = arith.constant 9.99999974E-6 : f32
    %14 = vector.broadcast %cst_7 : f32 to vector<216x1xf32>
    %15 = arith.addf %13, %14 : vector<216x1xf32>
    %16 = math.rsqrt %15 : vector<216x1xf32>
    %c0_8 = arith.constant 0 : index
    %c0_9 = arith.constant 0 : index
    %17 = vector.load %arg2[%c0_8, %c0_9] : memref<216x2xf32, #tpu.memory_space<vmem>>, vector<216x2xf32>
    %18 = vector.extract_strided_slice %17 {offsets = [0, 0], sizes = [216, 1], strides = [1, 1]} : vector<216x2xf32> to vector<216x1xf32>
    %19 = vector.extract_strided_slice %17 {offsets = [0, 1], sizes = [216, 1], strides = [1, 1]} : vector<216x2xf32> to vector<216x1xf32>
    %20 = arith.mulf %16, %18 : vector<216x1xf32>
    %21 = arith.mulf %6, %20 : vector<216x1xf32>
    %22 = arith.subf %19, %21 : vector<216x1xf32>
    %23 = vector.broadcast %20 : vector<216x1xf32> to vector<216x784xf32>
    %24 = arith.mulf %2, %23 : vector<216x784xf32>
    %25 = vector.broadcast %22 : vector<216x1xf32> to vector<216x784xf32>
    %26 = arith.addf %24, %25 : vector<216x784xf32>
    %cst_10 = arith.constant 0.000000e+00 : f32
    %27 = vector.broadcast %cst_10 : f32 to vector<216x784xf32>
    %28 = arith.maximumf %26, %27 : vector<216x784xf32>
    %c0_11 = arith.constant 0 : index
    %c0_12 = arith.constant 0 : index
    %29 = vector.load %arg3[%c0_11, %c0_12] : memref<216x784xf32, #tpu.memory_space<vmem>>, vector<216x784xf32>
    tpu.vector_store %arg3[%c0_11, %c0_12], %28 {strides = array<i32>} : memref<216x784xf32, #tpu.memory_space<vmem>>, vector<216x784xf32>,
    return
  }
}

</mosaic_0001>

<bundles_post_ra>
// kernel: tpu_custom_call.1
= control target key start
LH: loop header
LB: loop body
LE: loop exit
PB: predicated region body
PF: predicated region fallthrough
CT: control target
= control target key end

     0   :  { %8 = vsyncpa [#allocation3], 0  ;;  %s6753_s0 = inlined_call_operand.vmem [shape: bf16[216,216], index: 0, kind: input, shape index: {}]   ;;  %s6754_s1 = inlined_call_operand.hbm [shape: bf16[216,784], index: 1, kind: input, shape index: {}]   ;;  %s6755_s2 = inlined_call_operand.vmem [shape: f32[216,2], index: 2, kind: input, shape index: {}]   ;;  %s6756_s3 = inlined_call_operand.hbm [shape: f32[216,784], index: 3, kind: output, shape index: {}]  }
   0x1   :  { %9 = vsyncpa [#allocation4], 0  ;;  %s4206_s12 = smov [#allocation2]   ;;  %s4158_s16 = scalar_lea.hbm %s6754_s1, 12096 }
   0x2   :  { %s17_s13 = sshll.u32 %s4206_s12, 4  ;;  %p4159_p0 = scmp.ne.s32.totalorder %s6754_s1, %s4158_s16  ;;  %s18_s13 = int_to_ptr.vmem [resolvable:$true] %s17_s13 }
   0x3   :  { %p4162_p1 = scmp.lt.u32.totalorder %s4158_s16, %s6754_s1 }
   0x5   :  { %p4164_p2 = pnand %p4162_p1, %p4159_p0 }
   0x7   :  { %4167 = shalt.err (!%p4164_p2)
}
   0x8   :  { %s4168_s21 = scalar_lea.vmem %s18_s13, 12096  ;;  %p4173_p4 = scmp.lt.s32.totalorder %s18_s13, %s18_s13 }
   0x9   :  { %p4169_p3 = scmp.ne.s32.totalorder %s18_s13, %s4168_s21  ;;  %p4174_p5 = scmp.lt.s32.totalorder %s4168_s21, %s4168_s21 }
   0xb   :  { %p4175_p6 = por %p4174_p5, %p4173_p4 }
   0xd   :  { %p4176_p7 = pnand %p4175_p6, %p4169_p3 }
   0xf   :  { %4179 = shalt.err (!%p4176_p7)
}
  0x10   :  { %s4207_s22 = smov 448   ;;  %s4208_s23 = smov 28  }
  0x11   :  { %23 = dma.hbm_to_vmem [thread:$0]  %s6754_s1, 12096, %s18_s13, [#allocation3], %s4207_s22, %s4207_s22, %s4208_s23  }
  0x12   :  { %4202 = dma.done.wait [#allocation3], 12096  }
  0x13   :  { %4203 = vsyncadd [#allocation3], 4294955200  ;;  %v4209_v0 = vmov 0   ;;  %v3926_v1 = vld [vmem:[#allocation2 + $0x4] ss:$28 sps:$4 sm:$0xff]   ;;  %vm774_vm0 = vcmask 719872  }
  0x14   :  { %3922 = vset.pattern.permute.xlu1 %v4209_v0  ;;  %3923 = vset.pattern.permute.xlu0 %v4209_v0  ;;  %v3928_v2 = vld [vmem:[#allocation2] ss:$28 sps:$4 sm:$0xff]   ;;  %v3929_v3 = vld [vmem:[#allocation2 + $0xc] ss:$28 sps:$4 sm:$0xff]   ;;  %v3934_v6 = vld [vmem:[#allocation2 + $0x38] ss:$28 sps:$4 sm:$0xff]  }
  0x15   :  { %839 = vmatprep.subr.bf16.mxu0 %v3926_v1  ;;  %v3931_v4 = vld [vmem:[#allocation2 + $0x8] ss:$28 sps:$4 sm:$0xff]   ;;  %v3932_v5 = vld [vmem:[#allocation2 + $0x3c] ss:$28 sps:$4 sm:$0xff]   ;;  %1010 = vmatprep.subr.bf16.mxu1 %v3929_v3  ;;  %v3938_v9 = vld [vmem:[#allocation2 + $0x74] ss:$28 sps:$4 sm:$0xff]  }
  0x16   :  { %840 = vmatpush1.bf16.msra.mxu0 %v3928_v2  ;;  %v3935_v7 = vld [vmem:[#allocation2 + $0x44] ss:$28 sps:$4 sm:$0xff]   ;;  %1011 = vmatpush1.bf16.msra.mxu1 %v3931_v4  ;;  %v3940_v10 = vld [vmem:[#allocation2 + $0x70] ss:$28 sps:$4 sm:$0xff]   ;;  %v3941_v11 = vld [vmem:[#allocation2 + $0x7c] ss:$28 sps:$4 sm:$0xff]  }
  0x17   :  { %841 = vmatprep.subr.bf16.mxu0 %v3932_v5  ;;  %v3937_v8 = vld [vmem:[#allocation2 + $0x40] ss:$28 sps:$4 sm:$0xff]   ;;  %1012 = vmatprep.subr.bf16.mxu1 %v3935_v7  ;;  %v3944_v12 = vld [vmem:[#allocation2 + $0xac] ss:$28 sps:$4 sm:$0xff]   ;;  %v3943_v13 = vld [vmem:[#allocation2 + $0x78] ss:$28 sps:$4 sm:$0xff]  }
  0x18   :  { %v3947_v14 = vld [vmem:[#allocation2 + $0xb4] ss:$28 sps:$4 sm:$0xff]   ;;  %v3946_v15 = vld [vmem:[#allocation2 + $0xa8] ss:$28 sps:$4 sm:$0xff]   ;;  %v3952_v19 = vld [vmem:[#allocation2 + $0xe0] ss:$28 sps:$4 sm:$0xff]  }
  0x19   :  { %v3950_v16 = vld [vmem:[#allocation2 + $0xe4] ss:$28 sps:$4 sm:$0xff]   ;;  %v3949_v17 = vld [vmem:[#allocation2 + $0xb0] ss:$28 sps:$4 sm:$0xff]   ;;  %v3956_v20 = vld [vmem:[#allocation2 + $0x11c] ss:$28 sps:$4 sm:$0xff]  }
  0x1a   :  { %842 = vmatpush1.bf16.msra.mxu0 %v3934_v6  ;;  %1013 = vmatpush1.bf16.msra.mxu1 %v3937_v8  ;;  %v3953_v18 = vld [vmem:[#allocation2 + $0xec] ss:$28 sps:$4 sm:$0xff]   ;;  %v3959_v22 = vld [vmem:[#allocation2 + $0x124] ss:$28 sps:$4 sm:$0xff]   ;;  %v3958_v23 = vld [vmem:[#allocation2 + $0x118] ss:$28 sps:$4 sm:$0xff]  }
  0x1b   :  { %843 = vmatprep.subr.bf16.mxu0 %v3938_v9  ;;  %1014 = vmatprep.subr.bf16.mxu1 %v3941_v11  ;;  %v3955_v21 = vld [vmem:[#allocation2 + $0xe8] ss:$28 sps:$4 sm:$0xff]   ;;  %v3962_v24 = vld [vmem:[#allocation2 + $0x154] ss:$28 sps:$4 sm:$0xff]   ;;  %v3961_v25 = vld [vmem:[#allocation2 + $0x120] ss:$28 sps:$4 sm:$0xff]  }
  0x1c   :  { %v3965_v26 = vld [vmem:[#allocation2 + $0x15c] ss:$28 sps:$4 sm:$0xff]   ;;  %v3964_v27 = vld [vmem:[#allocation2 + $0x150] ss:$28 sps:$4 sm:$0xff]   ;;  %v3970_v31 = vld [vmem:[#allocation2 + $0x188] ss:$28 sps:$4 sm:$0xff]  }
  0x1d   :  { %v3968_v28 = vld [vmem:[#allocation2 + $0x18c] ss:$28 sps:$4 sm:$0xff]   ;;  %v3967_v29 = vld [vmem:[#allocation2 + $0x158] ss:$28 sps:$4 sm:$0xff]   ;;  %v3974_v32 = vld [vmem:[#allocation2 + $0x1c4] ss:$28 sps:$4 sm:$0xff]  }
  0x1e   :  { %844 = vmatpush1.bf16.msra.mxu0 %v3940_v10  ;;  %1015 = vmatpush1.bf16.msra.mxu1 %v3943_v13  ;;  %v3971_v30 = vld [vmem:[#allocation2 + $0x194] ss:$28 sps:$4 sm:$0xff]   ;;  %v3977_v34 = vld [vmem:[#allocation2 + $0x1cc] ss:$28 sps:$4 sm:$0xff]   ;;  %v3976_v35 = vld [vmem:[#allocation2 + $0x1c0] ss:$28 sps:$4 sm:$0xff]  }
  0x1f   :  { %845 = vmatprep.subr.bf16.mxu0 %v3944_v12  ;;  %1016 = vmatprep.subr.bf16.mxu1 %v3947_v14  ;;  %v3973_v33 = vld [vmem:[#allocation2 + $0x190] ss:$28 sps:$4 sm:$0xff]   ;;  %v3980_v36 = vld [vmem:[#allocation2 + $0x1fc] ss:$28 sps:$4 sm:$0xff]   ;;  %v3979_v37 = vld [vmem:[#allocation2 + $0x1c8] ss:$28 sps:$4 sm:$0xff]  }
  0x20   :  { %v3983_v38 = vld [vmem:[#allocation2 + $0x204] ss:$28 sps:$4 sm:$0xff]   ;;  %v3982_v39 = vld [vmem:[#allocation2 + $0x1f8] ss:$28 sps:$4 sm:$0xff]   ;;  %v3988_v44 = vld [vmem:[#allocation2 + $0x230] ss:$28 sps:$4 sm:$0xff]  }
  0x21   :  { %v3986_v40 = vld [vmem:[#allocation2 + $0x234] ss:$28 sps:$4 sm:$0xff]   ;;  %v4252_v41 = vld [vmem:[%s6753_s0 + $0x4] ss:$8 sps:$4 sm:$0xff]   ;;  %v3985_v42 = vld [vmem:[#allocation2 + $0x200] ss:$28 sps:$4 sm:$0xff]  }
  0x22   :  { %846 = vmatpush1.bf16.msra.mxu0 %v3946_v15  ;;  %1017 = vmatpush1.bf16.msra.mxu1 %v3949_v17  ;;  %v3989_v43 = vld [vmem:[#allocation2 + $0x23c] ss:$28 sps:$4 sm:$0xff]   ;;  %v3992_v45 = vld [vmem:[#allocation2 + $0x26c] ss:$28 sps:$4 sm:$0xff]   ;;  %v3995_v47 = vld [vmem:[#allocation2 + $0x274] ss:$28 sps:$4 sm:$0xff]  }
  0x23   :  { %847 = vmatprep.subr.bf16.mxu0 %v3950_v16  ;;  %1018 = vmatprep.subr.bf16.mxu1 %v3953_v18  ;;  %v3991_v46 = vld [vmem:[#allocation2 + $0x238] ss:$28 sps:$4 sm:$0xff]   ;;  %v3994_v48 = vld [vmem:[#allocation2 + $0x268] ss:$28 sps:$4 sm:$0xff]   ;;  %v3997_v49 = vld [vmem:[#allocation2 + $0x270] ss:$28 sps:$4 sm:$0xff]  }
  0x24   :  { %3855 = vmatprep.mubr.msk.bf16.mxu0 %vm774_vm0, %v4252_v41  ;;  %3870 = vmatprep.mubr.msk.bf16.mxu1 %vm774_vm0, %v4252_v41  ;;  %v3998_v50 = vld [vmem:[#allocation2 + $0x2a4] ss:$28 sps:$4 sm:$0xff]   ;;  %v161_v51 = vld [vmem:[#allocation2 + $0x2d8] sm:$0xff]  ;;  %v4001_v52 = vld [vmem:[#allocation2 + $0x2ac] ss:$28 sps:$4 sm:$0xff]   ;;  %vm817_vm1 = vcmask 1043456  }
  0x25   :  { %v4000_v53 = vld [vmem:[#allocation2 + $0x2a0] ss:$28 sps:$4 sm:$0xff]   ;;  %v3848_v55 = vcombine.high %v161_v51, %v161_v51  ;;  %v3847_v56 = vcombine.low %v161_v51, %v161_v51  ;;  %v4003_v57 = vld [vmem:[#allocation2 + $0x2a8] ss:$28 sps:$4 sm:$0xff]   ;;  %v4013_v61 = vld [vmem:[#allocation2 + $0x14] ss:$28 sps:$4 sm:$0xff]  }
  0x26   :  { %848 = vmatpush1.bf16.msra.mxu0 %v3952_v19  ;;  %1019 = vmatpush1.bf16.msra.mxu1 %v3955_v21  ;;  %v162_v54 = vld [vmem:[#allocation2 + $0x2e0] sm:$0xff]  ;;  %v4011_v1 = vld [vmem:[#allocation2 + $0x10] ss:$28 sps:$4 sm:$0xff]   ;;  %v4270_v2 = vld [vmem:[%s6753_s0 + $0x14] ss:$8 sps:$4 sm:$0xff]   ;;  %vm1501_vm2 = vcmask 130048  }
  0x27   :  { %849 = vmatprep.subr.bf16.mxu0 %v3956_v20  ;;  %1020 = vmatprep.subr.bf16.mxu1 %v3959_v22  ;;  %v3850_v58 = vcombine.high %v162_v54, %v162_v54  ;;  %v3849_v59 = vcombine.low %v162_v54, %v162_v54  ;;  %v819_v60 = vsel %vm817_vm1, %v3847_v56, 0  ;;  %v4265_v63 = vld [vmem:[%s6753_s0] ss:$8 sps:$4 sm:$0xff]   ;;  %v4014_v4 = vld [vmem:[#allocation2 + $0x18] ss:$28 sps:$4 sm:$0xff]   ;;  %s4210_s26 = smov 1  }
  0x28   :  { %v4020_v3 = vld [vmem:[#allocation2 + $0x4c] ss:$28 sps:$4 sm:$0xff]   ;;  %v4027_v6 = vld [vmem:[#allocation2 + $0x84] ss:$28 sps:$4 sm:$0xff]   ;;  %v4282_v8 = vld [vmem:[%s6753_s0 + $0x10] ss:$8 sps:$4 sm:$0xff]  }
  0x29   :  { %v825_v62 = vsel %vm817_vm1, %v3849_v59, 0  ;;  %v4018_v5 = vld [vmem:[#allocation2 + $0x48] ss:$28 sps:$4 sm:$0xff]   ;;  %v4021_v7 = vld [vmem:[#allocation2 + $0x50] ss:$28 sps:$4 sm:$0xff]  }
  0x2a   :  { %850 = vmatpush1.bf16.msra.mxu0 %v3958_v23  ;;  %1021 = vmatpush1.bf16.msra.mxu1 %v3961_v25  ;;  %v4288_v9 = vld [vmem:[%s6753_s0 + $0x24] ss:$8 sps:$4 sm:$0xff]   ;;  %v4025_v10 = vld [vmem:[#allocation2 + $0x80] ss:$28 sps:$4 sm:$0xff]   ;;  %v4032_v13 = vld [vmem:[#allocation2 + $0xb8] ss:$28 sps:$4 sm:$0xff]  }
  0x2b   :  { %851 = vmatprep.subr.bf16.mxu0 %v3962_v24  ;;  %1022 = vmatprep.subr.bf16.mxu1 %v3965_v26  ;;  %v4034_v11 = vld [vmem:[#allocation2 + $0xbc] ss:$28 sps:$4 sm:$0xff]   ;;  %v4028_v12 = vld [vmem:[#allocation2 + $0x88] ss:$28 sps:$4 sm:$0xff]   ;;  %v4041_v14 = vld [vmem:[#allocation2 + $0xf4] ss:$28 sps:$4 sm:$0xff]  }
  0x2c   :  { %v4035_v15 = vld [vmem:[#allocation2 + $0xc0] ss:$28 sps:$4 sm:$0xff]   ;;  %v4039_v18 = vld [vmem:[#allocation2 + $0xf0] ss:$28 sps:$4 sm:$0xff]   ;;  %v4042_v20 = vld [vmem:[#allocation2 + $0xf8] ss:$28 sps:$4 sm:$0xff]  }
  0x2d   :  { %v4300_v16 = vld [vmem:[%s6753_s0 + $0x20] ss:$8 sps:$4 sm:$0xff]   ;;  %v4305_v17 = vld [vmem:[%s6753_s0 + $0x34] ss:$8 sps:$4 sm:$0xff]   ;;  %v4316_v22 = vld [vmem:[%s6753_s0 + $0x30] ss:$8 sps:$4 sm:$0xff]  }
  0x2e   :  { %852 = vmatpush1.bf16.msra.mxu0 %v3964_v27  ;;  %1023 = vmatpush1.bf16.msra.mxu1 %v3967_v29  ;;  %v4048_v19 = vld [vmem:[#allocation2 + $0x12c] ss:$28 sps:$4 sm:$0xff]   ;;  %v4055_v23 = vld [vmem:[#allocation2 + $0x164] ss:$28 sps:$4 sm:$0xff]   ;;  %v4062_v27 = vld [vmem:[#allocation2 + $0x19c] ss:$28 sps:$4 sm:$0xff]  }
  0x2f   :  { %853 = vmatprep.subr.bf16.mxu0 %v3968_v28  ;;  %1024 = vmatprep.subr.bf16.mxu1 %v3971_v30  ;;  %v4046_v21 = vld [vmem:[#allocation2 + $0x128] ss:$28 sps:$4 sm:$0xff]   ;;  %v4049_v24 = vld [vmem:[#allocation2 + $0x130] ss:$28 sps:$4 sm:$0xff]   ;;  %v4053_v26 = vld [vmem:[#allocation2 + $0x160] ss:$28 sps:$4 sm:$0xff]  }
  0x30   :  { %v4323_v25 = vld [vmem:[%s6753_s0 + $0x44] ss:$8 sps:$4 sm:$0xff]   ;;  %v4060_v29 = vld [vmem:[#allocation2 + $0x198] ss:$28 sps:$4 sm:$0xff]   ;;  %v4103_v56 = vld [vmem:[#allocation2 + $0x2f0] ss:$0 sps:$4 sm:$0xff]  }
  0x31   :  { %v4056_v28 = vld [vmem:[#allocation2 + $0x168] ss:$28 sps:$4 sm:$0xff]   ;;  %v4069_v30 = vld [vmem:[#allocation2 + $0x1d4] ss:$28 sps:$4 sm:$0xff]   ;;  %v837_v59 = vsel %vm817_vm1, %v4103_v56, 0 }
  0x32   :  { %854 = vmatpush1.bf16.msra.mxu0 %v3970_v31  ;;  %1025 = vmatpush1.bf16.msra.mxu1 %v3973_v33  ;;  %v4063_v31 = vld [vmem:[#allocation2 + $0x1a0] ss:$28 sps:$4 sm:$0xff]  }
  0x33   :  { %855 = vmatprep.subr.bf16.mxu0 %v3974_v32  ;;  %1026 = vmatprep.subr.bf16.mxu1 %v3977_v34  ;;  %v4336_v32 = vld [vmem:[%s6753_s0 + $0x40] ss:$8 sps:$4 sm:$0xff]   ;;  %v4342_v33 = vld [vmem:[%s6753_s0 + $0x54] ss:$8 sps:$4 sm:$0xff]   ;;  %v4067_v34 = vld [vmem:[#allocation2 + $0x1d0] ss:$28 sps:$4 sm:$0xff]  }
  0x34   :  { %v4378_v51 = vld [vmem:[%s6753_s0 + $0x74] ss:$8 sps:$4 sm:$0xff]  }
  0x36   :  { %856 = vmatpush1.bf16.msra.mxu0 %v3976_v35  ;;  %1027 = vmatpush1.bf16.msra.mxu1 %v3979_v37  ;;  %v4076_v35 = vld [vmem:[#allocation2 + $0x20c] ss:$28 sps:$4 sm:$0xff]  }
  0x37   :  { %857 = vmatprep.subr.bf16.mxu0 %v3980_v36  ;;  %1028 = vmatprep.subr.bf16.mxu1 %v3983_v38  ;;  %v4070_v36 = vld [vmem:[#allocation2 + $0x1d8] ss:$28 sps:$4 sm:$0xff]   ;;  %v4074_v37 = vld [vmem:[#allocation2 + $0x208] ss:$28 sps:$4 sm:$0xff]  }
  0x38   :  { %v4083_v38 = vld [vmem:[#allocation2 + $0x244] ss:$28 sps:$4 sm:$0xff]  }
  0x3a   :  { %858 = vmatpush1.bf16.msra.mxu0 %v3982_v39  ;;  %1029 = vmatpush1.bf16.msra.mxu1 %v3985_v42  ;;  %v4077_v39 = vld [vmem:[#allocation2 + $0x210] ss:$28 sps:$4 sm:$0xff]  }
  0x3b   :  { %859 = vmatprep.subr.bf16.mxu0 %v3986_v40  ;;  %1030 = vmatprep.subr.bf16.mxu1 %v3989_v43  ;;  %v4354_v40 = vld [vmem:[%s6753_s0 + $0x50] ss:$8 sps:$4 sm:$0xff]   ;;  %v4360_v42 = vld [vmem:[%s6753_s0 + $0x64] ss:$8 sps:$4 sm:$0xff]   ;;  %v4081_v43 = vld [vmem:[#allocation2 + $0x240] ss:$28 sps:$4 sm:$0xff]  }
  0x3e   :  { %860 = vmatpush1.bf16.msra.mxu0 %v3988_v44  ;;  %1031 = vmatpush1.bf16.msra.mxu1 %v3991_v46  ;;  %v4090_v44 = vld [vmem:[#allocation2 + $0x27c] ss:$28 sps:$4 sm:$0xff]  }
  0x3f   :  { %861 = vmatprep.subr.bf16.mxu0 %v3992_v45  ;;  %1032 = vmatprep.subr.bf16.mxu1 %v3995_v47  ;;  %v4084_v45 = vld [vmem:[#allocation2 + $0x248] ss:$28 sps:$4 sm:$0xff]   ;;  %v4088_v46 = vld [vmem:[#allocation2 + $0x278] ss:$28 sps:$4 sm:$0xff]  }
  0x40   :  { %v4097_v47 = vld [vmem:[#allocation2 + $0x2b4] ss:$28 sps:$4 sm:$0xff]  }
  0x42   :  { %862 = vmatpush1.bf16.msra.mxu0 %v3994_v48  ;;  %1033 = vmatpush1.bf16.msra.mxu1 %v3997_v49  ;;  %v4091_v48 = vld [vmem:[#allocation2 + $0x280] ss:$28 sps:$4 sm:$0xff]   ;;  %v163_v49 = vld [vmem:[#allocation2 + $0x2e8] sm:$0xff] }
  0x43   :  { %863 = vmatprep.subr.bf16.mxu0 %v3998_v50  ;;  %1034 = vmatprep.subr.bf16.mxu1 %v4001_v52  ;;  %v4372_v50 = vld [vmem:[%s6753_s0 + $0x60] ss:$8 sps:$4 sm:$0xff]   ;;  %v4095_v52 = vld [vmem:[#allocation2 + $0x2b0] ss:$28 sps:$4 sm:$0xff]   ;;  %v3851_v54 = vcombine.low %v163_v49, %v163_v49 }
  0x46   :  { %864 = vmatpush1.bf16.msra.mxu0 %v4000_v53  ;;  %1035 = vmatpush1.bf16.msra.mxu1 %v4003_v57  ;;  %v3852_v53 = vcombine.high %v163_v49, %v163_v49  ;;  %v831_v57 = vsel %vm817_vm1, %v3851_v54, 0 }
  0x47   :  { %3854 = vmatprep.subr.msk.bf16.mxu0 %vm817_vm1, %v3848_v55  ;;  %3869 = vmatprep.subr.msk.bf16.mxu1 %vm817_vm1, %v3850_v58  ;;  %v4098_v55 = vld [vmem:[#allocation2 + $0x2b8] ss:$28 sps:$4 sm:$0xff]  }
  0x48   :  { %v4392_v58 = vld [vmem:[%s6753_s0 + $0x70] ss:$8 sps:$4 sm:$0xff]  }
  0x4a   :  { %866 = vmatpush1.bf16.msra.mxu0 %v819_v60  ;;  %1037 = vmatpush1.bf16.msra.mxu1 %v825_v62  ;;  %v4399_v60 = vld [vmem:[%s6753_s0 + $0x84] ss:$8 sps:$4 sm:$0xff]   ;;  %v4426_v62 = vld [vmem:[%s6753_s0 + $0x90] ss:$8 sps:$4 sm:$0xff]  }
  0x4b   :  { %1181 = vmatprep.subr.bf16.mxu0 %v4013_v61  ;;  %1352 = vmatprep.subr.bf16.mxu1 %v4209_v0  ;;  %v4415_v61 = vld [vmem:[%s6753_s0 + $0x94] ss:$8 sps:$4 sm:$0xff]  }
  0x4d   :  { %872 = vmatmul.mubr.bf16.vlgmr.msra.gmra.mrb[0].mxu0 %v4265_v63  ;;  %1043 = vmatmul.mubr.bf16.vlgmr.msra.gmra.mrb[0].mxu1 %v4265_v63 }
  0x4e   :  { %1182 = vmatpush1.bf16.msra.mxu0 %v4011_v1  ;;  %3856 = vmatprep.mubr.msk.bf16.mxu0 %vm774_vm0, %v4270_v2  ;;  %v4431_v1 = vld [vmem:[%s6753_s0 + $0xa4] ss:$8 sps:$4 sm:$0xff]  }
  0x4f   :  { %1183 = vmatprep.subr.bf16.mxu0 %v4020_v3  ;;  %1353 = vmatpush1.bf16.msra.mxu1 %v4014_v4  ;;  %v4442_v3 = vld [vmem:[%s6753_s0 + $0xa0] ss:$8 sps:$4 sm:$0xff]   ;;  %v4447_v4 = vld [vmem:[%s6753_s0 + $0xb4] ss:$8 sps:$4 sm:$0xff]  }
  0x50   :  { %3871 = vmatprep.mubr.msk.bf16.mxu1 %vm774_vm0, %v4270_v2  ;;  %1354 = vmatprep.subr.bf16.mxu1 %v4209_v0 }
  0x52   :  { %1184 = vmatpush1.bf16.msra.mxu0 %v4018_v5  ;;  %v4458_v5 = vld [vmem:[%s6753_s0 + $0xb0] ss:$8 sps:$4 sm:$0xff]  }
  0x53   :  { %1185 = vmatprep.subr.bf16.mxu0 %v4027_v6  ;;  %1355 = vmatpush1.bf16.msra.mxu1 %v4021_v7  ;;  %v4463_v6 = vld [vmem:[%s6753_s0 + $0xc4] ss:$8 sps:$4 sm:$0xff]   ;;  %v56_v7 = vld [vmem:[%s6753_s0 + $0xd0] sm:$0xff] }
  0x54   :  { %1356 = vmatprep.subr.bf16.mxu1 %v4209_v0 }
  0x55   :  { %882 = vmatmul.mubr.bf16.gmra.mrb[4].mxu0 %v4282_v8  ;;  %1053 = vmatmul.mubr.bf16.gmra.mrb[4].mxu1 %v4282_v8 }
  0x56   :  { %3857 = vmatprep.mubr.msk.bf16.mxu0 %vm774_vm0, %v4288_v9  ;;  %1186 = vmatpush1.bf16.msra.mxu0 %v4025_v10  ;;  %v4094_v10 = vld [vmem:[%s6753_s0 + $0xc0] ss:$8 sps:$4 sm:$0xff]  }
  0x57   :  { %1187 = vmatprep.subr.bf16.mxu0 %v4034_v11  ;;  %3872 = vmatprep.mubr.msk.bf16.mxu1 %vm774_vm0, %v4288_v9  ;;  %v3755_v11 = vcombine.high %v56_v7, %v56_v7 }
  0x58   :  { %1357 = vmatpush1.bf16.msra.mxu1 %v4028_v12  ;;  %v4479_v12 = vcombine.low %v56_v7, %v56_v7 }
  0x59   :  { %1358 = vmatprep.subr.bf16.mxu1 %v4209_v0 }
  0x5a   :  { %1188 = vmatpush1.bf16.msra.mxu0 %v4032_v13 }
  0x5b   :  { %1189 = vmatprep.subr.bf16.mxu0 %v4041_v14 }
  0x5c   :  { %1359 = vmatpush1.bf16.msra.mxu1 %v4035_v15 }
  0x5d   :  { %892 = vmatmul.mubr.bf16.gmra.mrb[8].mxu0 %v4300_v16  ;;  %1360 = vmatprep.subr.bf16.mxu1 %v4209_v0 }
  0x5e   :  { %3858 = vmatprep.mubr.msk.bf16.mxu0 %vm774_vm0, %v4305_v17  ;;  %1190 = vmatpush1.bf16.msra.mxu0 %v4039_v18 }
  0x5f   :  { %1063 = vmatmul.mubr.bf16.gmra.mrb[8].mxu1 %v4300_v16  ;;  %1191 = vmatprep.subr.bf16.mxu0 %v4048_v19 }
  0x60   :  { %3873 = vmatprep.mubr.msk.bf16.mxu1 %vm774_vm0, %v4305_v17  ;;  %1361 = vmatpush1.bf16.msra.mxu1 %v4042_v20 }
  0x61   :  { %1362 = vmatprep.subr.bf16.mxu1 %v4209_v0 }
  0x62   :  { %1192 = vmatpush1.bf16.msra.mxu0 %v4046_v21 }
  0x63   :  { %1193 = vmatprep.subr.bf16.mxu0 %v4055_v23 }
  0x64   :  { %1363 = vmatpush1.bf16.msra.mxu1 %v4049_v24 }
  0x65   :  { %902 = vmatmul.mubr.bf16.gmra.mrb[12].mxu0 %v4316_v22  ;;  %1364 = vmatprep.subr.bf16.mxu1 %v4209_v0 }
  0x66   :  { %3859 = vmatprep.mubr.msk.bf16.mxu0 %vm774_vm0, %v4323_v25  ;;  %1194 = vmatpush1.bf16.msra.mxu0 %v4053_v26 }
  0x67   :  { %1073 = vmatmul.mubr.bf16.gmra.mrb[12].mxu1 %v4316_v22  ;;  %1195 = vmatprep.subr.bf16.mxu0 %v4062_v27 }
  0x68   :  { %3874 = vmatprep.mubr.msk.bf16.mxu1 %vm774_vm0, %v4323_v25  ;;  %1365 = vmatpush1.bf16.msra.mxu1 %v4056_v28 }
  0x69   :  { %1366 = vmatprep.subr.bf16.mxu1 %v4209_v0 }
  0x6a   :  { %1196 = vmatpush1.bf16.msra.mxu0 %v4060_v29 }
  0x6b   :  { %1197 = vmatprep.subr.bf16.mxu0 %v4069_v30 }
  0x6c   :  { %1367 = vmatpush1.bf16.msra.mxu1 %v4063_v31 }
  0x6d   :  { %912 = vmatmul.mubr.bf16.gmra.mrb[16].mxu0 %v4336_v32  ;;  %1368 = vmatprep.subr.bf16.mxu1 %v4209_v0 }
  0x6e   :  { %3860 = vmatprep.mubr.msk.bf16.mxu0 %vm774_vm0, %v4342_v33  ;;  %1198 = vmatpush1.bf16.msra.mxu0 %v4067_v34 }
  0x6f   :  { %1083 = vmatmul.mubr.bf16.gmra.mrb[16].mxu1 %v4336_v32  ;;  %1199 = vmatprep.subr.bf16.mxu0 %v4076_v35 }
  0x70   :  { %3875 = vmatprep.mubr.msk.bf16.mxu1 %vm774_vm0, %v4342_v33  ;;  %1369 = vmatpush1.bf16.msra.mxu1 %v4070_v36 }
  0x71   :  { %1370 = vmatprep.subr.bf16.mxu1 %v4209_v0 }
  0x72   :  { %1200 = vmatpush1.bf16.msra.mxu0 %v4074_v37 }
  0x73   :  { %1201 = vmatprep.subr.bf16.mxu0 %v4083_v38 }
  0x74   :  { %1371 = vmatpush1.bf16.msra.mxu1 %v4077_v39 }
  0x75   :  { %922 = vmatmul.mubr.bf16.gmra.mrb[20].mxu0 %v4354_v40  ;;  %1372 = vmatprep.subr.bf16.mxu1 %v4209_v0 }
  0x76   :  { %3861 = vmatprep.mubr.msk.bf16.mxu0 %vm774_vm0, %v4360_v42  ;;  %1202 = vmatpush1.bf16.msra.mxu0 %v4081_v43 }
  0x77   :  { %1093 = vmatmul.mubr.bf16.gmra.mrb[20].mxu1 %v4354_v40  ;;  %1203 = vmatprep.subr.bf16.mxu0 %v4090_v44 }
  0x78   :  { %3876 = vmatprep.mubr.msk.bf16.mxu1 %vm774_vm0, %v4360_v42  ;;  %1373 = vmatpush1.bf16.msra.mxu1 %v4084_v45 }
  0x79   :  { %1374 = vmatprep.subr.bf16.mxu1 %v4209_v0 }
  0x7a   :  { %1204 = vmatpush1.bf16.msra.mxu0 %v4088_v46 }
  0x7b   :  { %1205 = vmatprep.subr.bf16.mxu0 %v4097_v47 }
  0x7c   :  { %1375 = vmatpush1.bf16.msra.mxu1 %v4091_v48 }
  0x7d   :  { %932 = vmatmul.mubr.bf16.gmra.mrb[24].mxu0 %v4372_v50  ;;  %1376 = vmatprep.subr.bf16.mxu1 %v4209_v0 }
  0x7e   :  { %3862 = vmatprep.mubr.msk.bf16.mxu0 %vm774_vm0, %v4378_v51  ;;  %1206 = vmatpush1.bf16.msra.mxu0 %v4095_v52 }
  0x7f   :  { %1103 = vmatmul.mubr.bf16.gmra.mrb[24].mxu1 %v4372_v50  ;;  %3884 = vmatprep.subr.msk.bf16.mxu0 %vm817_vm1, %v3852_v53 }
  0x80   :  { %3877 = vmatprep.mubr.msk.bf16.mxu1 %vm774_vm0, %v4378_v51  ;;  %1377 = vmatpush1.bf16.msra.mxu1 %v4098_v55 }
  0x81   :  { %1378 = vmatprep.subr.bf16.mxu1 %v4209_v0  ;;  %v4410_v0 = vld [vmem:[%s6753_s0 + $0x80] ss:$8 sps:$4 sm:$0xff]  }
  0x82   :  { %1208 = vmatpush1.bf16.msra.mxu0 %v831_v57 }
  0x84   :  { %1379 = vmatpush1.bf16.msra.mxu1 %v837_v59 }
  0x85   :  { %942 = vmatmul.mubr.bf16.gmra.mrb[28].mxu0 %v4392_v58 }
  0x86   :  { %3863 = vmatprep.mubr.msk.bf16.mxu0 %vm774_vm0, %v4399_v60 }
  0x87   :  { %1113 = vmatmul.mubr.bf16.gmra.mrb[28].mxu1 %v4392_v58 }
  0x88   :  { %3878 = vmatprep.mubr.msk.bf16.mxu1 %vm774_vm0, %v4399_v60 }
  0x8d   :  { %952 = vmatmul.mubr.bf16.gmra.mrb[32].mxu0 %v4410_v0 }
  0x8e   :  { %3864 = vmatprep.mubr.msk.bf16.mxu0 %vm774_vm0, %v4415_v61 }
  0x8f   :  { %1123 = vmatmul.mubr.bf16.gmra.mrb[32].mxu1 %v4410_v0 }
  0x90   :  { %3879 = vmatprep.mubr.msk.bf16.mxu1 %vm774_vm0, %v4415_v61 }
  0x95   :  { %962 = vmatmul.mubr.bf16.gmra.mrb[36].mxu0 %v4426_v62 }
  0x96   :  { %3865 = vmatprep.mubr.msk.bf16.mxu0 %vm774_vm0, %v4431_v1 }
  0x97   :  { %1133 = vmatmul.mubr.bf16.gmra.mrb[36].mxu1 %v4426_v62 }
  0x98   :  { %3880 = vmatprep.mubr.msk.bf16.mxu1 %vm774_vm0, %v4431_v1 }
  0x9d   :  { %972 = vmatmul.mubr.bf16.gmra.mrb[40].mxu0 %v4442_v3 }
  0x9e   :  { %3866 = vmatprep.mubr.msk.bf16.mxu0 %vm774_vm0, %v4447_v4 }
  0x9f   :  { %1143 = vmatmul.mubr.bf16.gmra.mrb[40].mxu1 %v4442_v3 }
  0xa0   :  { %3881 = vmatprep.mubr.msk.bf16.mxu1 %vm774_vm0, %v4447_v4 }
  0xa5   :  { %982 = vmatmul.mubr.bf16.gmra.mrb[44].mxu0 %v4458_v5 }
  0xa6   :  { %3867 = vmatprep.mubr.msk.bf16.mxu0 %vm774_vm0, %v4463_v6 }
  0xa7   :  { %1153 = vmatmul.mubr.bf16.gmra.mrb[44].mxu1 %v4458_v5 }
  0xa8   :  { %3882 = vmatprep.mubr.msk.bf16.mxu1 %vm774_vm0, %v4463_v6 }
  0xad   :  { %992 = vmatmul.mubr.bf16.gmra.mrb[48].mxu0 %v4094_v10 }
  0xae   :  { %3868 = vmatprep.mubr.msk.bf16.mxu0 %vm774_vm0, %v3755_v11 }
  0xaf   :  { %1163 = vmatmul.mubr.bf16.gmra.mrb[48].mxu1 %v4094_v10 }
  0xb0   :  { %3883 = vmatprep.mubr.msk.bf16.mxu1 %vm774_vm0, %v3755_v11 }
  0xb5   :  { %1002 = vmatmul.mubr.bf16.gmra.mrb[52].mxu0 %v4479_v12 }
  0xb6   :  { %3885 = vmatprep.mubr.msk.bf16.mxu0 %vm774_vm0, %v4252_v41 }
  0xb7   :  { %1173 = vmatmul.mubr.bf16.gmra.mrb[52].mxu1 %v4479_v12 }
  0xb8   :  { %3899 = vmatprep.mubr.msk.bf16.mxu1 %vm774_vm0, %v4252_v41 }
  0xbd   :  { %1214 = vmatmul.mubr.bf16.vlgmr.msra.gmra.mrb[56].mxu0 %v4265_v63 }
  0xbe   :  { %3886 = vmatprep.mubr.msk.bf16.mxu0 %vm774_vm0, %v4270_v2 }
  0xbf   :  { %1385 = vmatmul.mubr.bf16.vlgmr.msra.gmra.mrb[56].mxu1 %v4265_v63 }
  0xc0   :  { %3900 = vmatprep.mubr.msk.bf16.mxu1 %vm774_vm0, %v4270_v2 }
  0xc5   :  { %1224 = vmatmul.mubr.bf16.gmra.mrb[60].mxu0 %v4282_v8 }
  0xc6   :  { %3887 = vmatprep.mubr.msk.bf16.mxu0 %vm774_vm0, %v4288_v9 }
  0xc7   :  { %1393 = vmatmul.mubr.bf16.gmra.mrb[60].mxu1 %v4282_v8 }
  0xc8   :  { %3901 = vmatprep.mubr.msk.bf16.mxu1 %vm774_vm0, %v4288_v9 }
  0xcd   :  { %1234 = vmatmul.mubr.bf16.gmra.mrb[64].mxu0 %v4300_v16 }
  0xce   :  { %3888 = vmatprep.mubr.msk.bf16.mxu0 %vm774_vm0, %v4305_v17 }
  0xcf   :  { %1401 = vmatmul.mubr.bf16.gmra.mrb[64].mxu1 %v4300_v16 }
  0xd0   :  { %3902 = vmatprep.mubr.msk.bf16.mxu1 %vm774_vm0, %v4305_v17 }
  0xd5   :  { %1244 = vmatmul.mubr.bf16.gmra.mrb[68].mxu0 %v4316_v22 }
  0xd6   :  { %3889 = vmatprep.mubr.msk.bf16.mxu0 %vm774_vm0, %v4323_v25 }
  0xd7   :  { %1409 = vmatmul.mubr.bf16.gmra.mrb[68].mxu1 %v4316_v22 }
  0xd8   :  { %3903 = vmatprep.mubr.msk.bf16.mxu1 %vm774_vm0, %v4323_v25 }
  0xdd   :  { %1254 = vmatmul.mubr.bf16.gmra.mrb[72].mxu0 %v4336_v32 }
  0xde   :  { %3890 = vmatprep.mubr.msk.bf16.mxu0 %vm774_vm0, %v4342_v33 }
  0xdf   :  { %1417 = vmatmul.mubr.bf16.gmra.mrb[72].mxu1 %v4336_v32 }
  0xe0   :  { %3904 = vmatprep.mubr.msk.bf16.mxu1 %vm774_vm0, %v4342_v33 }
  0xe5   :  { %1264 = vmatmul.mubr.bf16.gmra.mrb[76].mxu0 %v4354_v40 }
  0xe6   :  { %3891 = vmatprep.mubr.msk.bf16.mxu0 %vm774_vm0, %v4360_v42 }
  0xe7   :  { %1425 = vmatmul.mubr.bf16.gmra.mrb[76].mxu1 %v4354_v40 }
  0xe8   :  { %3905 = vmatprep.mubr.msk.bf16.mxu1 %vm774_vm0, %v4360_v42 }
  0xed   :  { %1274 = vmatmul.mubr.bf16.gmra.mrb[80].mxu0 %v4372_v50 }
  0xee   :  { %3892 = vmatprep.mubr.msk.bf16.mxu0 %vm774_vm0, %v4378_v51 }
  0xef   :  { %1433 = vmatmul.mubr.bf16.gmra.mrb[80].mxu1 %v4372_v50 }
  0xf0   :  { %3906 = vmatprep.mubr.msk.bf16.mxu1 %vm774_vm0, %v4378_v51 }
  0xf5   :  { %1284 = vmatmul.mubr.bf16.gmra.mrb[84].mxu0 %v4392_v58 }
  0xf6   :  { %3893 = vmatprep.mubr.msk.bf16.mxu0 %vm774_vm0, %v4399_v60 }
  0xf7   :  { %1441 = vmatmul.mubr.bf16.gmra.mrb[84].mxu1 %v4392_v58 }
  0xf8   :  { %3907 = vmatprep.mubr.msk.bf16.mxu1 %vm774_vm0, %v4399_v60 }
  0xfd   :  { %1294 = vmatmul.mubr.bf16.gmra.mrb[88].mxu0 %v4410_v0 }
  0xfe   :  { %3894 = vmatprep.mubr.msk.bf16.mxu0 %vm774_vm0, %v4415_v61 }
  0xff   :  { %1449 = vmatmul.mubr.bf16.gmra.mrb[88].mxu1 %v4410_v0 }
 0x100   :  { %3908 = vmatprep.mubr.msk.bf16.mxu1 %vm774_vm0, %v4415_v61 }
 0x105   :  { %1304 = vmatmul.mubr.bf16.gmra.mrb[92].mxu0 %v4426_v62 }
 0x106   :  { %3895 = vmatprep.mubr.msk.bf16.mxu0 %vm774_vm0, %v4431_v1 }
 0x107   :  { %1457 = vmatmul.mubr.bf16.gmra.mrb[92].mxu1 %v4426_v62 }
 0x108   :  { %3909 = vmatprep.mubr.msk.bf16.mxu1 %vm774_vm0, %v4431_v1 }
 0x10d   :  { %1314 = vmatmul.mubr.bf16.gmra.mrb[96].mxu0 %v4442_v3 }
 0x10e   :  { %3896 = vmatprep.mubr.msk.bf16.mxu0 %vm774_vm0, %v4447_v4 }
 0x10f   :  { %1465 = vmatmul.mubr.bf16.gmra.mrb[96].mxu1 %v4442_v3 }
 0x110   :  { %3910 = vmatprep.mubr.msk.bf16.mxu1 %vm774_vm0, %v4447_v4 }
 0x115   :  { %1324 = vmatmul.mubr.bf16.gmra.mrb[100].mxu0 %v4458_v5 }
 0x116   :  { %3897 = vmatprep.mubr.msk.bf16.mxu0 %vm774_vm0, %v4463_v6 }
 0x117   :  { %1473 = vmatmul.mubr.bf16.gmra.mrb[100].mxu1 %v4458_v5 }
 0x118   :  { %3911 = vmatprep.mubr.msk.bf16.mxu1 %vm774_vm0, %v4463_v6 }
 0x11d   :  { %1334 = vmatmul.mubr.bf16.gmra.mrb[104].mxu0 %v4094_v10 }
 0x11e   :  { %3898 = vmatprep.mubr.msk.bf16.mxu0 %vm774_vm0, %v3755_v11 }
 0x11f   :  { %1481 = vmatmul.mubr.bf16.gmra.mrb[104].mxu1 %v4094_v10 }
 0x120   :  { %v4560_v41 = vpop.f32.mrb[0].mxu0  ;;  %3912 = vmatprep.mubr.msk.bf16.mxu1 %vm774_vm0, %v3755_v11  ;;  %v4567_v8 = vpop.f32.mrb[0].mxu1 }
 0x121   :  { %7081 = vst [vmem:[#allocation8_spill] sm:$0xff] %v4560_v41  ;;  %v4563_v63 = vpop.f32.mrb[1].mxu0  ;;  %7083 = vst [vmem:[#allocation10_spill] sm:$0xff] %v4567_v8  ;;  %v4571_v13 = vpop.f32.mrb[1].mxu1 }
 0x122   :  { %7082 = vst [vmem:[#allocation9_spill] sm:$0xff] %v4563_v63  ;;  %v1496_v2 = vadd.f32 %v4563_v63, %v4560_v41  ;;  %v4569_v9 = vpop.f32.mrb[2].mxu0  ;;  %7085 = vst [vmem:[#allocation12_spill] sm:$0xff] %v4571_v13  ;;  %v4578_v17 = vpop.f32.mrb[2].mxu1 }
 0x123   :  { %7084 = vst [vmem:[#allocation11_spill] sm:$0xff] %v4569_v9  ;;  %v4573_v14 = vpop.f32.mrb[3].mxu0  ;;  %7087 = vst [vmem:[#allocation14_spill] sm:$0xff] %v4578_v17  ;;  %v4580_v18 = vpop.f32.mrb[3].mxu1 }
 0x124   :  { %7086 = vst [vmem:[#allocation13_spill] sm:$0xff] %v4573_v14  ;;  %v1497_v15 = vadd.f32 %v1496_v2, %v4567_v8  ;;  %v1506_v16 = vadd.f32 %v4573_v14, %v4569_v9  ;;  %7088 = vst [vmem:[#allocation15_spill] sm:$0xff] %v4580_v18 }
 0x125   :  { %1344 = vmatmul.mubr.bf16.gmra.mrb[108].mxu0 %v4479_v12 }
 0x126   :  { %v4584_v19 = vadd.f32 %v1497_v15, %v4571_v13  ;;  %v1507_v20 = vadd.f32 %v1506_v16, %v4578_v17 }
 0x127   :  { %1489 = vmatmul.mubr.bf16.gmra.mrb[108].mxu1 %v4479_v12 }
 0x128   :  { %v4589_v21 = vadd.f32 %v1507_v20, %v4580_v18  ;;  %v4591_v22 = vpop.f32.mrb[4].mxu0  ;;  %v4597_v25 = vpop.f32.mrb[4].mxu1 }
 0x129   :  { %7089 = vst [vmem:[#allocation16_spill] sm:$0xff] %v4591_v22  ;;  %v4593_v23 = vpop.f32.mrb[5].mxu0  ;;  %v4601_v27 = vpop.f32.mrb[5].mxu1 }
 0x12a   :  { %v1515_v24 = vadd.f32 %v4593_v23, %v4591_v22  ;;  %v4599_v26 = vpop.f32.mrb[6].mxu0  ;;  %v4608_v31 = vpop.f32.mrb[6].mxu1 }
 0x12b   :  { %7090 = vst [vmem:[#allocation17_spill] sm:$0xff] %v4599_v26  ;;  %v4603_v28 = vpop.f32.mrb[7].mxu0  ;;  %7092 = vst [vmem:[#allocation19_spill] sm:$0xff] %v4608_v31  ;;  %v4610_v32 = vpop.f32.mrb[7].mxu1 }
 0x12c   :  { %7091 = vst [vmem:[#allocation18_spill] sm:$0xff] %v4603_v28  ;;  %v1516_v29 = vadd.f32 %v1515_v24, %v4597_v25  ;;  %v1524_v30 = vadd.f32 %v4603_v28, %v4599_v26  ;;  %7093 = vst [vmem:[#allocation20_spill] sm:$0xff] %v4610_v32 }
 0x12e   :  { %v4613_v33 = vadd.f32 %v1516_v29, %v4601_v27  ;;  %v1525_v34 = vadd.f32 %v1524_v30, %v4608_v31 }
 0x130   :  { %v4617_v35 = vadd.f32 %v1525_v34, %v4610_v32  ;;  %v4619_v36 = vpop.f32.mrb[8].mxu0 }
 0x131   :  { %7094 = vst [vmem:[#allocation21_spill] sm:$0xff] %v4619_v36  ;;  %v4621_v37 = vpop.f32.mrb[9].mxu0 }
 0x132   :  { %7095 = vst [vmem:[#allocation22_spill] sm:$0xff] %v4621_v37  ;;  %v1533_v38 = vadd.f32 %v4621_v37, %v4619_v36  ;;  %v4625_v39 = vpop.f32.mrb[8].mxu1  ;;  %v4627_v40 = vpop.f32.mrb[10].mxu0 }
 0x133   :  { %7096 = vst [vmem:[#allocation23_spill] sm:$0xff] %v4625_v39  ;;  %7097 = vst [vmem:[#allocation24_spill] sm:$0xff] %v4627_v40  ;;  %v4629_v42 = vpop.f32.mrb[9].mxu1  ;;  %v4631_v43 = vpop.f32.mrb[11].mxu0 }
 0x134   :  { %7098 = vst [vmem:[#allocation25_spill] sm:$0xff] %v4629_v42  ;;  %7099 = vst [vmem:[#allocation26_spill] sm:$0xff] %v4631_v43  ;;  %v1534_v44 = vadd.f32 %v1533_v38, %v4625_v39  ;;  %v1542_v45 = vadd.f32 %v4631_v43, %v4627_v40  ;;  %v4636_v46 = vpop.f32.mrb[10].mxu1 }
 0x135   :  { %7100 = vst [vmem:[#allocation27_spill] sm:$0xff] %v4636_v46  ;;  %v4638_v47 = vpop.f32.mrb[11].mxu1 }
 0x136   :  { %7101 = vst [vmem:[#allocation28_spill] sm:$0xff] %v4638_v47  ;;  %v4641_v48 = vadd.f32 %v1534_v44, %v4629_v42  ;;  %v1543_v49 = vadd.f32 %v1542_v45, %v4636_v46 }
 0x138   :  { %v4645_v50 = vadd.f32 %v1543_v49, %v4638_v47  ;;  %v4647_v51 = vpop.f32.mrb[12].mxu0 }
 0x139   :  { %7102 = vst [vmem:[#allocation29_spill] sm:$0xff] %v4647_v51  ;;  %v4649_v52 = vpop.f32.mrb[13].mxu0 }
 0x13a   :  { %7103 = vst [vmem:[#allocation30_spill] sm:$0xff] %v4649_v52  ;;  %v1551_v53 = vadd.f32 %v4649_v52, %v4647_v51  ;;  %v4653_v54 = vpop.f32.mrb[12].mxu1  ;;  %v4655_v55 = vpop.f32.mrb[14].mxu0 }
 0x13b   :  { %7104 = vst [vmem:[#allocation31_spill] sm:$0xff] %v4653_v54  ;;  %7105 = vst [vmem:[#allocation32_spill] sm:$0xff] %v4655_v55  ;;  %v4657_v56 = vpop.f32.mrb[13].mxu1  ;;  %v4659_v57 = vpop.f32.mrb[15].mxu0 }
 0x13c   :  { %7106 = vst [vmem:[#allocation33_spill] sm:$0xff] %v4657_v56  ;;  %7107 = vst [vmem:[#allocation34_spill] sm:$0xff] %v4659_v57  ;;  %v1552_v58 = vadd.f32 %v1551_v53, %v4653_v54  ;;  %v1560_v59 = vadd.f32 %v4659_v57, %v4655_v55  ;;  %v4664_v60 = vpop.f32.mrb[14].mxu1 }
 0x13d   :  { %7108 = vst [vmem:[#allocation35_spill] sm:$0xff] %v4664_v60  ;;  %v4666_v0 = vpop.f32.mrb[15].mxu1 }
 0x13e   :  { %7109 = vst [vmem:[#allocation36_spill] sm:$0xff] %v4666_v0  ;;  %v4669_v61 = vadd.f32 %v1552_v58, %v4657_v56  ;;  %v1561_v62 = vadd.f32 %v1560_v59, %v4664_v60 }
 0x140   :  { %v4673_v1 = vadd.f32 %v1561_v62, %v4666_v0  ;;  %v4675_v3 = vpop.f32.mrb[16].mxu0 }
 0x141   :  { %7110 = vst [vmem:[#allocation37_spill] sm:$0xff] %v4675_v3  ;;  %v4677_v4 = vpop.f32.mrb[17].mxu0 }
 0x142   :  { %7111 = vst [vmem:[#allocation38_spill] sm:$0xff] %v4677_v4  ;;  %v1569_v5 = vadd.f32 %v4677_v4, %v4675_v3  ;;  %v4681_v6 = vpop.f32.mrb[16].mxu1  ;;  %v4683_v7 = vpop.f32.mrb[18].mxu0 }
 0x143   :  { %7112 = vst [vmem:[#allocation39_spill] sm:$0xff] %v4681_v6  ;;  %7113 = vst [vmem:[#allocation40_spill] sm:$0xff] %v4683_v7  ;;  %v4685_v10 = vpop.f32.mrb[17].mxu1  ;;  %v4687_v11 = vpop.f32.mrb[19].mxu0 }
 0x144   :  { %7114 = vst [vmem:[#allocation41_spill] sm:$0xff] %v4685_v10  ;;  %7115 = vst [vmem:[#allocation42_spill] sm:$0xff] %v4687_v11  ;;  %v1570_v12 = vadd.f32 %v1569_v5, %v4681_v6  ;;  %v1578_v2 = vadd.f32 %v4687_v11, %v4683_v7  ;;  %v4692_v15 = vpop.f32.mrb[18].mxu1 }
 0x145   :  { %7116 = vst [vmem:[#allocation43_spill] sm:$0xff] %v4692_v15  ;;  %v4694_v16 = vpop.f32.mrb[19].mxu1 }
 0x146   :  { %7117 = vst [vmem:[#allocation44_spill] sm:$0xff] %v4694_v16  ;;  %v4697_v20 = vadd.f32 %v1570_v12, %v4685_v10  ;;  %v1579_v24 = vadd.f32 %v1578_v2, %v4692_v15 }
 0x148   :  { %v4701_v29 = vadd.f32 %v1579_v24, %v4694_v16  ;;  %v4703_v30 = vpop.f32.mrb[20].mxu0 }
 0x149   :  { %7118 = vst [vmem:[#allocation45_spill] sm:$0xff] %v4703_v30  ;;  %v4705_v34 = vpop.f32.mrb[21].mxu0 }
 0x14a   :  { %7119 = vst [vmem:[#allocation46_spill] sm:$0xff] %v4705_v34  ;;  %v1587_v38 = vadd.f32 %v4705_v34, %v4703_v30  ;;  %v4709_v44 = vpop.f32.mrb[20].mxu1  ;;  %v4711_v45 = vpop.f32.mrb[22].mxu0 }
 0x14b   :  { %7120 = vst [vmem:[#allocation47_spill] sm:$0xff] %v4709_v44  ;;  %7121 = vst [vmem:[#allocation48_spill] sm:$0xff] %v4711_v45  ;;  %v4713_v49 = vpop.f32.mrb[21].mxu1  ;;  %v4715_v53 = vpop.f32.mrb[23].mxu0 }
 0x14c   :  { %7122 = vst [vmem:[#allocation49_spill] sm:$0xff] %v4713_v49  ;;  %7123 = vst [vmem:[#allocation50_spill] sm:$0xff] %v4715_v53  ;;  %v1588_v58 = vadd.f32 %v1587_v38, %v4709_v44  ;;  %v1596_v59 = vadd.f32 %v4715_v53, %v4711_v45  ;;  %v4720_v62 = vpop.f32.mrb[22].mxu1 }
 0x14d   :  { %7124 = vst [vmem:[#allocation51_spill] sm:$0xff] %v4720_v62  ;;  %v4722_v5 = vpop.f32.mrb[23].mxu1 }
 0x14e   :  { %7125 = vst [vmem:[#allocation52_spill] sm:$0xff] %v4722_v5  ;;  %v4725_v12 = vadd.f32 %v1588_v58, %v4713_v49  ;;  %v1597_v2 = vadd.f32 %v1596_v59, %v4720_v62 }
 0x150   :  { %v4729_v24 = vadd.f32 %v1597_v2, %v4722_v5  ;;  %v4731_v34 = vpop.f32.mrb[24].mxu0 }
 0x151   :  { %7126 = vst [vmem:[#allocation53_spill] sm:$0xff] %v4731_v34  ;;  %v4733_v30 = vpop.f32.mrb[25].mxu0 }
 0x152   :  { %7127 = vst [vmem:[#allocation54_spill] sm:$0xff] %v4733_v30  ;;  %v1605_v38 = vadd.f32 %v4733_v30, %v4731_v34  ;;  %v4737_v53 = vpop.f32.mrb[24].mxu1  ;;  %v4739_v45 = vpop.f32.mrb[26].mxu0 }
 0x153   :  { %7128 = vst [vmem:[#allocation55_spill] sm:$0xff] %v4737_v53  ;;  %7129 = vst [vmem:[#allocation56_spill] sm:$0xff] %v4739_v45  ;;  %v4741_v44 = vpop.f32.mrb[25].mxu1  ;;  %v4743_v58 = vpop.f32.mrb[27].mxu0 }
 0x154   :  { %7130 = vst [vmem:[#allocation57_spill] sm:$0xff] %v4741_v44  ;;  %7131 = vst [vmem:[#allocation58_spill] sm:$0xff] %v4743_v58  ;;  %v1606_v59 = vadd.f32 %v1605_v38, %v4737_v53  ;;  %v1614_v2 = vadd.f32 %v4743_v58, %v4739_v45  ;;  %v4748_v5 = vpop.f32.mrb[26].mxu1 }
 0x155   :  { %7132 = vst [vmem:[#allocation59_spill] sm:$0xff] %v4748_v5  ;;  %v4750_v62 = vpop.f32.mrb[27].mxu1 }
 0x156   :  { %7133 = vst [vmem:[#allocation60_spill] sm:$0xff] %v4750_v62  ;;  %v4753_v49 = vadd.f32 %v1606_v59, %v4741_v44  ;;  %v1615_v30 = vadd.f32 %v1614_v2, %v4748_v5 }
 0x158   :  { %v4757_v34 = vadd.f32 %v1615_v30, %v4750_v62  ;;  %v4759_v16 = vpop.f32.mrb[28].mxu0 }
 0x159   :  { %7134 = vst [vmem:[#allocation61_spill] sm:$0xff] %v4759_v16  ;;  %v4761_v15 = vpop.f32.mrb[29].mxu0 }
 0x15a   :  { %7135 = vst [vmem:[#allocation62_spill] sm:$0xff] %v4761_v15  ;;  %v1623_v38 = vadd.f32 %v4761_v15, %v4759_v16  ;;  %v4765_v58 = vpop.f32.mrb[28].mxu1  ;;  %v4767_v45 = vpop.f32.mrb[30].mxu0 }
 0x15b   :  { %7136 = vst [vmem:[#allocation63_spill] sm:$0xff] %v4765_v58  ;;  %7137 = vst [vmem:[#allocation64_spill] sm:$0xff] %v4767_v45  ;;  %v4769_v53 = vpop.f32.mrb[29].mxu1  ;;  %v4771_v59 = vpop.f32.mrb[31].mxu0 }
 0x15c   :  { %7138 = vst [vmem:[#allocation65_spill] sm:$0xff] %v4769_v53  ;;  %7139 = vst [vmem:[#allocation66_spill] sm:$0xff] %v4771_v59  ;;  %v1624_v2 = vadd.f32 %v1623_v38, %v4765_v58  ;;  %v1632_v30 = vadd.f32 %v4771_v59, %v4767_v45  ;;  %v4776_v62 = vpop.f32.mrb[30].mxu1 }
 0x15d   :  { %7140 = vst [vmem:[#allocation67_spill] sm:$0xff] %v4776_v62  ;;  %v4778_v5 = vpop.f32.mrb[31].mxu1 }
 0x15e   :  { %7141 = vst [vmem:[#allocation68_spill] sm:$0xff] %v4778_v5  ;;  %v4781_v44 = vadd.f32 %v1624_v2, %v4769_v53  ;;  %v1633_v15 = vadd.f32 %v1632_v30, %v4776_v62 }
 0x160   :  { %v4785_v16 = vadd.f32 %v1633_v15, %v4778_v5  ;;  %v4787_v11 = vpop.f32.mrb[32].mxu0 }
 0x161   :  { %7142 = vst [vmem:[#allocation69_spill] sm:$0xff] %v4787_v11  ;;  %v4789_v7 = vpop.f32.mrb[33].mxu0 }
 0x162   :  { %7143 = vst [vmem:[#allocation70_spill] sm:$0xff] %v4789_v7  ;;  %v1641_v38 = vadd.f32 %v4789_v7, %v4787_v11  ;;  %v4793_v59 = vpop.f32.mrb[32].mxu1  ;;  %v4795_v45 = vpop.f32.mrb[34].mxu0 }
 0x163   :  { %7144 = vst [vmem:[#allocation71_spill] sm:$0xff] %v4793_v59  ;;  %7145 = vst [vmem:[#allocation72_spill] sm:$0xff] %v4795_v45  ;;  %v4797_v58 = vpop.f32.mrb[33].mxu1  ;;  %v4799_v2 = vpop.f32.mrb[35].mxu0 }
 0x164   :  { %7146 = vst [vmem:[#allocation73_spill] sm:$0xff] %v4797_v58  ;;  %7147 = vst [vmem:[#allocation74_spill] sm:$0xff] %v4799_v2  ;;  %v1642_v30 = vadd.f32 %v1641_v38, %v4793_v59  ;;  %v1650_v15 = vadd.f32 %v4799_v2, %v4795_v45  ;;  %v4804_v5 = vpop.f32.mrb[34].mxu1 }
 0x165   :  { %7148 = vst [vmem:[#allocation75_spill] sm:$0xff] %v4804_v5  ;;  %v4806_v62 = vpop.f32.mrb[35].mxu1 }
 0x166   :  { %7149 = vst [vmem:[#allocation76_spill] sm:$0xff] %v4806_v62  ;;  %v4809_v53 = vadd.f32 %v1642_v30, %v4797_v58  ;;  %v1651_v7 = vadd.f32 %v1650_v15, %v4804_v5 }
 0x168   :  { %v4813_v11 = vadd.f32 %v1651_v7, %v4806_v62  ;;  %v4815_v10 = vpop.f32.mrb[36].mxu0 }
 0x169   :  { %7150 = vst [vmem:[#allocation77_spill] sm:$0xff] %v4815_v10  ;;  %v4817_v6 = vpop.f32.mrb[37].mxu0 }
 0x16a   :  { %7151 = vst [vmem:[#allocation78_spill] sm:$0xff] %v4817_v6  ;;  %v1659_v38 = vadd.f32 %v4817_v6, %v4815_v10  ;;  %v4821_v2 = vpop.f32.mrb[36].mxu1  ;;  %v4823_v45 = vpop.f32.mrb[38].mxu0 }
 0x16b   :  { %7152 = vst [vmem:[#allocation79_spill] sm:$0xff] %v4821_v2  ;;  %7153 = vst [vmem:[#allocation80_spill] sm:$0xff] %v4823_v45  ;;  %v4825_v59 = vpop.f32.mrb[37].mxu1  ;;  %v4827_v30 = vpop.f32.mrb[39].mxu0 }
 0x16c   :  { %7154 = vst [vmem:[#allocation81_spill] sm:$0xff] %v4825_v59  ;;  %7155 = vst [vmem:[#allocation82_spill] sm:$0xff] %v4827_v30  ;;  %v1660_v15 = vadd.f32 %v1659_v38, %v4821_v2  ;;  %v1668_v7 = vadd.f32 %v4827_v30, %v4823_v45  ;;  %v4832_v62 = vpop.f32.mrb[38].mxu1 }
 0x16d   :  { %7156 = vst [vmem:[#allocation83_spill] sm:$0xff] %v4832_v62  ;;  %v4834_v5 = vpop.f32.mrb[39].mxu1 }
 0x16e   :  { %7157 = vst [vmem:[#allocation84_spill] sm:$0xff] %v4834_v5  ;;  %v4837_v58 = vadd.f32 %v1660_v15, %v4825_v59  ;;  %v1669_v6 = vadd.f32 %v1668_v7, %v4832_v62 }
 0x170   :  { %v4841_v10 = vadd.f32 %v1669_v6, %v4834_v5  ;;  %v4843_v4 = vpop.f32.mrb[40].mxu0 }
 0x171   :  { %7158 = vst [vmem:[#allocation85_spill] sm:$0xff] %v4843_v4  ;;  %v4845_v3 = vpop.f32.mrb[41].mxu0 }
 0x172   :  { %7159 = vst [vmem:[#allocation86_spill] sm:$0xff] %v4845_v3  ;;  %v1677_v38 = vadd.f32 %v4845_v3, %v4843_v4  ;;  %v4849_v30 = vpop.f32.mrb[40].mxu1  ;;  %v4851_v45 = vpop.f32.mrb[42].mxu0 }
 0x173   :  { %7160 = vst [vmem:[#allocation87_spill] sm:$0xff] %v4849_v30  ;;  %7161 = vst [vmem:[#allocation88_spill] sm:$0xff] %v4851_v45  ;;  %v4853_v2 = vpop.f32.mrb[41].mxu1  ;;  %v4855_v15 = vpop.f32.mrb[43].mxu0 }
 0x174   :  { %7162 = vst [vmem:[#allocation89_spill] sm:$0xff] %v4853_v2  ;;  %7163 = vst [vmem:[#allocation90_spill] sm:$0xff] %v4855_v15  ;;  %v1678_v7 = vadd.f32 %v1677_v38, %v4849_v30  ;;  %v1686_v6 = vadd.f32 %v4855_v15, %v4851_v45  ;;  %v4860_v5 = vpop.f32.mrb[42].mxu1 }
 0x175   :  { %7164 = vst [vmem:[#allocation91_spill] sm:$0xff] %v4860_v5  ;;  %v4862_v62 = vpop.f32.mrb[43].mxu1 }
 0x176   :  { %7165 = vst [vmem:[#allocation92_spill] sm:$0xff] %v4862_v62  ;;  %v4865_v59 = vadd.f32 %v1678_v7, %v4853_v2  ;;  %v1687_v3 = vadd.f32 %v1686_v6, %v4860_v5 }
 0x178   :  { %v4869_v4 = vadd.f32 %v1687_v3, %v4862_v62  ;;  %v4871_v0 = vpop.f32.mrb[44].mxu0 }
 0x179   :  { %7166 = vst [vmem:[#allocation93_spill] sm:$0xff] %v4871_v0  ;;  %v4873_v60 = vpop.f32.mrb[45].mxu0 }
 0x17a   :  { %7167 = vst [vmem:[#allocation94_spill] sm:$0xff] %v4873_v60  ;;  %v1695_v38 = vadd.f32 %v4873_v60, %v4871_v0  ;;  %v4877_v15 = vpop.f32.mrb[44].mxu1  ;;  %v4879_v45 = vpop.f32.mrb[46].mxu0 }
 0x17b   :  { %7168 = vst [vmem:[#allocation95_spill] sm:$0xff] %v4877_v15  ;;  %7169 = vst [vmem:[#allocation96_spill] sm:$0xff] %v4879_v45  ;;  %v4881_v30 = vpop.f32.mrb[45].mxu1  ;;  %v4883_v7 = vpop.f32.mrb[47].mxu0 }
 0x17c   :  { %7170 = vst [vmem:[#allocation97_spill] sm:$0xff] %v4881_v30  ;;  %7171 = vst [vmem:[#allocation98_spill] sm:$0xff] %v4883_v7  ;;  %v1696_v6 = vadd.f32 %v1695_v38, %v4877_v15  ;;  %v1704_v3 = vadd.f32 %v4883_v7, %v4879_v45  ;;  %v4888_v62 = vpop.f32.mrb[46].mxu1 }
 0x17d   :  { %7172 = vst [vmem:[#allocation99_spill] sm:$0xff] %v4888_v62  ;;  %v4890_v5 = vpop.f32.mrb[47].mxu1 }
 0x17e   :  { %7173 = vst [vmem:[#allocation100_spill] sm:$0xff] %v4890_v5  ;;  %v4893_v2 = vadd.f32 %v1696_v6, %v4881_v30  ;;  %v1705_v60 = vadd.f32 %v1704_v3, %v4888_v62 }
 0x180   :  { %v4897_v0 = vadd.f32 %v1705_v60, %v4890_v5  ;;  %v4899_v57 = vpop.f32.mrb[48].mxu0 }
 0x181   :  { %7174 = vst [vmem:[#allocation101_spill] sm:$0xff] %v4899_v57  ;;  %v4901_v55 = vpop.f32.mrb[49].mxu0 }
 0x182   :  { %7175 = vst [vmem:[#allocation102_spill] sm:$0xff] %v4901_v55  ;;  %v1713_v38 = vadd.f32 %v4901_v55, %v4899_v57  ;;  %v4905_v7 = vpop.f32.mrb[48].mxu1  ;;  %v4907_v45 = vpop.f32.mrb[50].mxu0 }
 0x183   :  { %7176 = vst [vmem:[#allocation103_spill] sm:$0xff] %v4905_v7  ;;  %7177 = vst [vmem:[#allocation104_spill] sm:$0xff] %v4907_v45  ;;  %v4909_v15 = vpop.f32.mrb[49].mxu1  ;;  %v4911_v6 = vpop.f32.mrb[51].mxu0 }
 0x184   :  { %7178 = vst [vmem:[#allocation105_spill] sm:$0xff] %v4909_v15  ;;  %7179 = vst [vmem:[#allocation106_spill] sm:$0xff] %v4911_v6  ;;  %v1714_v3 = vadd.f32 %v1713_v38, %v4905_v7  ;;  %v1722_v60 = vadd.f32 %v4911_v6, %v4907_v45  ;;  %v4916_v5 = vpop.f32.mrb[50].mxu1 }
 0x185   :  { %7180 = vst [vmem:[#allocation107_spill] sm:$0xff] %v4916_v5  ;;  %v4918_v62 = vpop.f32.mrb[51].mxu1 }
 0x186   :  { %7181 = vst [vmem:[#allocation108_spill] sm:$0xff] %v4918_v62  ;;  %v4921_v30 = vadd.f32 %v1714_v3, %v4909_v15  ;;  %v1723_v55 = vadd.f32 %v1722_v60, %v4916_v5 }
 0x188   :  { %v4925_v57 = vadd.f32 %v1723_v55, %v4918_v62  ;;  %v4927_v56 = vpop.f32.mrb[52].mxu0 }
 0x189   :  { %7182 = vst [vmem:[#allocation109_spill] sm:$0xff] %v4927_v56  ;;  %v4929_v54 = vpop.f32.mrb[53].mxu0 }
 0x18a   :  { %7183 = vst [vmem:[#allocation110_spill] sm:$0xff] %v4929_v54  ;;  %v1731_v38 = vadd.f32 %v4929_v54, %v4927_v56  ;;  %v4933_v6 = vpop.f32.mrb[52].mxu1  ;;  %v1007_v45 = vpop.f32.mrb[54].mxu0 }
 0x18b   :  { %7184 = vst [vmem:[#allocation111_spill] sm:$0xff] %v4933_v6  ;;  %v4935_v7 = vpop.f32.mrb[53].mxu1  ;;  %v1008_v52 = vpop.f32.mrb[55].mxu0 }
 0x18c   :  { %7185 = vst [vmem:[#allocation112_spill] sm:$0xff] %v4935_v7  ;;  %v1732_v3 = vadd.f32 %v1731_v38, %v4933_v6  ;;  %v1178_v15 = vpop.f32.mrb[54].mxu1 }
 0x18d   :  { %v1179_v60 = vpop.f32.mrb[55].mxu1 }
 0x18e   :  { %v4939_v55 = vadd.f32 %v1732_v3, %v4935_v7 }
 0x190   :  { %v4941_v62 = vpop.f32.mrb[56].mxu0 }
 0x191   :  { %7186 = vst [vmem:[#allocation113_spill] sm:$0xff] %v4941_v62  ;;  %v1499_v5 = vadd.f32 %v4584_v19, %v4941_v62  ;;  %v4945_v54 = vpop.f32.mrb[57].mxu0 }
 0x192   :  { %7187 = vst [vmem:[#allocation114_spill] sm:$0xff] %v4945_v54  ;;  %v4947_v56 = vpop.f32.mrb[56].mxu1  ;;  %v4949_v45 = vpop.f32.mrb[58].mxu0 }
 0x193   :  { %7188 = vst [vmem:[#allocation115_spill] sm:$0xff] %v4947_v56  ;;  %7189 = vst [vmem:[#allocation116_spill] sm:$0xff] %v4949_v45  ;;  %v1509_v52 = vadd.f32 %v4589_v21, %v4949_v45  ;;  %v1388_v15 = vpop.f32.mrb[57].mxu1  ;;  %v4953_v38 = vpop.f32.mrb[59].mxu0  ;;  %v1500_v3 = vadd.f32 %v1499_v5, %v4945_v54  ;;  %v1502_v60 = vsel %vm1501_vm2, %v4947_v56, 0.0 }
 0x194   :  { %7190 = vst [vmem:[#allocation117_spill] sm:$0xff] %v4953_v38  ;;  %v4958_v7 = vpop.f32.mrb[58].mxu1 }
 0x195   :  { %7191 = vst [vmem:[#allocation118_spill] sm:$0xff] %v4958_v7  ;;  %v1391_v19 = vpop.f32.mrb[59].mxu1  ;;  %v1503_v6 = vadd.f32 %v1502_v60, %v1500_v3  ;;  %v1510_v51 = vadd.f32 %v1509_v52, %v4953_v38  ;;  %v1511_v47 = vsel %vm1501_vm2, %v4958_v7, 0.0 }
 0x197   :  { %1504 = vadd.xlane.f32.xlu0 %v1503_v6  ;;  %v1512_v46 = vadd.f32 %v1511_v47, %v1510_v51 }
 0x198   :  { %v4963_v21 = vpop.f32.mrb[60].mxu0 }
 0x199   :  { %v1518_v15 = vadd.f32 %v4613_v33, %v4963_v21  ;;  %v4967_v5 = vpop.f32.mrb[61].mxu0 }
 0x19a   :  { %7192 = vst [vmem:[#allocation119_spill] sm:$0xff] %v4967_v5  ;;  %v4969_v43 = vpop.f32.mrb[62].mxu0  ;;  %v4971_v40 = vpop.f32.mrb[60].mxu1 }
 0x19b   :  { %7193 = vst [vmem:[#allocation120_spill] sm:$0xff] %v4969_v43  ;;  %7194 = vst [vmem:[#allocation121_spill] sm:$0xff] %v4971_v40  ;;  %v1527_v3 = vadd.f32 %v4617_v35, %v4969_v43  ;;  %1513 = vadd.xlane.f32.xlu0 %v1512_v46  ;;  %v4975_v52 = vpop.f32.mrb[63].mxu0  ;;  %v1396_v60 = vpop.f32.mrb[61].mxu1  ;;  %v1519_v47 = vadd.f32 %v1518_v15, %v4967_v5  ;;  %v1520_v51 = vsel %vm1501_vm2, %v4971_v40, 0.0 }
 0x19c   :  { %7195 = vst [vmem:[#allocation122_spill] sm:$0xff] %v4975_v52  ;;  %v4980_v6 = vpop.f32.mrb[62].mxu1 }
 0x19d   :  { %7196 = vst [vmem:[#allocation123_spill] sm:$0xff] %v4980_v6  ;;  %v1399_v33 = vpop.f32.mrb[63].mxu1  ;;  %v1521_v19 = vadd.f32 %v1520_v51, %v1519_v47  ;;  %v1528_v42 = vadd.f32 %v1527_v3, %v4975_v52  ;;  %v1529_v39 = vsel %vm1501_vm2, %v4980_v6, 0.0 }
 0x19f   :  { %1522 = vadd.xlane.f32.xlu1 %v1521_v19  ;;  %v1530_v35 = vadd.f32 %v1529_v39, %v1528_v42 }
 0x1a0   :  { %v4985_v46 = vpop.f32.mrb[64].mxu0 }
 0x1a1   :  { %7197 = vst [vmem:[#allocation124_spill] sm:$0xff] %v4985_v46  ;;  %v1536_v60 = vadd.f32 %v4641_v48, %v4985_v46  ;;  %v4989_v15 = vpop.f32.mrb[65].mxu0 }
 0x1a2   :  { %7198 = vst [vmem:[#allocation125_spill] sm:$0xff] %v4989_v15  ;;  %v4991_v37 = vpop.f32.mrb[66].mxu0  ;;  %v4993_v36 = vpop.f32.mrb[64].mxu1 }
 0x1a3   :  { %7199 = vst [vmem:[#allocation126_spill] sm:$0xff] %v4991_v37  ;;  %7200 = vst [vmem:[#allocation127_spill] sm:$0xff] %v4993_v36  ;;  %v1545_v47 = vadd.f32 %v4645_v50, %v4991_v37  ;;  %1531 = vadd.xlane.f32.xlu1 %v1530_v35  ;;  %v4997_v3 = vpop.f32.mrb[67].mxu0  ;;  %v1404_v51 = vpop.f32.mrb[65].mxu1  ;;  %v1537_v39 = vadd.f32 %v1536_v60, %v4989_v15  ;;  %v1538_v42 = vsel %vm1501_vm2, %v4993_v36, 0.0 }
 0x1a4   :  { %7201 = vst [vmem:[#allocation128_spill] sm:$0xff] %v4997_v3  ;;  %v5002_v33 = vpop.f32.mrb[66].mxu1 }
 0x1a5   :  { %7202 = vst [vmem:[#allocation129_spill] sm:$0xff] %v5002_v33  ;;  %v1407_v48 = vpop.f32.mrb[67].mxu1  ;;  %v1539_v19 = vadd.f32 %v1538_v42, %v1537_v39  ;;  %v1546_v46 = vadd.f32 %v1545_v47, %v4997_v3  ;;  %v1547_v52 = vsel %vm1501_vm2, %v5002_v33, 0.0 }
 0x1a7   :  { %1540 = vadd.xlane.f32.xlu0 %v1539_v19  ;;  %v1548_v50 = vadd.f32 %v1547_v52, %v1546_v46 }
 0x1a8   :  { %v5007_v35 = vpop.f32.mrb[68].mxu0 }
 0x1a9   :  { %7203 = vst [vmem:[#allocation130_spill] sm:$0xff] %v5007_v35  ;;  %v1554_v51 = vadd.f32 %v4669_v61, %v5007_v35  ;;  %1549 = vadd.xlane.f32.xlu1 %v1548_v50  ;;  %v5011_v60 = vpop.f32.mrb[69].mxu0 }
 0x1aa   :  { %7204 = vst [vmem:[#allocation131_spill] sm:$0xff] %v5011_v60  ;;  %v5013_v37 = vpop.f32.mrb[70].mxu0  ;;  %v5015_v15 = vpop.f32.mrb[68].mxu1 }
 0x1ab   :  { %7205 = vst [vmem:[#allocation132_spill] sm:$0xff] %v5013_v37  ;;  %7206 = vst [vmem:[#allocation133_spill] sm:$0xff] %v5015_v15  ;;  %v1563_v47 = vadd.f32 %v4673_v1, %v5013_v37  ;;  %v5019_v39 = vpop.f32.mrb[71].mxu0  ;;  %v1412_v42 = vpop.f32.mrb[69].mxu1  ;;  %v1555_v52 = vadd.f32 %v1554_v51, %v5011_v60  ;;  %v1556_v46 = vsel %vm1501_vm2, %v5015_v15, 0.0 }
 0x1ac   :  { %7207 = vst [vmem:[#allocation134_spill] sm:$0xff] %v5019_v39  ;;  %v5024_v48 = vpop.f32.mrb[70].mxu1 }
 0x1ad   :  { %7208 = vst [vmem:[#allocation135_spill] sm:$0xff] %v5024_v48  ;;  %v1415_v61 = vpop.f32.mrb[71].mxu1  ;;  %v1557_v19 = vadd.f32 %v1556_v46, %v1555_v52  ;;  %v1564_v50 = vadd.f32 %v1563_v47, %v5019_v39  ;;  %v1565_v35 = vsel %vm1501_vm2, %v5024_v48, 0.0 }
 0x1af   :  { %1558 = vadd.xlane.f32.xlu0 %v1557_v19  ;;  %v1566_v3 = vadd.f32 %v1565_v35, %v1564_v50 }
 0x1b0   :  { %v5029_v1 = vpop.f32.mrb[72].mxu0 }
 0x1b1   :  { %7209 = vst [vmem:[#allocation136_spill] sm:$0xff] %v5029_v1  ;;  %v1572_v42 = vadd.f32 %v4697_v20, %v5029_v1  ;;  %1567 = vadd.xlane.f32.xlu1 %v1566_v3  ;;  %v5033_v51 = vpop.f32.mrb[73].mxu0 }
 0x1b2   :  { %7210 = vst [vmem:[#allocation137_spill] sm:$0xff] %v5033_v51  ;;  %v5035_v37 = vpop.f32.mrb[74].mxu0  ;;  %v5037_v60 = vpop.f32.mrb[72].mxu1 }
 0x1b3   :  { %7211 = vst [vmem:[#allocation138_spill] sm:$0xff] %v5035_v37  ;;  %7212 = vst [vmem:[#allocation139_spill] sm:$0xff] %v5037_v60  ;;  %v1581_v47 = vadd.f32 %v4701_v29, %v5035_v37  ;;  %v5041_v52 = vpop.f32.mrb[75].mxu0  ;;  %v1420_v46 = vpop.f32.mrb[73].mxu1  ;;  %v1573_v35 = vadd.f32 %v1572_v42, %v5033_v51  ;;  %v1574_v61 = vsel %vm1501_vm2, %v5037_v60, 0.0 }
 0x1b4   :  { %7213 = vst [vmem:[#allocation140_spill] sm:$0xff] %v5041_v52  ;;  %v5046_v19 = vpop.f32.mrb[74].mxu1 }
 0x1b5   :  { %7214 = vst [vmem:[#allocation141_spill] sm:$0xff] %v5046_v19  ;;  %v1423_v20 = vpop.f32.mrb[75].mxu1  ;;  %v1575_v3 = vadd.f32 %v1574_v61, %v1573_v35  ;;  %v1582_v50 = vadd.f32 %v1581_v47, %v5041_v52  ;;  %v1583_v1 = vsel %vm1501_vm2, %v5046_v19, 0.0 }
 0x1b7   :  { %1576 = vadd.xlane.f32.xlu0 %v1575_v3  ;;  %v1584_v39 = vadd.f32 %v1583_v1, %v1582_v50 }
 0x1b8   :  { %v5051_v29 = vpop.f32.mrb[76].mxu0 }
 0x1b9   :  { %7215 = vst [vmem:[#allocation142_spill] sm:$0xff] %v5051_v29  ;;  %v1590_v46 = vadd.f32 %v4725_v12, %v5051_v29  ;;  %1585 = vadd.xlane.f32.xlu1 %v1584_v39  ;;  %v5055_v42 = vpop.f32.mrb[77].mxu0 }
 0x1ba   :  { %7216 = vst [vmem:[#allocation143_spill] sm:$0xff] %v5055_v42  ;;  %v5057_v37 = vpop.f32.mrb[78].mxu0  ;;  %v5059_v51 = vpop.f32.mrb[76].mxu1 }
 0x1bb   :  { %7217 = vst [vmem:[#allocation144_spill] sm:$0xff] %v5057_v37  ;;  %7218 = vst [vmem:[#allocation145_spill] sm:$0xff] %v5059_v51  ;;  %v1599_v47 = vadd.f32 %v4729_v24, %v5057_v37  ;;  %v5063_v35 = vpop.f32.mrb[79].mxu0  ;;  %v1428_v61 = vpop.f32.mrb[77].mxu1  ;;  %v1591_v1 = vadd.f32 %v1590_v46, %v5055_v42  ;;  %v1592_v20 = vsel %vm1501_vm2, %v5059_v51, 0.0 }
 0x1bc   :  { %7219 = vst [vmem:[#allocation146_spill] sm:$0xff] %v5063_v35  ;;  %v5068_v3 = vpop.f32.mrb[78].mxu1 }
 0x1bd   :  { %7220 = vst [vmem:[#allocation147_spill] sm:$0xff] %v5068_v3  ;;  %v1431_v12 = vpop.f32.mrb[79].mxu1  ;;  %v1593_v39 = vadd.f32 %v1592_v20, %v1591_v1  ;;  %v1600_v50 = vadd.f32 %v1599_v47, %v5063_v35  ;;  %v1601_v29 = vsel %vm1501_vm2, %v5068_v3, 0.0 }
 0x1bf   :  { %1594 = vadd.xlane.f32.xlu0 %v1593_v39  ;;  %v1602_v52 = vadd.f32 %v1601_v29, %v1600_v50 }
 0x1c0   :  { %v5073_v24 = vpop.f32.mrb[80].mxu0 }
 0x1c1   :  { %7221 = vst [vmem:[#allocation148_spill] sm:$0xff] %v5073_v24  ;;  %v1608_v61 = vadd.f32 %v4753_v49, %v5073_v24  ;;  %1603 = vadd.xlane.f32.xlu1 %v1602_v52  ;;  %v5077_v46 = vpop.f32.mrb[81].mxu0 }
 0x1c2   :  { %7222 = vst [vmem:[#allocation149_spill] sm:$0xff] %v5077_v46  ;;  %v5079_v37 = vpop.f32.mrb[82].mxu0  ;;  %v5081_v42 = vpop.f32.mrb[80].mxu1 }
 0x1c3   :  { %7223 = vst [vmem:[#allocation150_spill] sm:$0xff] %v5079_v37  ;;  %7224 = vst [vmem:[#allocation151_spill] sm:$0xff] %v5081_v42  ;;  %v1617_v47 = vadd.f32 %v4757_v34, %v5079_v37  ;;  %v5085_v1 = vpop.f32.mrb[83].mxu0  ;;  %v1436_v20 = vpop.f32.mrb[81].mxu1  ;;  %v1609_v29 = vadd.f32 %v1608_v61, %v5077_v46  ;;  %v1610_v12 = vsel %vm1501_vm2, %v5081_v42, 0.0 }
 0x1c4   :  { %7225 = vst [vmem:[#allocation152_spill] sm:$0xff] %v5085_v1  ;;  %v5090_v39 = vpop.f32.mrb[82].mxu1 }
 0x1c5   :  { %7226 = vst [vmem:[#allocation153_spill] sm:$0xff] %v5090_v39  ;;  %v1439_v49 = vpop.f32.mrb[83].mxu1  ;;  %v1611_v52 = vadd.f32 %v1610_v12, %v1609_v29  ;;  %v1618_v50 = vadd.f32 %v1617_v47, %v5085_v1  ;;  %v1619_v24 = vsel %vm1501_vm2, %v5090_v39, 0.0 }
 0x1c7   :  { %1612 = vadd.xlane.f32.xlu0 %v1611_v52  ;;  %v1620_v3 = vadd.f32 %v1619_v24, %v1618_v50 }
 0x1c8   :  { %v5095_v34 = vpop.f32.mrb[84].mxu0 }
 0x1c9   :  { %7227 = vst [vmem:[#allocation154_spill] sm:$0xff] %v5095_v34  ;;  %v1626_v20 = vadd.f32 %v4781_v44, %v5095_v34  ;;  %1621 = vadd.xlane.f32.xlu1 %v1620_v3  ;;  %v5099_v61 = vpop.f32.mrb[85].mxu0 }
 0x1ca   :  { %7228 = vst [vmem:[#allocation155_spill] sm:$0xff] %v5099_v61  ;;  %v5101_v37 = vpop.f32.mrb[86].mxu0  ;;  %v5103_v46 = vpop.f32.mrb[84].mxu1 }
 0x1cb   :  { %7229 = vst [vmem:[#allocation156_spill] sm:$0xff] %v5101_v37  ;;  %7230 = vst [vmem:[#allocation157_spill] sm:$0xff] %v5103_v46  ;;  %v1635_v47 = vadd.f32 %v4785_v16, %v5101_v37  ;;  %v5107_v29 = vpop.f32.mrb[87].mxu0  ;;  %v1444_v12 = vpop.f32.mrb[85].mxu1  ;;  %v1627_v24 = vadd.f32 %v1626_v20, %v5099_v61  ;;  %v1628_v49 = vsel %vm1501_vm2, %v5103_v46, 0.0 }
 0x1cc   :  { %7231 = vst [vmem:[#allocation158_spill] sm:$0xff] %v5107_v29  ;;  %v5112_v52 = vpop.f32.mrb[86].mxu1 }
 0x1cd   :  { %7232 = vst [vmem:[#allocation159_spill] sm:$0xff] %v5112_v52  ;;  %v1447_v44 = vpop.f32.mrb[87].mxu1  ;;  %v1629_v3 = vadd.f32 %v1628_v49, %v1627_v24  ;;  %v1636_v50 = vadd.f32 %v1635_v47, %v5107_v29  ;;  %v1637_v34 = vsel %vm1501_vm2, %v5112_v52, 0.0 }
 0x1cf   :  { %1630 = vadd.xlane.f32.xlu0 %v1629_v3  ;;  %v1638_v1 = vadd.f32 %v1637_v34, %v1636_v50 }
 0x1d0   :  { %v5117_v16 = vpop.f32.mrb[88].mxu0 }
 0x1d1   :  { %7233 = vst [vmem:[#allocation160_spill] sm:$0xff] %v5117_v16  ;;  %v1644_v12 = vadd.f32 %v4809_v53, %v5117_v16  ;;  %1639 = vadd.xlane.f32.xlu1 %v1638_v1  ;;  %v5121_v20 = vpop.f32.mrb[89].mxu0 }
 0x1d2   :  { %7234 = vst [vmem:[#allocation161_spill] sm:$0xff] %v5121_v20  ;;  %v5123_v37 = vpop.f32.mrb[90].mxu0  ;;  %v5125_v61 = vpop.f32.mrb[88].mxu1 }
 0x1d3   :  { %7235 = vst [vmem:[#allocation162_spill] sm:$0xff] %v5123_v37  ;;  %7236 = vst [vmem:[#allocation163_spill] sm:$0xff] %v5125_v61  ;;  %v1653_v47 = vadd.f32 %v4813_v11, %v5123_v37  ;;  %v5129_v24 = vpop.f32.mrb[91].mxu0  ;;  %v1452_v49 = vpop.f32.mrb[89].mxu1  ;;  %v1645_v34 = vadd.f32 %v1644_v12, %v5121_v20  ;;  %v1646_v44 = vsel %vm1501_vm2, %v5125_v61, 0.0 }
 0x1d4   :  { %7237 = vst [vmem:[#allocation164_spill] sm:$0xff] %v5129_v24  ;;  %v5134_v3 = vpop.f32.mrb[90].mxu1 }
 0x1d5   :  { %7238 = vst [vmem:[#allocation165_spill] sm:$0xff] %v5134_v3  ;;  %v1455_v53 = vpop.f32.mrb[91].mxu1  ;;  %v1647_v1 = vadd.f32 %v1646_v44, %v1645_v34  ;;  %v1654_v50 = vadd.f32 %v1653_v47, %v5129_v24  ;;  %v1655_v16 = vsel %vm1501_vm2, %v5134_v3, 0.0 }
 0x1d7   :  { %1648 = vadd.xlane.f32.xlu0 %v1647_v1  ;;  %v1656_v52 = vadd.f32 %v1655_v16, %v1654_v50 }
 0x1d8   :  { %v5139_v11 = vpop.f32.mrb[92].mxu0 }
 0x1d9   :  { %7239 = vst [vmem:[#allocation166_spill] sm:$0xff] %v5139_v11  ;;  %v1662_v49 = vadd.f32 %v4837_v58, %v5139_v11  ;;  %1657 = vadd.xlane.f32.xlu1 %v1656_v52  ;;  %v5143_v12 = vpop.f32.mrb[93].mxu0 }
 0x1da   :  { %7240 = vst [vmem:[#allocation167_spill] sm:$0xff] %v5143_v12  ;;  %v5145_v37 = vpop.f32.mrb[94].mxu0  ;;  %v5147_v20 = vpop.f32.mrb[92].mxu1 }
 0x1db   :  { %7241 = vst [vmem:[#allocation168_spill] sm:$0xff] %v5145_v37  ;;  %7242 = vst [vmem:[#allocation169_spill] sm:$0xff] %v5147_v20  ;;  %v1671_v47 = vadd.f32 %v4841_v10, %v5145_v37  ;;  %v5151_v34 = vpop.f32.mrb[95].mxu0  ;;  %v1460_v44 = vpop.f32.mrb[93].mxu1  ;;  %v1663_v16 = vadd.f32 %v1662_v49, %v5143_v12  ;;  %v1664_v53 = vsel %vm1501_vm2, %v5147_v20, 0.0 }
 0x1dc   :  { %7243 = vst [vmem:[#allocation170_spill] sm:$0xff] %v5151_v34  ;;  %v5156_v1 = vpop.f32.mrb[94].mxu1 }
 0x1dd   :  { %7244 = vst [vmem:[#allocation171_spill] sm:$0xff] %v5156_v1  ;;  %v1463_v58 = vpop.f32.mrb[95].mxu1  ;;  %v1665_v52 = vadd.f32 %v1664_v53, %v1663_v16  ;;  %v1672_v50 = vadd.f32 %v1671_v47, %v5151_v34  ;;  %v1673_v11 = vsel %vm1501_vm2, %v5156_v1, 0.0 }
 0x1df   :  { %1666 = vadd.xlane.f32.xlu0 %v1665_v52  ;;  %v1674_v24 = vadd.f32 %v1673_v11, %v1672_v50 }
 0x1e0   :  { %v5161_v10 = vpop.f32.mrb[96].mxu0 }
 0x1e1   :  { %7245 = vst [vmem:[#allocation172_spill] sm:$0xff] %v5161_v10  ;;  %v1680_v44 = vadd.f32 %v4865_v59, %v5161_v10  ;;  %1675 = vadd.xlane.f32.xlu1 %v1674_v24  ;;  %v5165_v49 = vpop.f32.mrb[97].mxu0 }
 0x1e2   :  { %7246 = vst [vmem:[#allocation173_spill] sm:$0xff] %v5165_v49  ;;  %v5167_v37 = vpop.f32.mrb[98].mxu0  ;;  %v5169_v12 = vpop.f32.mrb[96].mxu1 }
 0x1e3   :  { %7247 = vst [vmem:[#allocation174_spill] sm:$0xff] %v5167_v37  ;;  %7248 = vst [vmem:[#allocation175_spill] sm:$0xff] %v5169_v12  ;;  %v1689_v47 = vadd.f32 %v4869_v4, %v5167_v37  ;;  %v5173_v16 = vpop.f32.mrb[99].mxu0  ;;  %v1468_v53 = vpop.f32.mrb[97].mxu1  ;;  %v1681_v11 = vadd.f32 %v1680_v44, %v5165_v49  ;;  %v1682_v58 = vsel %vm1501_vm2, %v5169_v12, 0.0 }
 0x1e4   :  { %7249 = vst [vmem:[#allocation176_spill] sm:$0xff] %v5173_v16  ;;  %v5178_v52 = vpop.f32.mrb[98].mxu1 }
 0x1e5   :  { %7250 = vst [vmem:[#allocation177_spill] sm:$0xff] %v5178_v52  ;;  %v1471_v59 = vpop.f32.mrb[99].mxu1  ;;  %v1683_v24 = vadd.f32 %v1682_v58, %v1681_v11  ;;  %v1690_v50 = vadd.f32 %v1689_v47, %v5173_v16  ;;  %v1691_v10 = vsel %vm1501_vm2, %v5178_v52, 0.0 }
 0x1e7   :  { %1684 = vadd.xlane.f32.xlu0 %v1683_v24  ;;  %v1692_v1 = vadd.f32 %v1691_v10, %v1690_v50 }
 0x1e8   :  { %v5183_v4 = vpop.f32.mrb[100].mxu0 }
 0x1e9   :  { %7251 = vst [vmem:[#allocation178_spill] sm:$0xff] %v5183_v4  ;;  %v1698_v53 = vadd.f32 %v4893_v2, %v5183_v4  ;;  %1693 = vadd.xlane.f32.xlu1 %v1692_v1  ;;  %v5187_v44 = vpop.f32.mrb[101].mxu0 }
 0x1ea   :  { %7252 = vst [vmem:[#allocation179_spill] sm:$0xff] %v5187_v44  ;;  %v5189_v37 = vpop.f32.mrb[102].mxu0  ;;  %v5191_v49 = vpop.f32.mrb[100].mxu1 }
 0x1eb   :  { %7253 = vst [vmem:[#allocation180_spill] sm:$0xff] %v5189_v37  ;;  %7254 = vst [vmem:[#allocation181_spill] sm:$0xff] %v5191_v49  ;;  %v1707_v47 = vadd.f32 %v4897_v0, %v5189_v37  ;;  %v5195_v11 = vpop.f32.mrb[103].mxu0  ;;  %v1476_v58 = vpop.f32.mrb[101].mxu1  ;;  %v1699_v10 = vadd.f32 %v1698_v53, %v5187_v44  ;;  %v1700_v59 = vsel %vm1501_vm2, %v5191_v49, 0.0 }
 0x1ec   :  { %7255 = vst [vmem:[#allocation182_spill] sm:$0xff] %v5195_v11  ;;  %v5200_v24 = vpop.f32.mrb[102].mxu1 }
 0x1ed   :  { %7256 = vst [vmem:[#allocation183_spill] sm:$0xff] %v5200_v24  ;;  %v1479_v2 = vpop.f32.mrb[103].mxu1  ;;  %v1701_v1 = vadd.f32 %v1700_v59, %v1699_v10  ;;  %v1708_v50 = vadd.f32 %v1707_v47, %v5195_v11  ;;  %v1709_v4 = vsel %vm1501_vm2, %v5200_v24, 0.0 }
 0x1ef   :  { %1702 = vadd.xlane.f32.xlu0 %v1701_v1  ;;  %v1710_v16 = vadd.f32 %v1709_v4, %v1708_v50 }
 0x1f0   :  { %v5205_v0 = vpop.f32.mrb[104].mxu0 }
 0x1f1   :  { %7257 = vst [vmem:[#allocation184_spill] sm:$0xff] %v5205_v0  ;;  %v1716_v58 = vadd.f32 %v4921_v30, %v5205_v0  ;;  %1711 = vadd.xlane.f32.xlu1 %v1710_v16  ;;  %v5209_v53 = vpop.f32.mrb[105].mxu0 }
 0x1f2   :  { %7258 = vst [vmem:[#allocation185_spill] sm:$0xff] %v5209_v53  ;;  %v5211_v37 = vpop.f32.mrb[106].mxu0  ;;  %v5213_v44 = vpop.f32.mrb[104].mxu1 }
 0x1f3   :  { %7259 = vst [vmem:[#allocation186_spill] sm:$0xff] %v5211_v37  ;;  %7260 = vst [vmem:[#allocation187_spill] sm:$0xff] %v5213_v44  ;;  %v1725_v47 = vadd.f32 %v4925_v57, %v5211_v37  ;;  %v5217_v10 = vpop.f32.mrb[107].mxu0  ;;  %v1484_v59 = vpop.f32.mrb[105].mxu1  ;;  %v1717_v4 = vadd.f32 %v1716_v58, %v5209_v53  ;;  %v1718_v2 = vsel %vm1501_vm2, %v5213_v44, 0.0 }
 0x1f4   :  { %7261 = vst [vmem:[#allocation188_spill] sm:$0xff] %v5217_v10  ;;  %v5222_v1 = vpop.f32.mrb[106].mxu1 }
 0x1f5   :  { %7262 = vst [vmem:[#allocation189_spill] sm:$0xff] %v5222_v1  ;;  %v1487_v30 = vpop.f32.mrb[107].mxu1  ;;  %v1719_v16 = vadd.f32 %v1718_v2, %v1717_v4  ;;  %v1726_v50 = vadd.f32 %v1725_v47, %v5217_v10  ;;  %v1727_v0 = vsel %vm1501_vm2, %v5222_v1, 0.0 }
 0x1f7   :  { %1720 = vadd.xlane.f32.xlu0 %v1719_v16  ;;  %v1728_v11 = vadd.f32 %v1727_v0, %v1726_v50 }
 0x1f8   :  { %v5227_v57 = vpop.f32.mrb[108].mxu0 }
 0x1f9   :  { %7263 = vst [vmem:[#allocation190_spill] sm:$0xff] %v5227_v57  ;;  %v1734_v59 = vadd.f32 %v4939_v55, %v5227_v57  ;;  %1729 = vadd.xlane.f32.xlu1 %v1728_v11  ;;  %v5231_v58 = vpop.f32.mrb[109].mxu0 }
 0x1fa   :  { %7264 = vst [vmem:[#allocation191_spill] sm:$0xff] %v5231_v58  ;;  %v5233_v37 = vpop.f32.mrb[108].mxu1  ;;  %v1349_v44 = vpop.f32.mrb[110].mxu0 }
 0x1fb   :  { %7265 = vst [vmem:[#allocation192_spill] sm:$0xff] %v5233_v37  ;;  %v1735_v4 = vadd.f32 %v1734_v59, %v5231_v58  ;;  %v1736_v47 = vsel %vm1501_vm2, %v5233_v37, 0.0  ;;  %v1350_v2 = vpop.f32.mrb[111].mxu0  ;;  %v1492_v30 = vpop.f32.mrb[109].mxu1 }
 0x1fc   :  { %v1493_v16 = vpop.f32.mrb[110].mxu1 }
 0x1fd   :  { %v1737_v0 = vadd.f32 %v1736_v47, %v1735_v4  ;;  %v1494_v50 = vpop.f32.mrb[111].mxu1 }
 0x1ff   :  { %1738 = vadd.xlane.f32.xlu0 %v1737_v0 }
 0x224   :  { %v1505_v1 = vpop.xlane.xlu0 %1504 }
 0x225   :  { %v5238_v10 = vmul.f32 0.0012755102, %v1505_v1 }
 0x227   :  { %7266 = vst [vmem:[#allocation193_spill] sm:$0xff] %v5238_v10  ;;  %v1767_v55 = vsub.f32 %v4560_v41, %v5238_v10  ;;  %v1768_v44 = vsub.f32 %v4563_v63, %v5238_v10  ;;  %v1769_v11 = vsub.f32 %v4567_v8, %v5238_v10  ;;  %v1770_v2 = vsub.f32 %v4571_v13, %v5238_v10 }
 0x228   :  { %v1514_v59 = vpop.xlane.xlu0 %1513  ;;  %v1773_v4 = vsub.f32 %v4947_v56, %v5238_v10  ;;  %v1771_v16 = vsub.f32 %v4941_v62, %v5238_v10  ;;  %v1772_v0 = vsub.f32 %v4945_v54, %v5238_v10 }
 0x229   :  { %v5250_v47 = vmul.f32 0.0012755102, %v1514_v59  ;;  %v1956_v1 = vmul.f32 %v1767_v55, %v1767_v55  ;;  %v1957_v30 = vmul.f32 %v1768_v44, %v1768_v44  ;;  %v1958_v50 = vmul.f32 %v1769_v11, %v1769_v11 }
 0x22a   :  { %v1962_v63 = vmul.f32 %v1773_v4, %v1773_v4  ;;  %v1959_v59 = vmul.f32 %v1770_v2, %v1770_v2 }
 0x22b   :  { %v2145_v8 = vadd.f32 %v1957_v30, %v1956_v1  ;;  %v1774_v41 = vsub.f32 %v4569_v9, %v5250_v47  ;;  %v1775_v13 = vsub.f32 %v4573_v14, %v5250_v47  ;;  %v1776_v55 = vsub.f32 %v4578_v17, %v5250_v47 }
 0x22c   :  { %v1523_v56 = vpop.xlane.xlu1 %1522  ;;  %v1777_v44 = vsub.f32 %v4580_v18, %v5250_v47  ;;  %v1780_v11 = vsub.f32 %v4958_v7, %v5250_v47  ;;  %v1960_v1 = vmul.f32 %v1771_v16, %v1771_v16  ;;  %v1961_v30 = vmul.f32 %v1772_v0, %v1772_v0 }
 0x22d   :  { %v5264_v62 = vmul.f32 0.0012755102, %v1523_v56  ;;  %v2146_v54 = vadd.f32 %v2145_v8, %v1958_v50  ;;  %v1963_v4 = vmul.f32 %v1774_v41, %v1774_v41  ;;  %v1778_v14 = vsub.f32 %v4949_v45, %v5250_v47 }
 0x22e   :  { %v1964_v9 = vmul.f32 %v1775_v13, %v1775_v13  ;;  %v2150_v10 = vsel %vm1501_vm2, %v1962_v63, 0.0  ;;  %v1779_v17 = vsub.f32 %v4953_v38, %v5250_v47  ;;  %v1965_v50 = vmul.f32 %v1776_v55, %v1776_v55 }
 0x22f   :  { %v2147_v2 = vadd.f32 %v2146_v54, %v1959_v59  ;;  %v1781_v56 = vsub.f32 %v4591_v22, %v5264_v62  ;;  %v1969_v18 = vmul.f32 %v1780_v11, %v1780_v11  ;;  %v1782_v41 = vsub.f32 %v4593_v23, %v5264_v62 }
 0x230   :  { %v1532_v8 = vpop.xlane.xlu1 %1531  ;;  %v2154_v7 = vadd.f32 %v1964_v9, %v1963_v4  ;;  %v1966_v13 = vmul.f32 %v1777_v44, %v1777_v44  ;;  %v1783_v63 = vsub.f32 %v4597_v25, %v5264_v62  ;;  %v1967_v54 = vmul.f32 %v1778_v14, %v1778_v14 }
 0x231   :  { %v5277_v16 = vmul.f32 0.0012755102, %v1532_v8  ;;  %v2148_v0 = vadd.f32 %v2147_v2, %v1960_v1  ;;  %v1784_v38 = vsub.f32 %v4601_v27, %v5264_v62  ;;  %v1970_v22 = vmul.f32 %v1781_v56, %v1781_v56 }
 0x232   :  { %v2155_v59 = vadd.f32 %v2154_v7, %v1965_v50  ;;  %v1785_v9 = vsub.f32 %v4963_v21, %v5264_v62  ;;  %v1786_v55 = vsub.f32 %v4967_v5, %v5264_v62  ;;  %v1971_v11 = vmul.f32 %v1782_v41, %v1782_v41 }
 0x233   :  { %v2149_v45 = vadd.f32 %v2148_v0, %v1961_v30  ;;  %v1968_v1 = vmul.f32 %v1779_v17, %v1779_v17  ;;  %v2159_v2 = vsel %vm1501_vm2, %v1969_v18, 0.0  ;;  %v1787_v14 = vsub.f32 %v4971_v40, %v5264_v62 }
 0x234   :  { %v1541_v4 = vpop.xlane.xlu0 %1540  ;;  %v2156_v44 = vadd.f32 %v2155_v59, %v1966_v13  ;;  %v1972_v8 = vmul.f32 %v1783_v63, %v1783_v63  ;;  %v2163_v50 = vadd.f32 %v1971_v11, %v1970_v22  ;;  %v1788_v30 = vsub.f32 %v4599_v26, %v5277_v16 }
 0x235   :  { %v2151_v7 = vadd.f32 %v2150_v10, %v2149_v45  ;;  %v1973_v0 = vmul.f32 %v1784_v38, %v1784_v38  ;;  %v1789_v5 = vsub.f32 %v4603_v28, %v5277_v16  ;;  %v1790_v17 = vsub.f32 %v4608_v31, %v5277_v16 }
 0x236   :  { %v2157_v56 = vadd.f32 %v2156_v44, %v1967_v54  ;;  %v5296_v41 = vmul.f32 0.0012755102, %v1541_v4  ;;  %v1974_v18 = vmul.f32 %v1785_v9, %v1785_v9  ;;  %v1975_v13 = vmul.f32 %v1786_v55, %v1786_v55  ;;  %v1550_v54 = vpop.xlane.xlu1 %1549  ;;  %v7267_v9 = vld [vmem:[#allocation122_spill] sm:$0xff] }
 0x237   :  { %2152 = vadd.xlane.f32.xlu1 %v2151_v7  ;;  %v2164_v59 = vadd.f32 %v2163_v50, %v1972_v8  ;;  %v1976_v10 = vmul.f32 %v1787_v14, %v1787_v14  ;;  %v1794_v22 = vsub.f32 %v4980_v6, %v5277_v16  ;;  %v1977_v63 = vmul.f32 %v1788_v30, %v1788_v30  ;;  %v7268_v50 = vld [vmem:[#allocation21_spill] sm:$0xff] }
 0x238   :  { %v2158_v45 = vadd.f32 %v2157_v56, %v1968_v1  ;;  %v1791_v11 = vsub.f32 %v4610_v32, %v5277_v16  ;;  %v1792_v44 = vsub.f32 %v4969_v43, %v5277_v16  ;;  %v1978_v4 = vmul.f32 %v1789_v5, %v1789_v5  ;;  %v7269_v56 = vld [vmem:[#allocation22_spill] sm:$0xff]  ;;  %v7270_v5 = vld [vmem:[#allocation23_spill] sm:$0xff] }
 0x239   :  { %v2165_v38 = vadd.f32 %v2164_v59, %v1973_v0  ;;  %v1793_v55 = vsub.f32 %v7267_v9, %v5277_v16  ;;  %v1979_v7 = vmul.f32 %v1790_v17, %v1790_v17  ;;  %v1983_v1 = vmul.f32 %v1794_v22, %v1794_v22 }
 0x23a   :  { %v2160_v31 = vadd.f32 %v2159_v2, %v2158_v45  ;;  %v2172_v8 = vadd.f32 %v1978_v4, %v1977_v63  ;;  %v1795_v30 = vsub.f32 %v7268_v50, %v5296_v41  ;;  %v1796_v0 = vsub.f32 %v7269_v56, %v5296_v41 }
 0x23b   :  { %v2166_v14 = vadd.f32 %v2165_v38, %v1974_v18  ;;  %v5310_v59 = vmul.f32 0.0012755102, %v1550_v54  ;;  %v2168_v6 = vsel %vm1501_vm2, %v1976_v10, 0.0  ;;  %v1797_v2 = vsub.f32 %v7270_v5, %v5296_v41  ;;  %v7271_v18 = vld [vmem:[#allocation25_spill] sm:$0xff] }
 0x23c   :  { %2161 = vadd.xlane.f32.xlu0 %v2160_v31  ;;  %v1980_v9 = vmul.f32 %v1791_v11, %v1791_v11  ;;  %v1981_v17 = vmul.f32 %v1792_v44, %v1792_v44  ;;  %v2173_v22 = vadd.f32 %v2172_v8, %v1979_v7  ;;  %v1798_v63 = vsub.f32 %v7271_v18, %v5296_v41  ;;  %v1559_v54 = vpop.xlane.xlu0 %1558  ;;  %v7273_v44 = vld [vmem:[#allocation125_spill] sm:$0xff] }
 0x23d   :  { %v2167_v45 = vadd.f32 %v2166_v14, %v1975_v13  ;;  %v1801_v38 = vsub.f32 %v4993_v36, %v5296_v41  ;;  %v1984_v4 = vmul.f32 %v1795_v30, %v1795_v30  ;;  %v1985_v56 = vmul.f32 %v1796_v0, %v1796_v0  ;;  %v7272_v13 = vld [vmem:[#allocation124_spill] sm:$0xff] }
 0x23e   :  { %v1982_v31 = vmul.f32 %v1793_v55, %v1793_v55  ;;  %v2174_v43 = vadd.f32 %v2173_v22, %v1980_v9  ;;  %v2177_v10 = vsel %vm1501_vm2, %v1983_v1, 0.0  ;;  %v1568_v32 = vpop.xlane.xlu1 %1567  ;;  %v1799_v11 = vsub.f32 %v7272_v13, %v5296_v41  ;;  %v7274_v30 = vld [vmem:[#allocation24_spill] sm:$0xff]  ;;  %v7276_v22 = vld [vmem:[#allocation27_spill] sm:$0xff] }
 0x23f   :  { %v2169_v50 = vadd.f32 %v2168_v6, %v2167_v45  ;;  %v1800_v7 = vsub.f32 %v7273_v44, %v5296_v41  ;;  %v1986_v14 = vmul.f32 %v1797_v2, %v1797_v2  ;;  %v2181_v8 = vadd.f32 %v1985_v56, %v1984_v4  ;;  %v7275_v6 = vld [vmem:[#allocation26_spill] sm:$0xff] }
 0x240   :  { %v2175_v18 = vadd.f32 %v2174_v43, %v1981_v17  ;;  %v1990_v36 = vmul.f32 %v1801_v38, %v1801_v38  ;;  %v1802_v0 = vsub.f32 %v7274_v30, %v5310_v59  ;;  %v1803_v9 = vsub.f32 %v7275_v6, %v5310_v59  ;;  %v7278_v4 = vld [vmem:[#allocation126_spill] sm:$0xff] }
 0x241   :  { %2170 = vadd.xlane.f32.xlu1 %v2169_v50  ;;  %v5328_v55 = vmul.f32 0.0012755102, %v1559_v54  ;;  %v1987_v1 = vmul.f32 %v1798_v63, %v1798_v63  ;;  %v2182_v45 = vadd.f32 %v2181_v8, %v1986_v14  ;;  %v1804_v13 = vsub.f32 %v7276_v22, %v5310_v59  ;;  %v7277_v50 = vld [vmem:[#allocation28_spill] sm:$0xff]  ;;  %v7284_v22 = vld [vmem:[#allocation130_spill] sm:$0xff] }
 0x242   :  { %v5332_v5 = vmul.f32 0.0012755102, %v1568_v32  ;;  %v2176_v2 = vadd.f32 %v2175_v18, %v1982_v31  ;;  %v1805_v43 = vsub.f32 %v7277_v50, %v5310_v59  ;;  %v1991_v56 = vmul.f32 %v1802_v0, %v1802_v0  ;;  %v7279_v50 = vld [vmem:[#allocation29_spill] sm:$0xff] }
 0x243   :  { %v1988_v17 = vmul.f32 %v1799_v11, %v1799_v11  ;;  %v2183_v38 = vadd.f32 %v2182_v45, %v1987_v1  ;;  %v1806_v30 = vsub.f32 %v7278_v4, %v5310_v59  ;;  %v1992_v6 = vmul.f32 %v1803_v9, %v1803_v9  ;;  %v7280_v11 = vld [vmem:[#allocation128_spill] sm:$0xff] }
 0x244   :  { %v2178_v54 = vadd.f32 %v2177_v10, %v2176_v2  ;;  %v1577_v44 = vpop.xlane.xlu0 %1576  ;;  %v1989_v63 = vmul.f32 %v1800_v7, %v1800_v7  ;;  %v2186_v14 = vsel %vm1501_vm2, %v1990_v36, 0.0  ;;  %v1808_v32 = vsub.f32 %v5002_v33, %v5310_v59  ;;  %v7281_v10 = vld [vmem:[#allocation30_spill] sm:$0xff]  ;;  %v7282_v7 = vld [vmem:[#allocation31_spill] sm:$0xff] }
 0x245   :  { %v2184_v8 = vadd.f32 %v2183_v38, %v1988_v17  ;;  %v1993_v18 = vmul.f32 %v1804_v13, %v1804_v13  ;;  %v2190_v31 = vadd.f32 %v1992_v6, %v1991_v56  ;;  %v1809_v0 = vsub.f32 %v7279_v50, %v5328_v55  ;;  %v7283_v56 = vld [vmem:[#allocation33_spill] sm:$0xff] }
 0x246   :  { %2179 = vadd.xlane.f32.xlu0 %v2178_v54  ;;  %v1807_v1 = vsub.f32 %v7280_v11, %v5310_v59  ;;  %v1994_v45 = vmul.f32 %v1805_v43, %v1805_v43  ;;  %v1810_v9 = vsub.f32 %v7281_v10, %v5328_v55  ;;  %v1811_v36 = vsub.f32 %v7282_v7, %v5328_v55  ;;  %v1586_v33 = vpop.xlane.xlu1 %1585 }
 0x247   :  { %v5349_v2 = vmul.f32 0.0012755102, %v1577_v44  ;;  %v2185_v17 = vadd.f32 %v2184_v8, %v1989_v63  ;;  %v1995_v13 = vmul.f32 %v1806_v30, %v1806_v30  ;;  %v2191_v6 = vadd.f32 %v2190_v31, %v1993_v18  ;;  %v7285_v18 = vld [vmem:[#allocation131_spill] sm:$0xff] }
 0x248   :  { %v1812_v38 = vsub.f32 %v7283_v56, %v5328_v55  ;;  %v1815_v54 = vsub.f32 %v5015_v15, %v5328_v55  ;;  %v1998_v50 = vmul.f32 %v1809_v0, %v1809_v0  ;;  %v1999_v43 = vmul.f32 %v1810_v9, %v1810_v9  ;;  %v7286_v15 = vld [vmem:[#allocation32_spill] sm:$0xff] }
 0x249   :  { %v2187_v11 = vadd.f32 %v2186_v14, %v2185_v17  ;;  %v1997_v4 = vmul.f32 %v1808_v32, %v1808_v32  ;;  %v2192_v10 = vadd.f32 %v2191_v6, %v1994_v45  ;;  %v1813_v7 = vsub.f32 %v7284_v22, %v5328_v55  ;;  %v7287_v14 = vld [vmem:[#allocation34_spill] sm:$0xff] }
 0x24a   :  { %v5357_v44 = vmul.f32 0.0012755102, %v1586_v33  ;;  %v1996_v28 = vmul.f32 %v1807_v1, %v1807_v1  ;;  %v2000_v63 = vmul.f32 %v1811_v36, %v1811_v36  ;;  %v2199_v30 = vadd.f32 %v1999_v43, %v1998_v50  ;;  %v7288_v33 = vld [vmem:[#allocation35_spill] sm:$0xff]  ;;  %v7289_v43 = vld [vmem:[#allocation36_spill] sm:$0xff] }
 0x24b   :  { %2188 = vadd.xlane.f32.xlu1 %v2187_v11  ;;  %v2193_v8 = vadd.f32 %v2192_v10, %v1995_v13  ;;  %v1814_v31 = vsub.f32 %v7285_v18, %v5328_v55  ;;  %v1816_v0 = vsub.f32 %v7286_v15, %v5332_v5  ;;  %v1817_v32 = vsub.f32 %v7287_v14, %v5332_v5 }
 0x24c   :  { %v1595_v45 = vpop.xlane.xlu0 %1594  ;;  %v2001_v9 = vmul.f32 %v1812_v38, %v1812_v38  ;;  %v2004_v17 = vmul.f32 %v1815_v54, %v1815_v54  ;;  %v2200_v6 = vadd.f32 %v2199_v30, %v2000_v63  ;;  %v1818_v1 = vsub.f32 %v7288_v33, %v5332_v5  ;;  %v7290_v63 = vld [vmem:[#allocation132_spill] sm:$0xff] }
 0x24d   :  { %v2194_v36 = vadd.f32 %v2193_v8, %v1996_v28  ;;  %v2195_v50 = vsel %vm1501_vm2, %v1997_v4, 0.0  ;;  %v2002_v11 = vmul.f32 %v1813_v7, %v1813_v7  ;;  %v1822_v10 = vsub.f32 %v5024_v48, %v5332_v5 }
 0x24e   :  { %v2201_v13 = vadd.f32 %v2200_v6, %v2001_v9  ;;  %v1819_v15 = vsub.f32 %v7289_v43, %v5332_v5  ;;  %v2005_v18 = vmul.f32 %v1816_v0, %v1816_v0  ;;  %v2006_v14 = vmul.f32 %v1817_v32, %v1817_v32  ;;  %v7291_v9 = vld [vmem:[#allocation134_spill] sm:$0xff]  ;;  %v7292_v0 = vld [vmem:[#allocation37_spill] sm:$0xff] }
 0x24f   :  { %v2196_v22 = vadd.f32 %v2195_v50, %v2194_v36  ;;  %v5372_v38 = vmul.f32 0.0012755102, %v1595_v45  ;;  %v2003_v54 = vmul.f32 %v1814_v31, %v1814_v31  ;;  %v1820_v30 = vsub.f32 %v7290_v63, %v5332_v5  ;;  %v7293_v45 = vld [vmem:[#allocation38_spill] sm:$0xff]  ;;  %v1604_v31 = vpop.xlane.xlu1 %1603 }
 0x250   :  { %v2202_v28 = vadd.f32 %v2201_v13, %v2002_v11  ;;  %v2204_v4 = vsel %vm1501_vm2, %v2004_v17, 0.0  ;;  %v2007_v7 = vmul.f32 %v1818_v1, %v1818_v1  ;;  %v2208_v8 = vadd.f32 %v2006_v14, %v2005_v18  ;;  %v7294_v11 = vld [vmem:[#allocation39_spill] sm:$0xff] }
 0x251   :  { %2197 = vadd.xlane.f32.xlu0 %v2196_v22  ;;  %v1821_v6 = vsub.f32 %v7291_v9, %v5332_v5  ;;  %v2011_v48 = vmul.f32 %v1822_v10, %v1822_v10  ;;  %v1823_v32 = vsub.f32 %v7292_v0, %v5349_v2  ;;  %v1824_v36 = vsub.f32 %v7293_v45, %v5349_v2  ;;  %v7295_v22 = vld [vmem:[#allocation41_spill] sm:$0xff]  ;;  %v7296_v0 = vld [vmem:[#allocation136_spill] sm:$0xff] }
 0x252   :  { %v2203_v50 = vadd.f32 %v2202_v28, %v2003_v54  ;;  %v2008_v43 = vmul.f32 %v1819_v15, %v1819_v15  ;;  %v2209_v63 = vadd.f32 %v2208_v8, %v2007_v7  ;;  %v1825_v17 = vsub.f32 %v7294_v11, %v5349_v2 }
 0x253   :  { %v2009_v1 = vmul.f32 %v1820_v30, %v1820_v30  ;;  %v1826_v18 = vsub.f32 %v7295_v22, %v5349_v2  ;;  %v2012_v14 = vmul.f32 %v1823_v32, %v1823_v32  ;;  %v2013_v13 = vmul.f32 %v1824_v36, %v1824_v36  ;;  %v7297_v30 = vld [vmem:[#allocation137_spill] sm:$0xff] }
 0x254   :  { %v2205_v10 = vadd.f32 %v2204_v4, %v2203_v50  ;;  %v2210_v9 = vadd.f32 %v2209_v63, %v2008_v43  ;;  %v1613_v33 = vpop.xlane.xlu0 %1612  ;;  %v1827_v56 = vsub.f32 %v7296_v0, %v5349_v2  ;;  %v1829_v54 = vsub.f32 %v5037_v60, %v5349_v2  ;;  %v7298_v43 = vld [vmem:[#allocation40_spill] sm:$0xff]  ;;  %v7299_v60 = vld [vmem:[#allocation42_spill] sm:$0xff] }
 0x255   :  { %v5391_v15 = vmul.f32 0.0012755102, %v1604_v31  ;;  %v2010_v28 = vmul.f32 %v1821_v6, %v1821_v6  ;;  %v2213_v7 = vsel %vm1501_vm2, %v2011_v48, 0.0  ;;  %v1828_v8 = vsub.f32 %v7297_v30, %v5349_v2  ;;  %v7300_v6 = vld [vmem:[#allocation43_spill] sm:$0xff] }
 0x256   :  { %2206 = vadd.xlane.f32.xlu1 %v2205_v10  ;;  %v2211_v32 = vadd.f32 %v2210_v9, %v2009_v1  ;;  %v2014_v36 = vmul.f32 %v1825_v17, %v1825_v17  ;;  %v2217_v4 = vadd.f32 %v2013_v13, %v2012_v14  ;;  %v1830_v63 = vsub.f32 %v7298_v43, %v5357_v44  ;;  %v1622_v11 = vpop.xlane.xlu1 %1621  ;;  %v7301_v9 = vld [vmem:[#allocation44_spill] sm:$0xff] }
 0x257   :  { %v5398_v50 = vmul.f32 0.0012755102, %v1613_v33  ;;  %v2015_v0 = vmul.f32 %v1826_v18, %v1826_v18  ;;  %v1831_v31 = vsub.f32 %v7299_v60, %v5357_v44  ;;  %v1832_v22 = vsub.f32 %v7300_v6, %v5357_v44  ;;  %v7302_v60 = vld [vmem:[#allocation138_spill] sm:$0xff] }
 0x258   :  { %v2212_v48 = vadd.f32 %v2211_v32, %v2010_v28  ;;  %v2016_v45 = vmul.f32 %v1827_v56, %v1827_v56  ;;  %v2018_v30 = vmul.f32 %v1829_v54, %v1829_v54  ;;  %v2218_v10 = vadd.f32 %v2217_v4, %v2014_v36  ;;  %v7303_v54 = vld [vmem:[#allocation45_spill] sm:$0xff]  ;;  %v7304_v4 = vld [vmem:[#allocation140_spill] sm:$0xff] }
 0x259   :  { %v1833_v17 = vsub.f32 %v7301_v9, %v5357_v44  ;;  %v1836_v1 = vsub.f32 %v5046_v19, %v5357_v44  ;;  %v2019_v33 = vmul.f32 %v1830_v63, %v1830_v63  ;;  %v2020_v14 = vmul.f32 %v1831_v31, %v1831_v31 }
 0x25a   :  { %v2214_v18 = vadd.f32 %v2213_v7, %v2212_v48  ;;  %v2017_v13 = vmul.f32 %v1828_v8, %v1828_v8  ;;  %v2219_v43 = vadd.f32 %v2218_v10, %v2015_v0  ;;  %v1834_v26 = vsub.f32 %v7302_v60, %v5357_v44  ;;  %v7305_v7 = vld [vmem:[#allocation46_spill] sm:$0xff] }
 0x25b   :  { %v5410_v6 = vmul.f32 0.0012755102, %v1622_v11  ;;  %v2021_v28 = vmul.f32 %v1832_v22, %v1832_v22  ;;  %v2226_v56 = vadd.f32 %v2020_v14, %v2019_v33  ;;  %v1837_v32 = vsub.f32 %v7303_v54, %v5372_v38  ;;  %v7306_v22 = vld [vmem:[#allocation47_spill] sm:$0xff] }
 0x25c   :  { %2215 = vadd.xlane.f32.xlu0 %v2214_v18  ;;  %v2220_v36 = vadd.f32 %v2219_v43, %v2016_v45  ;;  %v1835_v19 = vsub.f32 %v7304_v4, %v5357_v44  ;;  %v2025_v63 = vmul.f32 %v1836_v1, %v1836_v1  ;;  %v1838_v8 = vsub.f32 %v7305_v7, %v5372_v38  ;;  %v1631_v11 = vpop.xlane.xlu0 %1630  ;;  %v7307_v18 = vld [vmem:[#allocation49_spill] sm:$0xff]  ;;  %v7308_v43 = vld [vmem:[#allocation142_spill] sm:$0xff] }
 0x25d   :  { %v2222_v0 = vsel %vm1501_vm2, %v2018_v30, 0.0  ;;  %v2022_v31 = vmul.f32 %v1833_v17, %v1833_v17  ;;  %v2227_v48 = vadd.f32 %v2226_v56, %v2021_v28  ;;  %v1839_v10 = vsub.f32 %v7306_v22, %v5372_v38 }
 0x25e   :  { %v2221_v33 = vadd.f32 %v2220_v36, %v2017_v13  ;;  %v2023_v14 = vmul.f32 %v1834_v26, %v1834_v26  ;;  %v1840_v45 = vsub.f32 %v7307_v18, %v5372_v38  ;;  %v1841_v54 = vsub.f32 %v7308_v43, %v5372_v38  ;;  %v7309_v18 = vld [vmem:[#allocation48_spill] sm:$0xff] }
 0x25f   :  { %v2228_v1 = vadd.f32 %v2227_v48, %v2022_v31  ;;  %v1843_v7 = vsub.f32 %v5059_v51, %v5372_v38  ;;  %v2026_v4 = vmul.f32 %v1837_v32, %v1837_v32  ;;  %v2027_v30 = vmul.f32 %v1838_v8, %v1838_v8  ;;  %v7310_v31 = vld [vmem:[#allocation143_spill] sm:$0xff]  ;;  %v7311_v32 = vld [vmem:[#allocation50_spill] sm:$0xff] }
 0x260   :  { %v2223_v17 = vadd.f32 %v2222_v0, %v2221_v33  ;;  %v2024_v28 = vmul.f32 %v1835_v19, %v1835_v19  ;;  %v2231_v56 = vsel %vm1501_vm2, %v2025_v63, 0.0  ;;  %v5428_v60 = vmul.f32 0.0012755102, %v1631_v11  ;;  %v7312_v19 = vld [vmem:[#allocation51_spill] sm:$0xff]  ;;  %v1640_v11 = vpop.xlane.xlu1 %1639 }
 0x261   :  { %v2229_v13 = vadd.f32 %v2228_v1, %v2023_v14  ;;  %v2028_v26 = vmul.f32 %v1839_v10, %v1839_v10  ;;  %v2235_v36 = vadd.f32 %v2027_v30, %v2026_v4  ;;  %v1844_v22 = vsub.f32 %v7309_v18, %v5391_v15  ;;  %v7313_v4 = vld [vmem:[#allocation52_spill] sm:$0xff] }
 0x262   :  { %2224 = vadd.xlane.f32.xlu1 %v2223_v17  ;;  %v1842_v48 = vsub.f32 %v7310_v31, %v5372_v38  ;;  %v2029_v43 = vmul.f32 %v1840_v45, %v1840_v45  ;;  %v1845_v8 = vsub.f32 %v7311_v32, %v5391_v15  ;;  %v1846_v0 = vsub.f32 %v7312_v19, %v5391_v15  ;;  %v7314_v30 = vld [vmem:[#allocation144_spill] sm:$0xff]  ;;  %v7315_v19 = vld [vmem:[#allocation147_spill] sm:$0xff] }
 0x263   :  { %v2230_v63 = vadd.f32 %v2229_v13, %v2024_v28  ;;  %v2030_v33 = vmul.f32 %v1841_v54, %v1841_v54  ;;  %v2032_v14 = vmul.f32 %v1843_v7, %v1843_v7  ;;  %v2236_v10 = vadd.f32 %v2235_v36, %v2028_v26 }
 0x264   :  { %v1847_v1 = vsub.f32 %v7313_v4, %v5391_v15  ;;  %v1848_v17 = vsub.f32 %v7314_v30, %v5391_v15  ;;  %v2033_v18 = vmul.f32 %v1844_v22, %v1844_v22  ;;  %v2034_v51 = vmul.f32 %v1845_v8, %v1845_v8  ;;  %v7316_v22 = vld [vmem:[#allocation53_spill] sm:$0xff]  ;;  %v1649_v30 = vpop.xlane.xlu0 %1648 }
 0x265   :  { %v2232_v45 = vadd.f32 %v2231_v56, %v2230_v63  ;;  %v2237_v31 = vadd.f32 %v2236_v10, %v2029_v43  ;;  %v1849_v32 = vsub.f32 %v5063_v35, %v5391_v15  ;;  %v1850_v28 = vsub.f32 %v7315_v19, %v5391_v15  ;;  %v7317_v43 = vld [vmem:[#allocation54_spill] sm:$0xff] }
 0x266   :  { %v5446_v13 = vmul.f32 0.0012755102, %v1640_v11  ;;  %v2031_v54 = vmul.f32 %v1842_v48, %v1842_v48  ;;  %v2035_v7 = vmul.f32 %v1846_v0, %v1846_v0  ;;  %v2244_v26 = vadd.f32 %v2034_v51, %v2033_v18  ;;  %v1658_v19 = vpop.xlane.xlu1 %1657  ;;  %v7318_v11 = vld [vmem:[#allocation55_spill] sm:$0xff] }
 0x267   :  { %2233 = vadd.xlane.f32.xlu0 %v2232_v45  ;;  %v2238_v36 = vadd.f32 %v2237_v31, %v2030_v33  ;;  %v2240_v4 = vsel %vm1501_vm2, %v2032_v14, 0.0  ;;  %v1851_v8 = vsub.f32 %v7316_v22, %v5398_v50  ;;  %v1852_v56 = vsub.f32 %v7317_v43, %v5398_v50  ;;  %v7319_v31 = vld [vmem:[#allocation57_spill] sm:$0xff] }
 0x268   :  { %v2036_v63 = vmul.f32 %v1847_v1, %v1847_v1  ;;  %v2037_v10 = vmul.f32 %v1848_v17, %v1848_v17  ;;  %v2245_v35 = vadd.f32 %v2244_v26, %v2035_v7  ;;  %v1853_v48 = vsub.f32 %v7318_v11, %v5398_v50  ;;  %v7320_v26 = vld [vmem:[#allocation148_spill] sm:$0xff] }
 0x269   :  { %v2239_v0 = vadd.f32 %v2238_v36, %v2031_v54  ;;  %v2038_v51 = vmul.f32 %v1849_v32, %v1849_v32  ;;  %v2039_v18 = vmul.f32 %v1850_v28, %v1850_v28  ;;  %v1854_v33 = vsub.f32 %v7319_v31, %v5398_v50  ;;  %v7321_v36 = vld [vmem:[#allocation56_spill] sm:$0xff] }
 0x26a   :  { %v2246_v14 = vadd.f32 %v2245_v35, %v2036_v63  ;;  %v1857_v45 = vsub.f32 %v5081_v42, %v5398_v50  ;;  %v2040_v22 = vmul.f32 %v1851_v8, %v1851_v8  ;;  %v2041_v43 = vmul.f32 %v1852_v56, %v1852_v56  ;;  %v7322_v8 = vld [vmem:[#allocation149_spill] sm:$0xff] }
 0x26b   :  { %v2241_v1 = vadd.f32 %v2240_v4, %v2239_v0  ;;  %v5459_v17 = vmul.f32 0.0012755102, %v1649_v30  ;;  %v5461_v7 = vmul.f32 0.0012755102, %v1658_v19  ;;  %v1855_v11 = vsub.f32 %v7320_v26, %v5398_v50  ;;  %v7323_v4 = vld [vmem:[#allocation58_spill] sm:$0xff]  ;;  %v7324_v19 = vld [vmem:[#allocation59_spill] sm:$0xff] }
 0x26c   :  { %v2247_v54 = vadd.f32 %v2246_v14, %v2037_v10  ;;  %v2042_v32 = vmul.f32 %v1853_v48, %v1853_v48  ;;  %v2253_v28 = vadd.f32 %v2041_v43, %v2040_v22  ;;  %v1858_v31 = vsub.f32 %v7321_v36, %v5410_v6  ;;  %v7325_v22 = vld [vmem:[#allocation60_spill] sm:$0xff] }
 0x26d   :  { %2242 = vadd.xlane.f32.xlu1 %v2241_v1  ;;  %v2249_v35 = vsel %vm1501_vm2, %v2039_v18, 0.0  ;;  %v1856_v56 = vsub.f32 %v7322_v8, %v5398_v50  ;;  %v1859_v30 = vsub.f32 %v7323_v4, %v5410_v6  ;;  %v1860_v63 = vsub.f32 %v7324_v19, %v5410_v6  ;;  %v7326_v4 = vld [vmem:[#allocation150_spill] sm:$0xff] }
 0x26e   :  { %v2248_v0 = vadd.f32 %v2247_v54, %v2038_v51  ;;  %v2043_v42 = vmul.f32 %v1854_v33, %v1854_v33  ;;  %v2046_v10 = vmul.f32 %v1857_v45, %v1857_v45  ;;  %v2254_v48 = vadd.f32 %v2253_v28, %v2042_v32  ;;  %v7327_v51 = vld [vmem:[#allocation152_spill] sm:$0xff] }
 0x26f   :  { %v1861_v43 = vsub.f32 %v7325_v22, %v5410_v6  ;;  %v1864_v14 = vsub.f32 %v5090_v39, %v5410_v6  ;;  %v2047_v18 = vmul.f32 %v1858_v31, %v1858_v31  ;;  %v2048_v1 = vmul.f32 %v1859_v30, %v1859_v30  ;;  %v7328_v22 = vld [vmem:[#allocation61_spill] sm:$0xff]  ;;  %v7329_v31 = vld [vmem:[#allocation62_spill] sm:$0xff] }
 0x270   :  { %v2250_v36 = vadd.f32 %v2249_v35, %v2248_v0  ;;  %v2044_v8 = vmul.f32 %v1855_v11, %v1855_v11  ;;  %v2255_v26 = vadd.f32 %v2254_v48, %v2043_v42  ;;  %v1862_v9 = vsub.f32 %v7326_v4, %v5410_v6  ;;  %v1667_v0 = vpop.xlane.xlu0 %1666 }
 0x271   :  { %v2045_v40 = vmul.f32 %v1856_v56, %v1856_v56  ;;  %v1863_v33 = vsub.f32 %v7327_v51, %v5410_v6  ;;  %v2049_v45 = vmul.f32 %v1860_v63, %v1860_v63  ;;  %v2262_v54 = vadd.f32 %v2048_v1, %v2047_v18  ;;  %v7330_v56 = vld [vmem:[#allocation63_spill] sm:$0xff] }
 0x272   :  { %2251 = vadd.xlane.f32.xlu0 %v2250_v36  ;;  %v2256_v32 = vadd.f32 %v2255_v26, %v2044_v8  ;;  %v2053_v28 = vmul.f32 %v1864_v14, %v1864_v14  ;;  %v1865_v39 = vsub.f32 %v7328_v22, %v5428_v60  ;;  %v1866_v35 = vsub.f32 %v7329_v31, %v5428_v60  ;;  %v7331_v36 = vld [vmem:[#allocation65_spill] sm:$0xff]  ;;  %v7332_v8 = vld [vmem:[#allocation154_spill] sm:$0xff] }
 0x273   :  { %v2258_v42 = vsel %vm1501_vm2, %v2046_v10, 0.0  ;;  %v2050_v11 = vmul.f32 %v1861_v43, %v1861_v43  ;;  %v2263_v30 = vadd.f32 %v2262_v54, %v2049_v45  ;;  %v1867_v48 = vsub.f32 %v7330_v56, %v5428_v60 }
 0x274   :  { %v2257_v51 = vadd.f32 %v2256_v32, %v2045_v40  ;;  %v2051_v63 = vmul.f32 %v1862_v9, %v1862_v9  ;;  %v1868_v26 = vsub.f32 %v7331_v36, %v5428_v60  ;;  %v1869_v14 = vsub.f32 %v7332_v8, %v5428_v60  ;;  %v7333_v36 = vld [vmem:[#allocation64_spill] sm:$0xff] }
 0x275   :  { %v2264_v18 = vadd.f32 %v2263_v30, %v2050_v11  ;;  %v1871_v1 = vsub.f32 %v5103_v46, %v5428_v60  ;;  %v2054_v31 = vmul.f32 %v1865_v39, %v1865_v39  ;;  %v2055_v10 = vmul.f32 %v1866_v35, %v1866_v35  ;;  %v7334_v11 = vld [vmem:[#allocation155_spill] sm:$0xff]  ;;  %v7335_v39 = vld [vmem:[#allocation66_spill] sm:$0xff] }
 0x276   :  { %v2259_v43 = vadd.f32 %v2258_v42, %v2257_v51  ;;  %v2052_v45 = vmul.f32 %v1863_v33, %v1863_v33  ;;  %v2267_v54 = vsel %vm1501_vm2, %v2053_v28, 0.0  ;;  %v5496_v22 = vmul.f32 0.0012755102, %v1667_v0  ;;  %v7336_v51 = vld [vmem:[#allocation67_spill] sm:$0xff]  ;;  %v1676_v42 = vpop.xlane.xlu1 %1675 }
 0x277   :  { %v2265_v40 = vadd.f32 %v2264_v18, %v2051_v63  ;;  %v2056_v9 = vmul.f32 %v1867_v48, %v1867_v48  ;;  %v2271_v32 = vadd.f32 %v2055_v10, %v2054_v31  ;;  %v1872_v56 = vsub.f32 %v7333_v36, %v5446_v13  ;;  %v7337_v31 = vld [vmem:[#allocation68_spill] sm:$0xff] }
 0x278   :  { %2260 = vadd.xlane.f32.xlu1 %v2259_v43  ;;  %v1870_v30 = vsub.f32 %v7334_v11, %v5428_v60  ;;  %v2057_v8 = vmul.f32 %v1868_v26, %v1868_v26  ;;  %v1873_v35 = vsub.f32 %v7335_v39, %v5446_v13  ;;  %v1874_v33 = vsub.f32 %v7336_v51, %v5446_v13  ;;  %v7338_v10 = vld [vmem:[#allocation156_spill] sm:$0xff]  ;;  %v7339_v51 = vld [vmem:[#allocation159_spill] sm:$0xff] }
 0x279   :  { %v2266_v28 = vadd.f32 %v2265_v40, %v2052_v45  ;;  %v2058_v0 = vmul.f32 %v1869_v14, %v1869_v14  ;;  %v2060_v63 = vmul.f32 %v1871_v1, %v1871_v1  ;;  %v2272_v48 = vadd.f32 %v2271_v32, %v2056_v9 }
 0x27a   :  { %v1875_v18 = vsub.f32 %v7337_v31, %v5446_v13  ;;  %v1876_v43 = vsub.f32 %v7338_v10, %v5446_v13  ;;  %v2061_v36 = vmul.f32 %v1872_v56, %v1872_v56  ;;  %v2062_v46 = vmul.f32 %v1873_v35, %v1873_v35  ;;  %v7340_v56 = vld [vmem:[#allocation69_spill] sm:$0xff]  ;;  %v1685_v10 = vpop.xlane.xlu0 %1684 }
 0x27b   :  { %v2268_v26 = vadd.f32 %v2267_v54, %v2266_v28  ;;  %v2273_v11 = vadd.f32 %v2272_v48, %v2057_v8  ;;  %v1877_v39 = vsub.f32 %v5107_v29, %v5446_v13  ;;  %v1878_v45 = vsub.f32 %v7339_v51, %v5446_v13  ;;  %v7341_v8 = vld [vmem:[#allocation70_spill] sm:$0xff]  ;;  %v1694_v51 = vpop.xlane.xlu1 %1693 }
 0x27c   :  { %v5514_v40 = vmul.f32 0.0012755102, %v1676_v42  ;;  %v2059_v14 = vmul.f32 %v1870_v30, %v1870_v30  ;;  %v2063_v1 = vmul.f32 %v1874_v33, %v1874_v33  ;;  %v2280_v9 = vadd.f32 %v2062_v46, %v2061_v36  ;;  %v7342_v42 = vld [vmem:[#allocation71_spill] sm:$0xff] }
 0x27d   :  { %2269 = vadd.xlane.f32.xlu0 %v2268_v26  ;;  %v2274_v32 = vadd.f32 %v2273_v11, %v2058_v0  ;;  %v2276_v31 = vsel %vm1501_vm2, %v2060_v63, 0.0  ;;  %v1879_v35 = vsub.f32 %v7340_v56, %v5459_v17  ;;  %v1880_v54 = vsub.f32 %v7341_v8, %v5459_v17  ;;  %v7343_v11 = vld [vmem:[#allocation73_spill] sm:$0xff] }
 0x27e   :  { %v2064_v28 = vmul.f32 %v1875_v18, %v1875_v18  ;;  %v2065_v48 = vmul.f32 %v1876_v43, %v1876_v43  ;;  %v2281_v29 = vadd.f32 %v2280_v9, %v2063_v1  ;;  %v1881_v30 = vsub.f32 %v7342_v42, %v5459_v17  ;;  %v7344_v9 = vld [vmem:[#allocation160_spill] sm:$0xff] }
 0x27f   :  { %v2275_v33 = vadd.f32 %v2274_v32, %v2059_v14  ;;  %v2066_v46 = vmul.f32 %v1877_v39, %v1877_v39  ;;  %v2067_v36 = vmul.f32 %v1878_v45, %v1878_v45  ;;  %v1882_v0 = vsub.f32 %v7343_v11, %v5459_v17  ;;  %v7345_v32 = vld [vmem:[#allocation72_spill] sm:$0xff] }
 0x280   :  { %v2282_v63 = vadd.f32 %v2281_v29, %v2064_v28  ;;  %v1885_v26 = vsub.f32 %v5125_v61, %v5459_v17  ;;  %v2068_v56 = vmul.f32 %v1879_v35, %v1879_v35  ;;  %v2069_v8 = vmul.f32 %v1880_v54, %v1880_v54  ;;  %v7346_v35 = vld [vmem:[#allocation161_spill] sm:$0xff] }
 0x281   :  { %v2277_v18 = vadd.f32 %v2276_v31, %v2275_v33  ;;  %v5527_v43 = vmul.f32 0.0012755102, %v1685_v10  ;;  %v5529_v1 = vmul.f32 0.0012755102, %v1694_v51  ;;  %v1883_v42 = vsub.f32 %v7344_v9, %v5459_v17  ;;  %v7347_v31 = vld [vmem:[#allocation74_spill] sm:$0xff]  ;;  %v7348_v51 = vld [vmem:[#allocation75_spill] sm:$0xff] }
 0x282   :  { %v2283_v14 = vadd.f32 %v2282_v63, %v2065_v48  ;;  %v2070_v39 = vmul.f32 %v1881_v30, %v1881_v30  ;;  %v2289_v45 = vadd.f32 %v2069_v8, %v2068_v56  ;;  %v1886_v11 = vsub.f32 %v7345_v32, %v5461_v7  ;;  %v7349_v56 = vld [vmem:[#allocation76_spill] sm:$0xff] }
 0x283   :  { %2278 = vadd.xlane.f32.xlu1 %v2277_v18  ;;  %v2285_v29 = vsel %vm1501_vm2, %v2067_v36, 0.0  ;;  %v1884_v54 = vsub.f32 %v7346_v35, %v5459_v17  ;;  %v1887_v10 = vsub.f32 %v7347_v31, %v5461_v7  ;;  %v1888_v28 = vsub.f32 %v7348_v51, %v5461_v7  ;;  %v7350_v31 = vld [vmem:[#allocation162_spill] sm:$0xff] }
 0x284   :  { %v2284_v33 = vadd.f32 %v2283_v14, %v2066_v46  ;;  %v2071_v61 = vmul.f32 %v1882_v0, %v1882_v0  ;;  %v2074_v48 = vmul.f32 %v1885_v26, %v1885_v26  ;;  %v2290_v30 = vadd.f32 %v2289_v45, %v2070_v39  ;;  %v7351_v46 = vld [vmem:[#allocation164_spill] sm:$0xff] }
 0x285   :  { %v1889_v8 = vsub.f32 %v7349_v56, %v5461_v7  ;;  %v1892_v63 = vsub.f32 %v5134_v3, %v5461_v7  ;;  %v2075_v36 = vmul.f32 %v1886_v11, %v1886_v11  ;;  %v2076_v18 = vmul.f32 %v1887_v10, %v1887_v10  ;;  %v7352_v56 = vld [vmem:[#allocation77_spill] sm:$0xff]  ;;  %v7353_v11 = vld [vmem:[#allocation78_spill] sm:$0xff] }
 0x286   :  { %v2286_v32 = vadd.f32 %v2285_v29, %v2284_v33  ;;  %v2072_v35 = vmul.f32 %v1883_v42, %v1883_v42  ;;  %v2291_v9 = vadd.f32 %v2290_v30, %v2071_v61  ;;  %v1890_v4 = vsub.f32 %v7350_v31, %v5461_v7  ;;  %v1703_v33 = vpop.xlane.xlu0 %1702 }
 0x287   :  { %v2073_v19 = vmul.f32 %v1884_v54, %v1884_v54  ;;  %v1891_v0 = vsub.f32 %v7351_v46, %v5461_v7  ;;  %v2077_v26 = vmul.f32 %v1888_v28, %v1888_v28  ;;  %v2298_v14 = vadd.f32 %v2076_v18, %v2075_v36  ;;  %v7354_v54 = vld [vmem:[#allocation79_spill] sm:$0xff] }
 0x288   :  { %2287 = vadd.xlane.f32.xlu0 %v2286_v32  ;;  %v2292_v39 = vadd.f32 %v2291_v9, %v2072_v35  ;;  %v2081_v45 = vmul.f32 %v1892_v63, %v1892_v63  ;;  %v1893_v3 = vsub.f32 %v7352_v56, %v5496_v22  ;;  %v1894_v29 = vsub.f32 %v7353_v11, %v5496_v22  ;;  %v7355_v32 = vld [vmem:[#allocation81_spill] sm:$0xff]  ;;  %v7356_v35 = vld [vmem:[#allocation166_spill] sm:$0xff] }
 0x289   :  { %v2294_v61 = vsel %vm1501_vm2, %v2074_v48, 0.0  ;;  %v2078_v42 = vmul.f32 %v1889_v8, %v1889_v8  ;;  %v2299_v10 = vadd.f32 %v2298_v14, %v2077_v26  ;;  %v1895_v30 = vsub.f32 %v7354_v54, %v5496_v22 }
 0x28a   :  { %v2293_v46 = vadd.f32 %v2292_v39, %v2073_v19  ;;  %v2079_v28 = vmul.f32 %v1890_v4, %v1890_v4  ;;  %v1896_v9 = vsub.f32 %v7355_v32, %v5496_v22  ;;  %v1897_v63 = vsub.f32 %v7356_v35, %v5496_v22  ;;  %v7357_v32 = vld [vmem:[#allocation80_spill] sm:$0xff] }
 0x28b   :  { %v2300_v36 = vadd.f32 %v2299_v10, %v2078_v42  ;;  %v1899_v18 = vsub.f32 %v5147_v20, %v5496_v22  ;;  %v2082_v11 = vmul.f32 %v1893_v3, %v1893_v3  ;;  %v2083_v48 = vmul.f32 %v1894_v29, %v1894_v29  ;;  %v7358_v42 = vld [vmem:[#allocation167_spill] sm:$0xff]  ;;  %v7359_v3 = vld [vmem:[#allocation82_spill] sm:$0xff] }
 0x28c   :  { %v2295_v8 = vadd.f32 %v2294_v61, %v2293_v46  ;;  %v2080_v26 = vmul.f32 %v1891_v0, %v1891_v0  ;;  %v2303_v14 = vsel %vm1501_vm2, %v2081_v45, 0.0  ;;  %v5564_v56 = vmul.f32 0.0012755102, %v1703_v33  ;;  %v7360_v46 = vld [vmem:[#allocation83_spill] sm:$0xff]  ;;  %v1712_v61 = vpop.xlane.xlu1 %1711 }
 0x28d   :  { %v2301_v19 = vadd.f32 %v2300_v36, %v2079_v28  ;;  %v2084_v4 = vmul.f32 %v1895_v30, %v1895_v30  ;;  %v2307_v39 = vadd.f32 %v2083_v48, %v2082_v11  ;;  %v1900_v54 = vsub.f32 %v7357_v32, %v5514_v40  ;;  %v7361_v11 = vld [vmem:[#allocation84_spill] sm:$0xff] }
 0x28e   :  { %2296 = vadd.xlane.f32.xlu1 %v2295_v8  ;;  %v1898_v10 = vsub.f32 %v7358_v42, %v5496_v22  ;;  %v2085_v35 = vmul.f32 %v1896_v9, %v1896_v9  ;;  %v1901_v29 = vsub.f32 %v7359_v3, %v5514_v40  ;;  %v1902_v0 = vsub.f32 %v7360_v46, %v5514_v40  ;;  %v7362_v48 = vld [vmem:[#allocation168_spill] sm:$0xff]  ;;  %v7363_v46 = vld [vmem:[#allocation171_spill] sm:$0xff] }
 0x28f   :  { %v2302_v45 = vadd.f32 %v2301_v19, %v2080_v26  ;;  %v2086_v33 = vmul.f32 %v1897_v63, %v1897_v63  ;;  %v2088_v28 = vmul.f32 %v1899_v18, %v1899_v18  ;;  %v2308_v30 = vadd.f32 %v2307_v39, %v2084_v4 }
 0x290   :  { %v1903_v36 = vsub.f32 %v7361_v11, %v5514_v40  ;;  %v1904_v8 = vsub.f32 %v7362_v48, %v5514_v40  ;;  %v2089_v32 = vmul.f32 %v1900_v54, %v1900_v54  ;;  %v2090_v20 = vmul.f32 %v1901_v29, %v1901_v29  ;;  %v7364_v54 = vld [vmem:[#allocation85_spill] sm:$0xff]  ;;  %v1721_v48 = vpop.xlane.xlu0 %1720 }
 0x291   :  { %v2304_v9 = vadd.f32 %v2303_v14, %v2302_v45  ;;  %v2309_v42 = vadd.f32 %v2308_v30, %v2085_v35  ;;  %v1905_v3 = vsub.f32 %v5151_v34, %v5514_v40  ;;  %v1906_v26 = vsub.f32 %v7363_v46, %v5514_v40  ;;  %v7365_v35 = vld [vmem:[#allocation86_spill] sm:$0xff]  ;;  %v1730_v46 = vpop.xlane.xlu1 %1729 }
 0x292   :  { %v5582_v19 = vmul.f32 0.0012755102, %v1712_v61  ;;  %v2087_v63 = vmul.f32 %v1898_v10, %v1898_v10  ;;  %v2091_v18 = vmul.f32 %v1902_v0, %v1902_v0  ;;  %v2316_v4 = vadd.f32 %v2090_v20, %v2089_v32  ;;  %v7366_v61 = vld [vmem:[#allocation87_spill] sm:$0xff] }
 0x293   :  { %2305 = vadd.xlane.f32.xlu0 %v2304_v9  ;;  %v2310_v39 = vadd.f32 %v2309_v42, %v2086_v33  ;;  %v2312_v11 = vsel %vm1501_vm2, %v2088_v28, 0.0  ;;  %v1907_v29 = vsub.f32 %v7364_v54, %v5527_v43  ;;  %v1908_v14 = vsub.f32 %v7365_v35, %v5527_v43  ;;  %v7367_v42 = vld [vmem:[#allocation89_spill] sm:$0xff] }
 0x294   :  { %v2092_v45 = vmul.f32 %v1903_v36, %v1903_v36  ;;  %v2093_v30 = vmul.f32 %v1904_v8, %v1904_v8  ;;  %v2317_v34 = vadd.f32 %v2316_v4, %v2091_v18  ;;  %v1909_v10 = vsub.f32 %v7366_v61, %v5527_v43  ;;  %v7368_v4 = vld [vmem:[#allocation172_spill] sm:$0xff] }
 0x295   :  { %v2311_v0 = vadd.f32 %v2310_v39, %v2087_v63  ;;  %v2094_v20 = vmul.f32 %v1905_v3, %v1905_v3  ;;  %v2095_v32 = vmul.f32 %v1906_v26, %v1906_v26  ;;  %v1910_v33 = vsub.f32 %v7367_v42, %v5527_v43  ;;  %v7369_v39 = vld [vmem:[#allocation88_spill] sm:$0xff] }
 0x296   :  { %v2318_v28 = vadd.f32 %v2317_v34, %v2092_v45  ;;  %v1913_v9 = vsub.f32 %v5169_v12, %v5527_v43  ;;  %v2096_v54 = vmul.f32 %v1907_v29, %v1907_v29  ;;  %v2097_v35 = vmul.f32 %v1908_v14, %v1908_v14  ;;  %v7370_v29 = vld [vmem:[#allocation173_spill] sm:$0xff] }
 0x297   :  { %v2313_v36 = vadd.f32 %v2312_v11, %v2311_v0  ;;  %v5595_v8 = vmul.f32 0.0012755102, %v1721_v48  ;;  %v5597_v18 = vmul.f32 0.0012755102, %v1730_v46  ;;  %v1911_v61 = vsub.f32 %v7368_v4, %v5527_v43  ;;  %v7371_v11 = vld [vmem:[#allocation90_spill] sm:$0xff]  ;;  %v7372_v46 = vld [vmem:[#allocation91_spill] sm:$0xff] }
 0x298   :  { %v2319_v63 = vadd.f32 %v2318_v28, %v2093_v30  ;;  %v2098_v3 = vmul.f32 %v1909_v10, %v1909_v10  ;;  %v2325_v26 = vadd.f32 %v2097_v35, %v2096_v54  ;;  %v1914_v42 = vsub.f32 %v7369_v39, %v5529_v1  ;;  %v7373_v54 = vld [vmem:[#allocation92_spill] sm:$0xff]  ;;  %v7374_v28 = vld [vmem:[#allocation174_spill] sm:$0xff] }
 0x299   :  { %2314 = vadd.xlane.f32.xlu1 %v2313_v36  ;;  %v2321_v34 = vsel %vm1501_vm2, %v2095_v32, 0.0  ;;  %v1912_v14 = vsub.f32 %v7370_v29, %v5527_v43  ;;  %v1915_v48 = vsub.f32 %v7371_v11, %v5529_v1  ;;  %v1916_v45 = vsub.f32 %v7372_v46, %v5529_v1 }
 0x29a   :  { %v2320_v0 = vadd.f32 %v2319_v63, %v2094_v20  ;;  %v2099_v12 = vmul.f32 %v1910_v33, %v1910_v33  ;;  %v2102_v30 = vmul.f32 %v1913_v9, %v1913_v9  ;;  %v2326_v10 = vadd.f32 %v2325_v26, %v2098_v3  ;;  %v7375_v20 = vld [vmem:[#allocation176_spill] sm:$0xff]  ;;  %v7376_v26 = vld [vmem:[#allocation93_spill] sm:$0xff] }
 0x29b   :  { %v1917_v35 = vsub.f32 %v7373_v54, %v5529_v1  ;;  %v1918_v36 = vsub.f32 %v7374_v28, %v5529_v1  ;;  %v2103_v32 = vmul.f32 %v1914_v42, %v1914_v42  ;;  %v2104_v39 = vmul.f32 %v1915_v48, %v1915_v48  ;;  %v7377_v42 = vld [vmem:[#allocation94_spill] sm:$0xff] }
 0x29c   :  { %v2322_v4 = vadd.f32 %v2321_v34, %v2320_v0  ;;  %v2100_v29 = vmul.f32 %v1911_v61, %v1911_v61  ;;  %v2327_v31 = vadd.f32 %v2326_v10, %v2099_v12  ;;  %v1920_v11 = vsub.f32 %v5178_v52, %v5529_v1  ;;  %v7378_v61 = vld [vmem:[#allocation95_spill] sm:$0xff] }
 0x29d   :  { %v2101_v51 = vmul.f32 %v1912_v14, %v1912_v14  ;;  %v1919_v33 = vsub.f32 %v7375_v20, %v5529_v1  ;;  %v2105_v9 = vmul.f32 %v1916_v45, %v1916_v45  ;;  %v2334_v63 = vadd.f32 %v2104_v39, %v2103_v32  ;;  %v7379_v39 = vld [vmem:[#allocation97_spill] sm:$0xff]  ;;  %v1739_v45 = vpop.xlane.xlu0 %1738  ;;  %v7380_v32 = vld [vmem:[#allocation178_spill] sm:$0xff] }
 0x29e   :  { %2323 = vadd.xlane.f32.xlu0 %v2322_v4  ;;  %v2328_v3 = vadd.f32 %v2327_v31, %v2100_v29  ;;  %v1921_v54 = vsub.f32 %v7376_v26, %v5564_v56  ;;  %v1922_v48 = vsub.f32 %v7377_v42, %v5564_v56  ;;  %v1923_v12 = vsub.f32 %v7378_v61, %v5564_v56 }
 0x29f   :  { %v2330_v34 = vsel %vm1501_vm2, %v2102_v30, 0.0  ;;  %v2106_v0 = vmul.f32 %v1917_v35, %v1917_v35  ;;  %v2107_v14 = vmul.f32 %v1918_v36, %v1918_v36  ;;  %v2335_v10 = vadd.f32 %v2334_v63, %v2105_v9  ;;  %v7381_v35 = vld [vmem:[#allocation179_spill] sm:$0xff]  ;;  %v7382_v63 = vld [vmem:[#allocation96_spill] sm:$0xff] }
 0x2a0   :  { %v2329_v52 = vadd.f32 %v2328_v3, %v2101_v51  ;;  %v2109_v20 = vmul.f32 %v1920_v11, %v1920_v11  ;;  %v1924_v4 = vsub.f32 %v7379_v39, %v5564_v56  ;;  %v2110_v31 = vmul.f32 %v1921_v54, %v1921_v54  ;;  %v7383_v3 = vld [vmem:[#allocation98_spill] sm:$0xff] }
 0x2a1   :  { %v2336_v29 = vadd.f32 %v2335_v10, %v2106_v0  ;;  %v1925_v26 = vsub.f32 %v7380_v32, %v5564_v56  ;;  %v1927_v42 = vsub.f32 %v5191_v49, %v5564_v56  ;;  %v2111_v61 = vmul.f32 %v1922_v48, %v1922_v48 }
 0x2a2   :  { %v2331_v28 = vadd.f32 %v2330_v34, %v2329_v52  ;;  %v2108_v30 = vmul.f32 %v1919_v33, %v1919_v33  ;;  %v1926_v36 = vsub.f32 %v7381_v35, %v5564_v56  ;;  %v2112_v51 = vmul.f32 %v1923_v12, %v1923_v12  ;;  %v7384_v52 = vld [vmem:[#allocation99_spill] sm:$0xff] }
 0x2a3   :  { %v2337_v11 = vadd.f32 %v2336_v29, %v2107_v14  ;;  %v2343_v9 = vadd.f32 %v2111_v61, %v2110_v31  ;;  %v1928_v54 = vsub.f32 %v7382_v63, %v5582_v19  ;;  %v1929_v0 = vsub.f32 %v7383_v3, %v5582_v19  ;;  %v7385_v61 = vld [vmem:[#allocation100_spill] sm:$0xff] }
 0x2a4   :  { %2332 = vadd.xlane.f32.xlu1 %v2331_v28  ;;  %v2339_v10 = vsel %vm1501_vm2, %v2109_v20, 0.0  ;;  %v5638_v32 = vmul.f32 0.0012755102, %v1739_v45  ;;  %v2113_v48 = vmul.f32 %v1924_v4, %v1924_v4  ;;  %v1930_v33 = vsub.f32 %v7384_v52, %v5582_v19  ;;  %v7386_v4 = vld [vmem:[#allocation180_spill] sm:$0xff] }
 0x2a5   :  { %v2338_v34 = vadd.f32 %v2337_v11, %v2108_v30  ;;  %v2114_v49 = vmul.f32 %v1925_v26, %v1925_v26  ;;  %v2116_v12 = vmul.f32 %v1927_v42, %v1927_v42  ;;  %v2344_v14 = vadd.f32 %v2343_v9, %v2112_v51  ;;  %v7387_v26 = vld [vmem:[#allocation101_spill] sm:$0xff]  ;;  %v7388_v30 = vld [vmem:[#allocation102_spill] sm:$0xff] }
 0x2a6   :  { %v1931_v31 = vsub.f32 %v7385_v61, %v5582_v19  ;;  %v1934_v29 = vsub.f32 %v5200_v24, %v5582_v19  ;;  %v2117_v3 = vmul.f32 %v1928_v54, %v1928_v54  ;;  %v2118_v28 = vmul.f32 %v1929_v0, %v1929_v0  ;;  %v7389_v54 = vld [vmem:[#allocation182_spill] sm:$0xff] }
 0x2a7   :  { %v2340_v63 = vadd.f32 %v2339_v10, %v2338_v34  ;;  %v2115_v20 = vmul.f32 %v1926_v36, %v1926_v36  ;;  %v2345_v45 = vadd.f32 %v2344_v14, %v2113_v48  ;;  %v1932_v35 = vsub.f32 %v7386_v4, %v5582_v19  ;;  %v7390_v36 = vld [vmem:[#allocation103_spill] sm:$0xff] }
 0x2a8   :  { %v2119_v39 = vmul.f32 %v1930_v33, %v1930_v33  ;;  %v2352_v52 = vadd.f32 %v2118_v28, %v2117_v3  ;;  %v1935_v42 = vsub.f32 %v7387_v26, %v5595_v8  ;;  %v1936_v51 = vsub.f32 %v7388_v30, %v5595_v8  ;;  %v7391_v3 = vld [vmem:[#allocation105_spill] sm:$0xff]  ;;  %v7392_v26 = vld [vmem:[#allocation184_spill] sm:$0xff] }
 0x2a9   :  { %2341 = vadd.xlane.f32.xlu0 %v2340_v63  ;;  %v2346_v11 = vadd.f32 %v2345_v45, %v2114_v49  ;;  %v2348_v9 = vsel %vm1501_vm2, %v2116_v12, 0.0  ;;  %v1933_v0 = vsub.f32 %v7389_v54, %v5582_v19  ;;  %v1937_v10 = vsub.f32 %v7390_v36, %v5595_v8  ;;  %v7393_v54 = vld [vmem:[#allocation187_spill] sm:$0xff] }
 0x2aa   :  { %v2120_v48 = vmul.f32 %v1931_v31, %v1931_v31  ;;  %v2123_v34 = vmul.f32 %v1934_v29, %v1934_v29  ;;  %v2353_v33 = vadd.f32 %v2352_v52, %v2119_v39  ;;  %v1938_v14 = vsub.f32 %v7391_v3, %v5595_v8  ;;  %v7394_v52 = vld [vmem:[#allocation104_spill] sm:$0xff] }
 0x2ab   :  { %v2347_v28 = vadd.f32 %v2346_v11, %v2115_v20  ;;  %v1939_v30 = vsub.f32 %v7392_v26, %v5595_v8  ;;  %v2124_v63 = vmul.f32 %v1935_v42, %v1935_v42  ;;  %v2125_v49 = vmul.f32 %v1936_v51, %v1936_v51  ;;  %v7395_v26 = vld [vmem:[#allocation106_spill] sm:$0xff] }
 0x2ac   :  { %v2121_v45 = vmul.f32 %v1932_v35, %v1932_v35  ;;  %v2354_v12 = vadd.f32 %v2353_v33, %v2120_v48  ;;  %v1940_v24 = vsub.f32 %v5209_v53, %v5595_v8  ;;  %v1941_v36 = vsub.f32 %v7393_v54, %v5595_v8  ;;  %v7396_v35 = vld [vmem:[#allocation107_spill] sm:$0xff] }
 0x2ad   :  { %v2349_v31 = vadd.f32 %v2348_v9, %v2347_v28  ;;  %v2126_v29 = vmul.f32 %v1937_v10, %v1937_v10  ;;  %v2361_v39 = vadd.f32 %v2125_v49, %v2124_v63  ;;  %v1942_v3 = vsub.f32 %v7394_v52, %v5597_v18  ;;  %v7397_v10 = vld [vmem:[#allocation108_spill] sm:$0xff] }
 0x2ae   :  { %v2122_v20 = vmul.f32 %v1933_v0, %v1933_v0  ;;  %v2355_v11 = vadd.f32 %v2354_v12, %v2121_v45  ;;  %v1943_v42 = vsub.f32 %v7395_v26, %v5597_v18  ;;  %v1944_v51 = vsub.f32 %v7396_v35, %v5597_v18  ;;  %v7398_v26 = vld [vmem:[#allocation186_spill] sm:$0xff] }
 0x2af   :  { %2350 = vadd.xlane.f32.xlu1 %v2349_v31  ;;  %v2357_v48 = vsel %vm1501_vm2, %v2123_v34, 0.0  ;;  %v2127_v33 = vmul.f32 %v1938_v14, %v1938_v14  ;;  %v2128_v53 = vmul.f32 %v1939_v30, %v1939_v30  ;;  %v2362_v54 = vadd.f32 %v2361_v39, %v2126_v29  ;;  %v7399_v31 = vld [vmem:[#allocation188_spill] sm:$0xff]  ;;  %v7400_v29 = vld [vmem:[#allocation189_spill] sm:$0xff] }
 0x2b0   :  { %v2356_v9 = vadd.f32 %v2355_v11, %v2122_v20  ;;  %v1945_v28 = vsub.f32 %v7397_v10, %v5597_v18  ;;  %v2131_v63 = vmul.f32 %v1942_v3, %v1942_v3  ;;  %v2132_v49 = vmul.f32 %v1943_v42, %v1943_v42  ;;  %v7401_v20 = vld [vmem:[#allocation109_spill] sm:$0xff]  ;;  %v7403_v42 = vld [vmem:[#allocation111_spill] sm:$0xff] }
 0x2b1   :  { %v2129_v0 = vmul.f32 %v1940_v24, %v1940_v24  ;;  %v2130_v45 = vmul.f32 %v1941_v36, %v1941_v36  ;;  %v2363_v12 = vadd.f32 %v2362_v54, %v2127_v33  ;;  %v1946_v52 = vsub.f32 %v7398_v26, %v5597_v18  ;;  %v7402_v24 = vld [vmem:[#allocation110_spill] sm:$0xff] }
 0x2b2   :  { %v2358_v4 = vadd.f32 %v2357_v48, %v2356_v9  ;;  %v1947_v35 = vsub.f32 %v7399_v31, %v5597_v18  ;;  %v2133_v34 = vmul.f32 %v1944_v51, %v1944_v51  ;;  %v2370_v14 = vadd.f32 %v2132_v49, %v2131_v63  ;;  %v7404_v49 = vld [vmem:[#allocation112_spill] sm:$0xff] }
 0x2b3   :  { %v2364_v30 = vadd.f32 %v2363_v12, %v2128_v53  ;;  %v1948_v39 = vsub.f32 %v7400_v29, %v5597_v18  ;;  %v1949_v3 = vsub.f32 %v7401_v20, %v5638_v32  ;;  %v1950_v36 = vsub.f32 %v7402_v24, %v5638_v32 }
 0x2b4   :  { %2359 = vadd.xlane.f32.xlu0 %v2358_v4  ;;  %v2134_v54 = vmul.f32 %v1945_v28, %v1945_v28  ;;  %v2371_v11 = vadd.f32 %v2370_v14, %v2133_v34  ;;  %v1951_v48 = vsub.f32 %v7403_v42, %v5638_v32  ;;  %v2366_v51 = vsel %vm1501_vm2, %v2130_v45, 0.0 }
 0x2b5   :  { %v2365_v33 = vadd.f32 %v2364_v30, %v2129_v0  ;;  %v2138_v9 = vmul.f32 %v1949_v3, %v1949_v3  ;;  %v2135_v53 = vmul.f32 %v1946_v52, %v1946_v52  ;;  %v1952_v12 = vsub.f32 %v7404_v49, %v5638_v32 }
 0x2b6   :  { %v2372_v63 = vadd.f32 %v2371_v11, %v2134_v54  ;;  %v2139_v29 = vmul.f32 %v1950_v36, %v1950_v36  ;;  %v2136_v31 = vmul.f32 %v1947_v35, %v1947_v35  ;;  %v2137_v26 = vmul.f32 %v1948_v39, %v1948_v39 }
 0x2b7   :  { %v2367_v20 = vadd.f32 %v2366_v51, %v2365_v33  ;;  %v1953_v4 = vsub.f32 %v5227_v57, %v5638_v32  ;;  %v2140_v28 = vmul.f32 %v1951_v48, %v1951_v48  ;;  %v1955_v0 = vsub.f32 %v5233_v37, %v5638_v32  ;;  %v7423_v37 = vld [vmem:[#allocation118_spill] sm:$0xff] }
 0x2b8   :  { %v2373_v24 = vadd.f32 %v2372_v63, %v2135_v53  ;;  %v2379_v34 = vadd.f32 %v2139_v29, %v2138_v9  ;;  %v1954_v52 = vsub.f32 %v5231_v58, %v5638_v32  ;;  %v2141_v14 = vmul.f32 %v1952_v12, %v1952_v12  ;;  %v7425_v58 = vld [vmem:[#allocation16_spill] sm:$0xff] }
 0x2b9   :  { %2368 = vadd.xlane.f32.xlu1 %v2367_v20  ;;  %v2375_v3 = vsel %vm1501_vm2, %v2137_v26, 0.0  ;;  %v2142_v39 = vmul.f32 %v1953_v4, %v1953_v4  ;;  %v2144_v54 = vmul.f32 %v1955_v0, %v1955_v0 }
 0x2ba   :  { %v2374_v45 = vadd.f32 %v2373_v24, %v2136_v31  ;;  %v2380_v30 = vadd.f32 %v2379_v34, %v2140_v28  ;;  %v2143_v11 = vmul.f32 %v1954_v52, %v1954_v52  ;;  %v5700_v28 = vld [vmem:[%s6755_s2] sm:$0xff] }
 0x2bb   :  { %v2384_v20 = vsel %vm1501_vm2, %v2144_v54, 0.0 }
 0x2bc   :  { %v2376_v35 = vadd.f32 %v2375_v3, %v2374_v45  ;;  %v2381_v36 = vadd.f32 %v2380_v30, %v2141_v14  ;;  %v7405_v14 = vld [vmem:[#allocation193_spill] sm:$0xff] }
 0x2bd   :  { %v5707_v3 = vld [vmem:[%s6755_s2 + $0x8] sm:$0xff] }
 0x2be   :  { %2377 = vadd.xlane.f32.xlu0 %v2376_v35  ;;  %v2382_v48 = vadd.f32 %v2381_v36, %v2142_v39 }
 0x2c0   :  { %v2383_v29 = vadd.f32 %v2382_v48, %v2143_v11 }
 0x2c2   :  { %v2385_v33 = vadd.f32 %v2384_v20, %v2383_v29  ;;  %v5715_v20 = vld [vmem:[%s6755_s2 + $0x10] sm:$0xff] }
 0x2c4   :  { %v2153_v51 = vpop.xlane.xlu1 %2152  ;;  %2386 = vadd.xlane.f32.xlu1 %v2385_v33 }
 0x2c5   :  { %v2388_v31 = vmul.f32 0.0012755102, %v2153_v51 }
 0x2c7   :  { %v2415_v24 = vadd.f32 1e-05, %v2388_v31 }
 0x2c9   :  { %4104 = vrsqrt.f32 %v2415_v24  ;;  %v2162_v9 = vpop.xlane.xlu0 %2161 }
 0x2ca   :  { %v2389_v53 = vmul.f32 0.0012755102, %v2162_v9 }
 0x2cc   :  { %v2416_v63 = vadd.f32 1e-05, %v2389_v53 }
 0x2ce   :  { %4106 = vrsqrt.f32 %v2416_v63  ;;  %v2171_v26 = vpop.xlane.xlu1 %2170 }
 0x2cf   :  { %v2390_v12 = vmul.f32 0.0012755102, %v2171_v26  ;;  %v5723_v26 = vld [vmem:[%s6755_s2 + $0x18] sm:$0xff] }
 0x2d1   :  { %v2417_v4 = vadd.f32 1e-05, %v2390_v12 }
 0x2d3   :  { %v4105_v34 = vpop.eup %4104  ;;  %4108 = vrsqrt.f32 %v2417_v4  ;;  %v2180_v0 = vpop.xlane.xlu0 %2179  ;;  %v5729_v4 = vld [vmem:[%s6755_s2 + $0x20] sm:$0xff] }
 0x2d4   :  { %v2496_v45 = vmul.f32 %v4105_v34, %v5700_v28  ;;  %v2391_v52 = vmul.f32 0.0012755102, %v2180_v0 }
 0x2d6   :  { %2687 = vperm.xlu1 %3922, %v2496_v45   ;;  %v2523_v30 = vmul.f32 %v2496_v45, %v7405_v14  ;;  %v2418_v35 = vadd.f32 1e-05, %v2391_v52 }
 0x2d8   :  { %v4107_v39 = vpop.eup %4106  ;;  %2577 = vrot.lane.b32.xlu0 %v2523_v30, %s4210_s26  ;;  %v2189_v36 = vpop.xlane.xlu1 %2188  ;;  %4110 = vrsqrt.f32 %v2418_v35  ;;  %v5737_v35 = vld [vmem:[%s6755_s2 + $0x28] sm:$0xff] }
 0x2d9   :  { %v2497_v54 = vmul.f32 %v4107_v39, %v5707_v3  ;;  %v2392_v11 = vmul.f32 0.0012755102, %v2189_v36 }
 0x2db   :  { %v2524_v48 = vmul.f32 %v2497_v54, %v5250_v47  ;;  %v2419_v29 = vadd.f32 1e-05, %v2392_v11 }
 0x2dc   :  { %2692 = vperm.xlu0 %3923, %v2497_v54  }
 0x2dd   :  { %v4109_v33 = vpop.eup %4108  ;;  %2579 = vrot.lane.b32.xlu1 %v2524_v48, %s4210_s26  ;;  %4112 = vrsqrt.f32 %v2419_v29 }
 0x2de   :  { %v2198_v51 = vpop.xlane.xlu0 %2197  ;;  %v2498_v31 = vmul.f32 %v4109_v33, %v5715_v20 }
 0x2df   :  { %v2393_v24 = vmul.f32 0.0012755102, %v2198_v51 }
 0x2e0   :  { %v2525_v53 = vmul.f32 %v2498_v31, %v5264_v62 }
 0x2e1   :  { %2697 = vperm.xlu1 %3922, %v2498_v31   ;;  %v2420_v9 = vadd.f32 1e-05, %v2393_v24 }
 0x2e2   :  { %v4111_v47 = vpop.eup %4110 }
 0x2e3   :  { %4114 = vrsqrt.f32 %v2420_v9  ;;  %v2207_v63 = vpop.xlane.xlu1 %2206  ;;  %v2499_v0 = vmul.f32 %v4111_v47, %v5723_v26 }
 0x2e4   :  { %v2394_v12 = vmul.f32 0.0012755102, %v2207_v63 }
 0x2e5   :  { %2581 = vrot.lane.b32.xlu1 %v2525_v53, %s4210_s26  ;;  %v2526_v30 = vmul.f32 %v2499_v0, %v5277_v16  ;;  %v5746_v16 = vld [vmem:[%s6755_s2 + $0x30] sm:$0xff]  ;;  %v5754_v53 = vld [vmem:[%s6755_s2 + $0x38] sm:$0xff] }
 0x2e6   :  { %v2421_v34 = vadd.f32 1e-05, %v2394_v12 }
 0x2e7   :  { %v4113_v62 = vpop.eup %4112 }
 0x2e8   :  { %4116 = vrsqrt.f32 %v2421_v34  ;;  %v2500_v45 = vmul.f32 %v4113_v62, %v5729_v4  ;;  %v5762_v62 = vld [vmem:[%s6755_s2 + $0x40] sm:$0xff] }
 0x2e9   :  { %2702 = vperm.xlu1 %3922, %v2499_v0   ;;  %v2216_v52 = vpop.xlane.xlu0 %2215 }
 0x2ea   :  { %v2395_v14 = vmul.f32 0.0012755102, %v2216_v52  ;;  %2707 = vperm.xlu0 %3923, %v2500_v45   ;;  %v2527_v36 = vmul.f32 %v2500_v45, %v5296_v41 }
 0x2ec   :  { %v2422_v39 = vadd.f32 1e-05, %v2395_v14 }
 0x2ed   :  { %2583 = vrot.lane.b32.xlu1 %v2526_v30, %s4210_s26  ;;  %v4115_v54 = vpop.eup %4114 }
 0x2ee   :  { %4118 = vrsqrt.f32 %v2422_v39  ;;  %2585 = vrot.lane.b32.xlu0 %v2527_v36, %s4210_s26  ;;  %v2501_v11 = vmul.f32 %v4115_v54, %v5737_v35  ;;  %v5770_v36 = vld [vmem:[%s6755_s2 + $0x48] sm:$0xff] }
 0x2ef   :  { %v2225_v48 = vpop.xlane.xlu1 %2224 }
 0x2f0   :  { %v2396_v29 = vmul.f32 0.0012755102, %v2225_v48  ;;  %v2528_v41 = vmul.f32 %v2501_v11, %v5310_v59 }
 0x2f1   :  { %2712 = vperm.xlu1 %3922, %v2501_v11  }
 0x2f2   :  { %v4117_v33 = vpop.eup %4116  ;;  %v2423_v51 = vadd.f32 1e-05, %v2396_v29 }
 0x2f3   :  { %v2502_v31 = vmul.f32 %v4117_v33, %v5746_v16 }
 0x2f4   :  { %4120 = vrsqrt.f32 %v2423_v51  ;;  %v2234_v24 = vpop.xlane.xlu0 %2233  ;;  %v5778_v51 = vld [vmem:[%s6755_s2 + $0x50] sm:$0xff] }
 0x2f5   :  { %2587 = vrot.lane.b32.xlu1 %v2528_v41, %s4210_s26  ;;  %v2397_v9 = vmul.f32 0.0012755102, %v2234_v24  ;;  %2717 = vperm.xlu0 %3923, %v2502_v31   ;;  %v2529_v63 = vmul.f32 %v2502_v31, %v5328_v55 }
 0x2f7   :  { %v2424_v47 = vadd.f32 1e-05, %v2397_v9 }
 0x2f8   :  { %v4119_v12 = vpop.eup %4118 }
 0x2f9   :  { %4122 = vrsqrt.f32 %v2424_v47  ;;  %2589 = vrot.lane.b32.xlu0 %v2529_v63, %s4210_s26  ;;  %v2503_v59 = vmul.f32 %v4119_v12, %v5754_v53  ;;  %v5786_v63 = vld [vmem:[%s6755_s2 + $0x58] sm:$0xff] }
 0x2fa   :  { %v2243_v34 = vpop.xlane.xlu1 %2242 }
 0x2fb   :  { %v2398_v0 = vmul.f32 0.0012755102, %v2243_v34  ;;  %2722 = vperm.xlu1 %3922, %v2503_v59   ;;  %v2530_v52 = vmul.f32 %v2503_v59, %v5332_v5 }
 0x2fd   :  { %v2425_v45 = vadd.f32 1e-05, %v2398_v0 }
 0x2fe   :  { %v4121_v14 = vpop.eup %4120 }
 0x2ff   :  { %4124 = vrsqrt.f32 %v2425_v45  ;;  %v2252_v55 = vpop.xlane.xlu0 %2251  ;;  %v2504_v30 = vmul.f32 %v4121_v14, %v5762_v62  ;;  %2591 = vrot.lane.b32.xlu1 %v2530_v52, %s4210_s26  ;;  %v5794_v52 = vld [vmem:[%s6755_s2 + $0x60] sm:$0xff] }
 0x300   :  { %v2399_v39 = vmul.f32 0.0012755102, %v2252_v55 }
 0x301   :  { %2727 = vperm.xlu0 %3923, %v2504_v30   ;;  %v2531_v48 = vmul.f32 %v2504_v30, %v5349_v2 }
 0x302   :  { %v2426_v54 = vadd.f32 1e-05, %v2399_v39 }
 0x303   :  { %v4123_v11 = vpop.eup %4122 }
 0x304   :  { %4126 = vrsqrt.f32 %v2426_v54  ;;  %v2505_v5 = vmul.f32 %v4123_v11, %v5770_v36  ;;  %v5802_v11 = vld [vmem:[%s6755_s2 + $0x68] sm:$0xff] }
 0x305   :  { %v2261_v29 = vpop.xlane.xlu1 %2260  ;;  %2593 = vrot.lane.b32.xlu0 %v2531_v48, %s4210_s26 }
 0x306   :  { %v2400_v33 = vmul.f32 0.0012755102, %v2261_v29  ;;  %2732 = vperm.xlu1 %3922, %v2505_v5   ;;  %v2532_v31 = vmul.f32 %v2505_v5, %v5357_v44 }
 0x308   :  { %v2427_v41 = vadd.f32 1e-05, %v2400_v33 }
 0x309   :  { %v4125_v24 = vpop.eup %4124 }
 0x30a   :  { %4128 = vrsqrt.f32 %v2427_v41  ;;  %v2270_v9 = vpop.xlane.xlu0 %2269  ;;  %v2506_v2 = vmul.f32 %v4125_v24, %v5778_v51  ;;  %2595 = vrot.lane.b32.xlu1 %v2532_v31, %s4210_s26  ;;  %v5810_v31 = vld [vmem:[%s6755_s2 + $0x70] sm:$0xff] }
 0x30b   :  { %v2401_v47 = vmul.f32 0.0012755102, %v2270_v9 }
 0x30c   :  { %2737 = vperm.xlu0 %3923, %v2506_v2   ;;  %v2533_v34 = vmul.f32 %v2506_v2, %v5372_v38 }
 0x30d   :  { %v2428_v12 = vadd.f32 1e-05, %v2401_v47 }
 0x30e   :  { %v4127_v59 = vpop.eup %4126 }
 0x30f   :  { %4130 = vrsqrt.f32 %v2428_v12  ;;  %v2507_v44 = vmul.f32 %v4127_v59, %v5786_v63  ;;  %v5818_v59 = vld [vmem:[%s6755_s2 + $0x78] sm:$0xff] }
 0x310   :  { %v2279_v0 = vpop.xlane.xlu1 %2278  ;;  %2597 = vrot.lane.b32.xlu0 %v2533_v34, %s4210_s26 }
 0x311   :  { %v2402_v45 = vmul.f32 0.0012755102, %v2279_v0  ;;  %2742 = vperm.xlu1 %3922, %v2507_v44   ;;  %v2534_v55 = vmul.f32 %v2507_v44, %v5391_v15 }
 0x313   :  { %v2429_v14 = vadd.f32 1e-05, %v2402_v45 }
 0x314   :  { %v4129_v30 = vpop.eup %4128 }
 0x315   :  { %4132 = vrsqrt.f32 %v2429_v14  ;;  %v2288_v39 = vpop.xlane.xlu0 %2287  ;;  %v2508_v38 = vmul.f32 %v4129_v30, %v5794_v52  ;;  %2599 = vrot.lane.b32.xlu1 %v2534_v55, %s4210_s26  ;;  %v5826_v55 = vld [vmem:[%s6755_s2 + $0x80] sm:$0xff] }
 0x316   :  { %v2403_v54 = vmul.f32 0.0012755102, %v2288_v39 }
 0x317   :  { %2747 = vperm.xlu0 %3923, %v2508_v38   ;;  %v2535_v29 = vmul.f32 %v2508_v38, %v5398_v50 }
 0x318   :  { %v2430_v48 = vadd.f32 1e-05, %v2403_v54 }
 0x319   :  { %v4131_v5 = vpop.eup %4130 }
 0x31a   :  { %4134 = vrsqrt.f32 %v2430_v48  ;;  %v2509_v15 = vmul.f32 %v4131_v5, %v5802_v11  ;;  %v5834_v5 = vld [vmem:[%s6755_s2 + $0x88] sm:$0xff] }
 0x31b   :  { %v2297_v33 = vpop.xlane.xlu1 %2296  ;;  %2601 = vrot.lane.b32.xlu0 %v2535_v29, %s4210_s26 }
 0x31c   :  { %v2404_v41 = vmul.f32 0.0012755102, %v2297_v33  ;;  %2752 = vperm.xlu1 %3922, %v2509_v15   ;;  %v2536_v9 = vmul.f32 %v2509_v15, %v5410_v6 }
 0x31e   :  { %v2431_v24 = vadd.f32 1e-05, %v2404_v41 }
 0x31f   :  { %v4133_v2 = vpop.eup %4132 }
 0x320   :  { %4136 = vrsqrt.f32 %v2431_v24  ;;  %v2306_v47 = vpop.xlane.xlu0 %2305  ;;  %v2510_v50 = vmul.f32 %v4133_v2, %v5810_v31  ;;  %2603 = vrot.lane.b32.xlu1 %v2536_v9, %s4210_s26  ;;  %v5842_v9 = vld [vmem:[%s6755_s2 + $0x90] sm:$0xff] }
 0x321   :  { %v2405_v12 = vmul.f32 0.0012755102, %v2306_v47 }
 0x322   :  { %2757 = vperm.xlu0 %3923, %v2510_v50   ;;  %v2537_v0 = vmul.f32 %v2510_v50, %v5428_v60 }
 0x323   :  { %v2432_v34 = vadd.f32 1e-05, %v2405_v12 }
 0x324   :  { %v4135_v44 = vpop.eup %4134 }
 0x325   :  { %4138 = vrsqrt.f32 %v2432_v34  ;;  %v2511_v6 = vmul.f32 %v4135_v44, %v5818_v59  ;;  %v5850_v44 = vld [vmem:[%s6755_s2 + $0x98] sm:$0xff] }
 0x326   :  { %v2315_v45 = vpop.xlane.xlu1 %2314  ;;  %2605 = vrot.lane.b32.xlu0 %v2537_v0, %s4210_s26 }
 0x327   :  { %v2406_v14 = vmul.f32 0.0012755102, %v2315_v45  ;;  %2762 = vperm.xlu1 %3922, %v2511_v6   ;;  %v2538_v39 = vmul.f32 %v2511_v6, %v5446_v13 }
 0x329   :  { %v2433_v30 = vadd.f32 1e-05, %v2406_v14 }
 0x32a   :  { %v4137_v38 = vpop.eup %4136 }
 0x32b   :  { %4140 = vrsqrt.f32 %v2433_v30  ;;  %v2324_v54 = vpop.xlane.xlu0 %2323  ;;  %v2512_v60 = vmul.f32 %v4137_v38, %v5826_v55  ;;  %2607 = vrot.lane.b32.xlu1 %v2538_v39, %s4210_s26  ;;  %v5858_v39 = vld [vmem:[%s6755_s2 + $0xa0] sm:$0xff] }
 0x32c   :  { %v2407_v48 = vmul.f32 0.0012755102, %v2324_v54 }
 0x32d   :  { %2767 = vperm.xlu0 %3923, %v2512_v60   ;;  %v2539_v33 = vmul.f32 %v2512_v60, %v5459_v17 }
 0x32e   :  { %v2434_v29 = vadd.f32 1e-05, %v2407_v48 }
 0x32f   :  { %v4139_v15 = vpop.eup %4138 }
 0x330   :  { %4142 = vrsqrt.f32 %v2434_v29  ;;  %v2513_v13 = vmul.f32 %v4139_v15, %v5834_v5  ;;  %v5866_v15 = vld [vmem:[%s6755_s2 + $0xa8] sm:$0xff] }
 0x331   :  { %v2333_v41 = vpop.xlane.xlu1 %2332  ;;  %2609 = vrot.lane.b32.xlu0 %v2539_v33, %s4210_s26 }
 0x332   :  { %v2408_v24 = vmul.f32 0.0012755102, %v2333_v41  ;;  %2772 = vperm.xlu1 %3922, %v2513_v13   ;;  %v2540_v47 = vmul.f32 %v2513_v13, %v5461_v7 }
 0x334   :  { %v2435_v2 = vadd.f32 1e-05, %v2408_v24 }
 0x335   :  { %v4141_v50 = vpop.eup %4140 }
 0x336   :  { %4144 = vrsqrt.f32 %v2435_v2  ;;  %v2342_v12 = vpop.xlane.xlu0 %2341  ;;  %v2514_v17 = vmul.f32 %v4141_v50, %v5842_v9  ;;  %2611 = vrot.lane.b32.xlu1 %v2540_v47, %s4210_s26  ;;  %v5874_v50 = vld [vmem:[%s6755_s2 + $0xb0] sm:$0xff] }
 0x337   :  { %v2409_v34 = vmul.f32 0.0012755102, %v2342_v12 }
 0x338   :  { %2777 = vperm.xlu0 %3923, %v2514_v17   ;;  %v2541_v45 = vmul.f32 %v2514_v17, %v5496_v22 }
 0x339   :  { %v2436_v0 = vadd.f32 1e-05, %v2409_v34 }
 0x33a   :  { %v4143_v6 = vpop.eup %4142 }
 0x33b   :  { %4146 = vrsqrt.f32 %v2436_v0  ;;  %v2515_v7 = vmul.f32 %v4143_v6, %v5850_v44 }
 0x33c   :  { %v2351_v14 = vpop.xlane.xlu1 %2350  ;;  %2613 = vrot.lane.b32.xlu0 %v2541_v45, %s4210_s26  ;;  %v5882_v45 = vld [vmem:[%s6755_s2 + $0xb8] sm:$0xff] }
 0x33d   :  { %v2410_v30 = vmul.f32 0.0012755102, %v2351_v14  ;;  %2782 = vperm.xlu1 %3922, %v2515_v7   ;;  %v2542_v54 = vmul.f32 %v2515_v7, %v5514_v40 }
 0x33f   :  { %v2437_v38 = vadd.f32 1e-05, %v2410_v30 }
 0x340   :  { %v4145_v60 = vpop.eup %4144 }
 0x341   :  { %4148 = vrsqrt.f32 %v2437_v38  ;;  %v2360_v48 = vpop.xlane.xlu0 %2359  ;;  %v2516_v22 = vmul.f32 %v4145_v60, %v5858_v39  ;;  %2615 = vrot.lane.b32.xlu1 %v2542_v54, %s4210_s26  ;;  %v5890_v54 = vld [vmem:[%s6755_s2 + $0xc0] sm:$0xff] }
 0x342   :  { %v2411_v29 = vmul.f32 0.0012755102, %v2360_v48 }
 0x343   :  { %2787 = vperm.xlu0 %3923, %v2516_v22   ;;  %v2543_v41 = vmul.f32 %v2516_v22, %v5527_v43 }
 0x344   :  { %v2438_v33 = vadd.f32 1e-05, %v2411_v29 }
 0x345   :  { %v4147_v13 = vpop.eup %4146 }
 0x346   :  { %4150 = vrsqrt.f32 %v2438_v33  ;;  %v2369_v40 = vpop.xlane.xlu1 %2368  ;;  %v2517_v24 = vmul.f32 %v4147_v13, %v5866_v15  ;;  %v7406_v13 = vld [vmem:[#allocation8_spill] sm:$0xff] }
 0x347   :  { %v2412_v2 = vmul.f32 0.0012755102, %v2369_v40  ;;  %2617 = vrot.lane.b32.xlu0 %v2543_v41, %s4210_s26  ;;  %v7407_v40 = vld [vmem:[#allocation9_spill] sm:$0xff] }
 0x348   :  { %2792 = vperm.xlu1 %3922, %v2517_v24   ;;  %v2544_v12 = vmul.f32 %v2517_v24, %v5529_v1 }
 0x349   :  { %v2439_v47 = vadd.f32 1e-05, %v2412_v2  ;;  %v7408_v2 = vld [vmem:[#allocation10_spill] sm:$0xff] }
 0x34b   :  { %v4149_v17 = vpop.eup %4148  ;;  %4152 = vrsqrt.f32 %v2439_v47  ;;  %v2378_v34 = vpop.xlane.xlu0 %2377 }
 0x34c   :  { %v2413_v43 = vmul.f32 0.0012755102, %v2378_v34  ;;  %v2518_v0 = vmul.f32 %v4149_v17, %v5874_v50  ;;  %2619 = vrot.lane.b32.xlu1 %v2544_v12, %s4210_s26  ;;  %v7409_v12 = vld [vmem:[#allocation12_spill] sm:$0xff] }
 0x34e   :  { %v2440_v6 = vadd.f32 1e-05, %v2413_v43  ;;  %2797 = vperm.xlu0 %3923, %v2518_v0   ;;  %v2545_v14 = vmul.f32 %v2518_v0, %v5564_v56  ;;  %v7411_v43 = vld [vmem:[#allocation114_spill] sm:$0xff] }
 0x34f   :  { %v2578_v33 = vpop.permute.xlu0 %2577 }
 0x350   :  { %v4151_v7 = vpop.eup %4150  ;;  %4154 = vrsqrt.f32 %v2440_v6  ;;  %v5916_v6 = vld [vmem:[%s6755_s2 + $0xc8] sm:$0xff] }
 0x351   :  { %v2387_v1 = vpop.xlane.xlu1 %2386  ;;  %v2519_v30 = vmul.f32 %v4151_v7, %v5882_v45  ;;  %v7412_v7 = vld [vmem:[#allocation115_spill] sm:$0xff] }
 0x352   :  { %v2414_v38 = vmul.f32 0.0012755102, %v2387_v1  ;;  %2621 = vrot.lane.b32.xlu0 %v2545_v14, %s4210_s26 }
 0x353   :  { %2802 = vperm.xlu1 %3922, %v2519_v30   ;;  %v2546_v22 = vmul.f32 %v2519_v30, %v5582_v19  ;;  %v7410_v19 = vld [vmem:[#allocation113_spill] sm:$0xff] }
 0x354   :  { %v2441_v60 = vadd.f32 1e-05, %v2414_v38 }
 0x355   :  { %v4153_v48 = vpop.eup %4152  ;;  %v2688_v29 = vpop.permute.xlu1 %2687 }
 0x356   :  { %4156 = vrsqrt.f32 %v2441_v60  ;;  %v2520_v56 = vmul.f32 %v4153_v48, %v5890_v54  ;;  %v5895_v41 = vmul.f32 %v2688_v29, %v7406_v13  ;;  %v5898_v24 = vmul.f32 %v2688_v29, %v7407_v40  ;;  %v7414_v40 = vld [vmem:[#allocation13_spill] sm:$0xff] }
 0x357   :  { %2623 = vrot.lane.b32.xlu1 %v2546_v22, %s4210_s26  ;;  %v5902_v47 = vmul.f32 %v2688_v29, %v7408_v2  ;;  %v5905_v17 = vmul.f32 %v2688_v29, %v7409_v12  ;;  %v5908_v34 = vmul.f32 %v2688_v29, %v7410_v19  ;;  %v5911_v0 = vmul.f32 %v2688_v29, %v7411_v43  ;;  %v7413_v22 = vld [vmem:[#allocation11_spill] sm:$0xff]  ;;  %v7415_v12 = vld [vmem:[#allocation14_spill] sm:$0xff] }
 0x358   :  { %2807 = vperm.xlu0 %3923, %v2520_v56   ;;  %v5919_v14 = vmul.f32 %v2688_v29, %v7412_v7  ;;  %v2547_v30 = vmul.f32 %v2520_v56, %v5595_v8  ;;  %v7417_v29 = vld [vmem:[#allocation15_spill] sm:$0xff]  ;;  %v7419_v7 = vld [vmem:[#allocation116_spill] sm:$0xff]  ;;  %v7421_v56 = vld [vmem:[#allocation117_spill] sm:$0xff] }
 0x359   :  { %v2580_v48 = vpop.permute.xlu1 %2579 }
 0x35a   :  { %v4155_v1 = vpop.eup %4154 }
 0x35b   :  { %v2693_v38 = vpop.permute.xlu0 %2692  ;;  %v2521_v60 = vmul.f32 %v4155_v1, %v5916_v6 }
 0x35c   :  { %v5924_v13 = vmul.f32 %v2693_v38, %v7413_v22  ;;  %v5927_v2 = vmul.f32 %v2693_v38, %v7414_v40  ;;  %v5930_v19 = vmul.f32 %v2693_v38, %v7415_v12  ;;  %2625 = vrot.lane.b32.xlu0 %v2547_v30, %s4210_s26  ;;  %v5934_v43 = vmul.f32 %v2693_v38, %v7417_v29  ;;  %v5949_v12 = vld [vmem:[%s6755_s2 + $0xd0] sm:$0xff]  ;;  %s4212_s2 = smov [#allocation5]  }
 0x35d   :  { %v5937_v8 = vmul.f32 %v2693_v38, %v7419_v7  ;;  %v5940_v1 = vmul.f32 %v2693_v38, %v7421_v56  ;;  %v5943_v22 = vmul.f32 %v2693_v38, %v7423_v37  ;;  %v2548_v40 = vmul.f32 %v2521_v60, %v5597_v18 }
 0x35e   :  { %7416 = vst [vmem:[#allocation91_spill] sm:$0xff] %v5930_v19  ;;  %7418 = vst [vmem:[#allocation100_spill] sm:$0xff] %v5934_v43  ;;  %v7430_v43 = vld [vmem:[#allocation18_spill] sm:$0xff] }
 0x35f   :  { %7420 = vst [vmem:[#allocation108_spill] sm:$0xff] %v5937_v8  ;;  %7422 = vst [vmem:[#allocation111_spill] sm:$0xff] %v5940_v1  ;;  %2627 = vrot.lane.b32.xlu1 %v2548_v40, %s4210_s26  ;;  %v7426_v40 = vld [vmem:[#allocation119_spill] sm:$0xff]  ;;  %v7428_v8 = vld [vmem:[#allocation17_spill] sm:$0xff] }
 0x360   :  { %7424 = vst [vmem:[#allocation193_spill] sm:$0xff] %v5943_v22  ;;  %v2698_v30 = vpop.permute.xlu1 %2697  ;;  %v4157_v29 = vpop.eup %4156  ;;  %v7427_v22 = vld [vmem:[#allocation121_spill] sm:$0xff] }
 0x361   :  { %v5953_v7 = vmul.f32 %v2698_v30, %v7425_v58  ;;  %v5956_v56 = vmul.f32 %v2698_v30, %v4593_v23  ;;  %v5959_v37 = vmul.f32 %v2698_v30, %v4597_v25  ;;  %v5962_v18 = vmul.f32 %v2698_v30, %v4601_v27 }
 0x362   :  { %v2522_v38 = vmul.f32 %v4157_v29, %v5949_v12  ;;  %v5966_v57 = vmul.f32 %v2698_v30, %v4963_v21  ;;  %v5969_v49 = vmul.f32 %v2698_v30, %v7426_v40  ;;  %v5972_v58 = vmul.f32 %v2698_v30, %v7427_v22  ;;  %v7432_v30 = vld [vmem:[#allocation19_spill] sm:$0xff] }
 0x363   :  { %2812 = vperm.xlu1 %3922, %v2521_v60   ;;  %v2658_v25 = vsub.f32 %v5700_v28, %v2578_v33  ;;  %v4211_v27 = vmov 1   ;;  %v7434_v60 = vld [vmem:[#allocation20_spill] sm:$0xff]  ;;  %v2659_v28 = vsub.f32 %v5707_v3, %v2580_v48  ;;  %v7445_v3 = vld [vmem:[#allocation25_spill] sm:$0xff] }
 0x364   :  { %v2549_v23 = vmul.f32 %v2522_v38, %v5638_v32  ;;  %v2582_v1 = vpop.permute.xlu1 %2581 }
 0x365   :  { %v2660_v29 = vsub.f32 %v5715_v20, %v2582_v1  ;;  %v7438_v1 = vld [vmem:[#allocation122_spill] sm:$0xff] }
 0x366   :  { %2629 = vrot.lane.b32.xlu0 %v2549_v23, %s4210_s26  ;;  %v7436_v23 = vld [vmem:[#allocation120_spill] sm:$0xff]  ;;  %s3716_s26 = sshll.u32 %s4212_s2, 4  ;;  %s3717_s26 = int_to_ptr.vmem [resolvable:$true] %s3716_s26 }
 0x367   :  { %3924 = vset.pattern.permute.xlu1 %v4211_v27  ;;  %s4180_s22 = scalar_lea.vmem %s3717_s26, 24192  ;;  %p4185_p9 = scmp.lt.s32.totalorder %s3717_s26, %s3717_s26 }
 0x368   :  { %v2703_v21 = vpop.permute.xlu1 %2702  ;;  %3011 = vperm.xlu1 %3924, %v2658_v25   ;;  %p4181_p8 = scmp.ne.s32.totalorder %s3717_s26, %s4180_s22  ;;  %p4186_p10 = scmp.lt.s32.totalorder %s4180_s22, %s4180_s22 }
 0x369   :  { %v5979_v40 = vmul.f32 %v2703_v21, %v7428_v8  ;;  %v5982_v22 = vmul.f32 %v2703_v21, %v7430_v43  ;;  %v5985_v32 = vmul.f32 %v2703_v21, %v7432_v30  ;;  %v5988_v19 = vmul.f32 %v2703_v21, %v7434_v60  ;;  %v2708_v33 = vpop.permute.xlu0 %2707  ;;  %v7440_v8 = vld [vmem:[#allocation123_spill] sm:$0xff]  ;;  %v7442_v43 = vld [vmem:[#allocation21_spill] sm:$0xff]  ;;  %v7443_v30 = vld [vmem:[#allocation22_spill] sm:$0xff] }
 0x36a   :  { %2817 = vperm.xlu0 %3923, %v2522_v38   ;;  %v5992_v20 = vmul.f32 %v2703_v21, %v7436_v23  ;;  %v5995_v25 = vmul.f32 %v2703_v21, %v7438_v1  ;;  %v7444_v60 = vld [vmem:[#allocation23_spill] sm:$0xff]  ;;  %v6010_v48 = vmul.f32 %v2708_v33, %v7445_v3  ;;  %v7446_v23 = vld [vmem:[#allocation124_spill] sm:$0xff]  ;;  %v7448_v1 = vld [vmem:[#allocation125_spill] sm:$0xff]  ;;  %p4187_p11 = por %p4186_p10, %p4185_p9 }
 0x36b   :  { %7429 = vst [vmem:[#allocation8_spill] sm:$0xff] %v5979_v40  ;;  %7431 = vst [vmem:[#allocation9_spill] sm:$0xff] %v5982_v22  ;;  %v5998_v40 = vmul.f32 %v2703_v21, %v7440_v8  ;;  %v6001_v22 = vmul.f32 %v2708_v33, %v7442_v43  ;;  %v6007_v38 = vmul.f32 %v2708_v33, %v7444_v60  ;;  %v7450_v21 = vld [vmem:[#allocation127_spill] sm:$0xff] }
 0x36c   :  { %7433 = vst [vmem:[#allocation10_spill] sm:$0xff] %v5985_v32  ;;  %7435 = vst [vmem:[#allocation12_spill] sm:$0xff] %v5988_v19  ;;  %v6004_v32 = vmul.f32 %v2708_v33, %v7443_v30  ;;  %v6019_v8 = vmul.f32 %v2708_v33, %v7450_v21  ;;  %v2584_v43 = vpop.permute.xlu1 %2583  ;;  %3021 = vperm.xlu1 %3924, %v2660_v29   ;;  %v7451_v19 = vld [vmem:[#allocation24_spill] sm:$0xff]  ;;  %p4188_p12 = pnand %p4187_p11, %p4181_p8 }
 0x36d   :  { %7437 = vst [vmem:[#allocation113_spill] sm:$0xff] %v5992_v20  ;;  %7439 = vst [vmem:[#allocation114_spill] sm:$0xff] %v5995_v25  ;;  %v6013_v20 = vmul.f32 %v2708_v33, %v7446_v23  ;;  %v6016_v25 = vmul.f32 %v2708_v33, %v7448_v1  ;;  %v2661_v30 = vsub.f32 %v5723_v26, %v2584_v43  ;;  %v7456_v21 = vld [vmem:[#allocation28_spill] sm:$0xff]  ;;  %v7458_v26 = vld [vmem:[#allocation126_spill] sm:$0xff] }
 0x36e   :  { %7441 = vst [vmem:[#allocation115_spill] sm:$0xff] %v5998_v40  ;;  %3925 = vset.pattern.permute.xlu0 %v4211_v27  ;;  %v2586_v40 = vpop.permute.xlu0 %2585 }
 0x36f   :  { %7447 = vst [vmem:[#allocation11_spill] sm:$0xff] %v6013_v20  ;;  %7449 = vst [vmem:[#allocation13_spill] sm:$0xff] %v6016_v25  ;;  %3016 = vperm.xlu0 %3925, %v2659_v28   ;;  %v2662_v60 = vsub.f32 %v5729_v4, %v2586_v40  ;;  %v7452_v20 = vld [vmem:[#allocation26_spill] sm:$0xff]  ;;  %v7454_v25 = vld [vmem:[#allocation27_spill] sm:$0xff] }
 0x370   :  { %v2713_v3 = vpop.permute.xlu1 %2712  ;;  %3026 = vperm.xlu1 %3924, %v2661_v30   ;;  %v7460_v28 = vld [vmem:[#allocation128_spill] sm:$0xff]  ;;  %v7462_v4 = vld [vmem:[#allocation129_spill] sm:$0xff] }
 0x371   :  { %v6024_v23 = vmul.f32 %v2713_v3, %v7451_v19  ;;  %v6027_v1 = vmul.f32 %v2713_v3, %v7452_v20  ;;  %v6030_v33 = vmul.f32 %v2713_v3, %v7454_v25  ;;  %v6033_v29 = vmul.f32 %v2713_v3, %v7456_v21 }
 0x372   :  { %v6036_v27 = vmul.f32 %v2713_v3, %v7458_v26  ;;  %v6039_v43 = vmul.f32 %v2713_v3, %v7460_v28  ;;  %v6042_v40 = vmul.f32 %v2713_v3, %v7462_v4 }
 0x373   :  { %7453 = vst [vmem:[#allocation14_spill] sm:$0xff] %v6027_v1  ;;  %7455 = vst [vmem:[#allocation15_spill] sm:$0xff] %v6030_v33  ;;  %3031 = vperm.xlu0 %3925, %v2662_v60   ;;  %v7464_v1 = vld [vmem:[#allocation29_spill] sm:$0xff]  ;;  %v7465_v33 = vld [vmem:[#allocation30_spill] sm:$0xff] }
 0x374   :  { %7457 = vst [vmem:[#allocation116_spill] sm:$0xff] %v6033_v29  ;;  %7459 = vst [vmem:[#allocation117_spill] sm:$0xff] %v6036_v27  ;;  %v2588_v19 = vpop.permute.xlu1 %2587  ;;  %v2718_v30 = vpop.permute.xlu0 %2717  ;;  %v7466_v29 = vld [vmem:[#allocation31_spill] sm:$0xff]  ;;  %v7468_v27 = vld [vmem:[#allocation33_spill] sm:$0xff] }
 0x375   :  { %7461 = vst [vmem:[#allocation118_spill] sm:$0xff] %v6039_v43  ;;  %7463 = vst [vmem:[#allocation16_spill] sm:$0xff] %v6042_v40  ;;  %v2663_v20 = vsub.f32 %v5737_v35, %v2588_v19  ;;  %v6046_v25 = vmul.f32 %v2718_v30, %v7464_v1  ;;  %v6049_v21 = vmul.f32 %v2718_v30, %v7465_v33  ;;  %v7470_v43 = vld [vmem:[#allocation130_spill] sm:$0xff]  ;;  %v7472_v60 = vld [vmem:[#allocation131_spill] sm:$0xff] }
 0x376   :  { %v6052_v26 = vmul.f32 %v2718_v30, %v7466_v29  ;;  %v6055_v28 = vmul.f32 %v2718_v30, %v7468_v27  ;;  %v6058_v3 = vmul.f32 %v2718_v30, %v7470_v43  ;;  %v6061_v4 = vmul.f32 %v2718_v30, %v7472_v60  ;;  %v7474_v40 = vld [vmem:[#allocation133_spill] sm:$0xff]  ;;  %v7476_v29 = vld [vmem:[#allocation32_spill] sm:$0xff]  ;;  %v7478_v27 = vld [vmem:[#allocation34_spill] sm:$0xff] }
 0x377   :  { %v6064_v35 = vmul.f32 %v2718_v30, %v7474_v40  ;;  %3036 = vperm.xlu1 %3924, %v2663_v20   ;;  %v7480_v43 = vld [vmem:[#allocation35_spill] sm:$0xff]  ;;  %v7482_v60 = vld [vmem:[#allocation36_spill] sm:$0xff]  ;;  %v7486_v20 = vld [vmem:[#allocation134_spill] sm:$0xff] }
 0x378   :  { %7467 = vst [vmem:[#allocation119_spill] sm:$0xff] %v6052_v26  ;;  %7469 = vst [vmem:[#allocation121_spill] sm:$0xff] %v6055_v28  ;;  %v2590_v1 = vpop.permute.xlu0 %2589  ;;  %v7484_v40 = vld [vmem:[#allocation132_spill] sm:$0xff] }
 0x379   :  { %7471 = vst [vmem:[#allocation17_spill] sm:$0xff] %v6058_v3  ;;  %7473 = vst [vmem:[#allocation18_spill] sm:$0xff] %v6061_v4  ;;  %v2664_v33 = vsub.f32 %v5746_v16, %v2590_v1  ;;  %v7487_v16 = vld [vmem:[#allocation135_spill] sm:$0xff] }
 0x37a   :  { %7475 = vst [vmem:[#allocation19_spill] sm:$0xff] %v6064_v35  ;;  %v2723_v19 = vpop.permute.xlu1 %2722 }
 0x37b   :  { %3041 = vperm.xlu0 %3925, %v2664_v33   ;;  %v6068_v26 = vmul.f32 %v2723_v19, %v7476_v29  ;;  %v6071_v28 = vmul.f32 %v2723_v19, %v7478_v27  ;;  %v6074_v3 = vmul.f32 %v2723_v19, %v7480_v43  ;;  %v6077_v4 = vmul.f32 %v2723_v19, %v7482_v60  ;;  %v7491_v43 = vld [vmem:[#allocation38_spill] sm:$0xff]  ;;  %v7493_v60 = vld [vmem:[#allocation39_spill] sm:$0xff] }
 0x37c   :  { %v6080_v30 = vmul.f32 %v2723_v19, %v7484_v40  ;;  %v6083_v35 = vmul.f32 %v2723_v19, %v7486_v20  ;;  %v6086_v1 = vmul.f32 %v2723_v19, %v7487_v16  ;;  %v7495_v40 = vld [vmem:[#allocation41_spill] sm:$0xff]  ;;  %v7497_v20 = vld [vmem:[#allocation136_spill] sm:$0xff] }
 0x37d   :  { %7477 = vst [vmem:[#allocation20_spill] sm:$0xff] %v6068_v26  ;;  %7479 = vst [vmem:[#allocation120_spill] sm:$0xff] %v6071_v28  ;;  %v7489_v28 = vld [vmem:[#allocation37_spill] sm:$0xff] }
 0x37e   :  { %7481 = vst [vmem:[#allocation122_spill] sm:$0xff] %v6074_v3  ;;  %7483 = vst [vmem:[#allocation123_spill] sm:$0xff] %v6077_v4  ;;  %v2592_v33 = vpop.permute.xlu1 %2591  ;;  %v7499_v16 = vld [vmem:[#allocation137_spill] sm:$0xff] }
 0x37f   :  { %7485 = vst [vmem:[#allocation21_spill] sm:$0xff] %v6080_v30  ;;  %7488 = vst [vmem:[#allocation22_spill] sm:$0xff] %v6086_v1  ;;  %v2665_v29 = vsub.f32 %v5754_v53, %v2592_v33  ;;  %v7500_v53 = vld [vmem:[#allocation139_spill] sm:$0xff] }
 0x380   :  { %v2728_v27 = vpop.permute.xlu0 %2727 }
 0x381   :  { %v6090_v26 = vmul.f32 %v2728_v27, %v7489_v28  ;;  %v6093_v3 = vmul.f32 %v2728_v27, %v7491_v43  ;;  %v6096_v4 = vmul.f32 %v2728_v27, %v7493_v60  ;;  %v6099_v30 = vmul.f32 %v2728_v27, %v7495_v40  ;;  %3046 = vperm.xlu1 %3924, %v2665_v29   ;;  %v7506_v29 = vld [vmem:[#allocation43_spill] sm:$0xff] }
 0x382   :  { %v6102_v19 = vmul.f32 %v2728_v27, %v7497_v20  ;;  %v6105_v1 = vmul.f32 %v2728_v27, %v7499_v16  ;;  %v6108_v33 = vmul.f32 %v2728_v27, %v7500_v53  ;;  %v7508_v20 = vld [vmem:[#allocation44_spill] sm:$0xff]  ;;  %v7510_v16 = vld [vmem:[#allocation138_spill] sm:$0xff] }
 0x383   :  { %7490 = vst [vmem:[#allocation23_spill] sm:$0xff] %v6090_v26  ;;  %7492 = vst [vmem:[#allocation25_spill] sm:$0xff] %v6093_v3  ;;  %v7502_v26 = vld [vmem:[#allocation40_spill] sm:$0xff] }
 0x384   :  { %7494 = vst [vmem:[#allocation124_spill] sm:$0xff] %v6096_v4  ;;  %7496 = vst [vmem:[#allocation125_spill] sm:$0xff] %v6099_v30  ;;  %v2594_v28 = vpop.permute.xlu0 %2593  ;;  %v7504_v4 = vld [vmem:[#allocation42_spill] sm:$0xff]  ;;  %v7512_v53 = vld [vmem:[#allocation140_spill] sm:$0xff] }
 0x385   :  { %7498 = vst [vmem:[#allocation127_spill] sm:$0xff] %v6102_v19  ;;  %7501 = vst [vmem:[#allocation24_spill] sm:$0xff] %v6108_v33  ;;  %v2666_v43 = vsub.f32 %v5762_v62, %v2594_v28  ;;  %v2733_v3 = vpop.permute.xlu1 %2732  ;;  %v7513_v62 = vld [vmem:[#allocation141_spill] sm:$0xff] }
 0x386   :  { %v6112_v60 = vmul.f32 %v2733_v3, %v7502_v26  ;;  %v6115_v40 = vmul.f32 %v2733_v3, %v7504_v4  ;;  %v6118_v30 = vmul.f32 %v2733_v3, %v7506_v29  ;;  %v6121_v19 = vmul.f32 %v2733_v3, %v7508_v20 }
 0x387   :  { %3051 = vperm.xlu0 %3925, %v2666_v43   ;;  %v6124_v27 = vmul.f32 %v2733_v3, %v7510_v16  ;;  %v6127_v33 = vmul.f32 %v2733_v3, %v7512_v53  ;;  %v6130_v28 = vmul.f32 %v2733_v3, %v7513_v62  ;;  %v7519_v43 = vld [vmem:[#allocation47_spill] sm:$0xff]  ;;  %v7521_v16 = vld [vmem:[#allocation49_spill] sm:$0xff]  ;;  %v7523_v53 = vld [vmem:[#allocation142_spill] sm:$0xff] }
 0x388   :  { %7503 = vst [vmem:[#allocation26_spill] sm:$0xff] %v6112_v60  ;;  %7505 = vst [vmem:[#allocation27_spill] sm:$0xff] %v6115_v40  ;;  %v7515_v60 = vld [vmem:[#allocation45_spill] sm:$0xff]  ;;  %v7525_v62 = vld [vmem:[#allocation143_spill] sm:$0xff] }
 0x389   :  { %7507 = vst [vmem:[#allocation28_spill] sm:$0xff] %v6118_v30  ;;  %7509 = vst [vmem:[#allocation126_spill] sm:$0xff] %v6121_v19  ;;  %v2596_v26 = vpop.permute.xlu1 %2595  ;;  %v7517_v30 = vld [vmem:[#allocation46_spill] sm:$0xff] }
 0x38a   :  { %7511 = vst [vmem:[#allocation128_spill] sm:$0xff] %v6124_v27  ;;  %7514 = vst [vmem:[#allocation129_spill] sm:$0xff] %v6130_v28  ;;  %v2667_v4 = vsub.f32 %v5770_v36, %v2596_v26  ;;  %v7526_v36 = vld [vmem:[#allocation145_spill] sm:$0xff] }
 0x38b   :  { %v2738_v40 = vpop.permute.xlu0 %2737 }
 0x38c   :  { %v6134_v29 = vmul.f32 %v2738_v40, %v7515_v60  ;;  %v6137_v20 = vmul.f32 %v2738_v40, %v7517_v30  ;;  %v6140_v19 = vmul.f32 %v2738_v40, %v7519_v43  ;;  %v6143_v27 = vmul.f32 %v2738_v40, %v7521_v16  ;;  %3056 = vperm.xlu1 %3924, %v2667_v4   ;;  %v7532_v4 = vld [vmem:[#allocation51_spill] sm:$0xff] }
 0x38d   :  { %v6146_v3 = vmul.f32 %v2738_v40, %v7523_v53  ;;  %v6149_v28 = vmul.f32 %v2738_v40, %v7525_v62  ;;  %v6152_v26 = vmul.f32 %v2738_v40, %v7526_v36  ;;  %v7534_v53 = vld [vmem:[#allocation52_spill] sm:$0xff]  ;;  %v7538_v36 = vld [vmem:[#allocation146_spill] sm:$0xff] }
 0x38e   :  { %7516 = vst [vmem:[#allocation29_spill] sm:$0xff] %v6134_v29  ;;  %7518 = vst [vmem:[#allocation30_spill] sm:$0xff] %v6137_v20  ;;  %v7528_v29 = vld [vmem:[#allocation48_spill] sm:$0xff] }
 0x38f   :  { %7520 = vst [vmem:[#allocation31_spill] sm:$0xff] %v6140_v19  ;;  %7522 = vst [vmem:[#allocation33_spill] sm:$0xff] %v6143_v27  ;;  %v2598_v60 = vpop.permute.xlu0 %2597  ;;  %v7530_v19 = vld [vmem:[#allocation50_spill] sm:$0xff]  ;;  %v7536_v62 = vld [vmem:[#allocation144_spill] sm:$0xff] }
 0x390   :  { %7524 = vst [vmem:[#allocation130_spill] sm:$0xff] %v6146_v3  ;;  %7527 = vst [vmem:[#allocation131_spill] sm:$0xff] %v6152_v26  ;;  %v2668_v30 = vsub.f32 %v5778_v51, %v2598_v60  ;;  %v2743_v20 = vpop.permute.xlu1 %2742  ;;  %v7539_v51 = vld [vmem:[#allocation147_spill] sm:$0xff] }
 0x391   :  { %v6156_v43 = vmul.f32 %v2743_v20, %v7528_v29  ;;  %v6159_v16 = vmul.f32 %v2743_v20, %v7530_v19  ;;  %v6162_v27 = vmul.f32 %v2743_v20, %v7532_v4  ;;  %v6165_v3 = vmul.f32 %v2743_v20, %v7534_v53 }
 0x392   :  { %3061 = vperm.xlu0 %3925, %v2668_v30   ;;  %v6168_v40 = vmul.f32 %v2743_v20, %v7536_v62  ;;  %v6171_v26 = vmul.f32 %v2743_v20, %v7538_v36  ;;  %v6174_v60 = vmul.f32 %v2743_v20, %v7539_v51  ;;  %v7545_v30 = vld [vmem:[#allocation55_spill] sm:$0xff]  ;;  %v7547_v62 = vld [vmem:[#allocation57_spill] sm:$0xff]  ;;  %v7549_v36 = vld [vmem:[#allocation148_spill] sm:$0xff] }
 0x393   :  { %7529 = vst [vmem:[#allocation133_spill] sm:$0xff] %v6156_v43  ;;  %7531 = vst [vmem:[#allocation32_spill] sm:$0xff] %v6159_v16  ;;  %v7541_v43 = vld [vmem:[#allocation53_spill] sm:$0xff] }
 0x394   :  { %7533 = vst [vmem:[#allocation34_spill] sm:$0xff] %v6162_v27  ;;  %7535 = vst [vmem:[#allocation35_spill] sm:$0xff] %v6165_v3  ;;  %v2600_v29 = vpop.permute.xlu1 %2599  ;;  %v7543_v27 = vld [vmem:[#allocation54_spill] sm:$0xff]  ;;  %v7551_v51 = vld [vmem:[#allocation149_spill] sm:$0xff] }
 0x395   :  { %7537 = vst [vmem:[#allocation36_spill] sm:$0xff] %v6168_v40  ;;  %7540 = vst [vmem:[#allocation132_spill] sm:$0xff] %v6174_v60  ;;  %v2669_v19 = vsub.f32 %v5786_v63, %v2600_v29  ;;  %v7552_v63 = vld [vmem:[#allocation151_spill] sm:$0xff] }
 0x396   :  { %v2748_v16 = vpop.permute.xlu0 %2747 }
 0x397   :  { %v6178_v4 = vmul.f32 %v2748_v16, %v7541_v43  ;;  %v6181_v53 = vmul.f32 %v2748_v16, %v7543_v27  ;;  %v6184_v3 = vmul.f32 %v2748_v16, %v7545_v30  ;;  %v6187_v40 = vmul.f32 %v2748_v16, %v7547_v62  ;;  %3066 = vperm.xlu1 %3924, %v2669_v19   ;;  %v7558_v19 = vld [vmem:[#allocation59_spill] sm:$0xff] }
 0x398   :  { %v6190_v20 = vmul.f32 %v2748_v16, %v7549_v36  ;;  %v6193_v60 = vmul.f32 %v2748_v16, %v7551_v51  ;;  %v6196_v29 = vmul.f32 %v2748_v16, %v7552_v63  ;;  %v7560_v36 = vld [vmem:[#allocation60_spill] sm:$0xff]  ;;  %v7562_v51 = vld [vmem:[#allocation150_spill] sm:$0xff] }
 0x399   :  { %7542 = vst [vmem:[#allocation134_spill] sm:$0xff] %v6178_v4  ;;  %7544 = vst [vmem:[#allocation135_spill] sm:$0xff] %v6181_v53  ;;  %v7554_v4 = vld [vmem:[#allocation56_spill] sm:$0xff] }
 0x39a   :  { %7546 = vst [vmem:[#allocation37_spill] sm:$0xff] %v6184_v3  ;;  %7548 = vst [vmem:[#allocation38_spill] sm:$0xff] %v6187_v40  ;;  %v2602_v43 = vpop.permute.xlu0 %2601  ;;  %v7556_v3 = vld [vmem:[#allocation58_spill] sm:$0xff]  ;;  %v7564_v63 = vld [vmem:[#allocation152_spill] sm:$0xff] }
 0x39b   :  { %7550 = vst [vmem:[#allocation39_spill] sm:$0xff] %v6190_v20  ;;  %7553 = vst [vmem:[#allocation41_spill] sm:$0xff] %v6196_v29  ;;  %v2670_v27 = vsub.f32 %v5794_v52, %v2602_v43  ;;  %v2753_v53 = vpop.permute.xlu1 %2752  ;;  %v7565_v52 = vld [vmem:[#allocation153_spill] sm:$0xff] }
 0x39c   :  { %v6200_v30 = vmul.f32 %v2753_v53, %v7554_v4  ;;  %v6203_v62 = vmul.f32 %v2753_v53, %v7556_v3  ;;  %v6206_v40 = vmul.f32 %v2753_v53, %v7558_v19  ;;  %v6209_v20 = vmul.f32 %v2753_v53, %v7560_v36 }
 0x39d   :  { %3071 = vperm.xlu0 %3925, %v2670_v27   ;;  %v6212_v16 = vmul.f32 %v2753_v53, %v7562_v51  ;;  %v6215_v29 = vmul.f32 %v2753_v53, %v7564_v63  ;;  %v6218_v43 = vmul.f32 %v2753_v53, %v7565_v52  ;;  %v7571_v27 = vld [vmem:[#allocation63_spill] sm:$0xff]  ;;  %v7573_v51 = vld [vmem:[#allocation65_spill] sm:$0xff]  ;;  %v7575_v63 = vld [vmem:[#allocation154_spill] sm:$0xff] }
 0x39e   :  { %7555 = vst [vmem:[#allocation136_spill] sm:$0xff] %v6200_v30  ;;  %7557 = vst [vmem:[#allocation137_spill] sm:$0xff] %v6203_v62  ;;  %v7567_v30 = vld [vmem:[#allocation61_spill] sm:$0xff]  ;;  %v7577_v52 = vld [vmem:[#allocation155_spill] sm:$0xff] }
 0x39f   :  { %7559 = vst [vmem:[#allocation139_spill] sm:$0xff] %v6206_v40  ;;  %7561 = vst [vmem:[#allocation40_spill] sm:$0xff] %v6209_v20  ;;  %v2604_v4 = vpop.permute.xlu1 %2603  ;;  %v7569_v40 = vld [vmem:[#allocation62_spill] sm:$0xff] }
 0x3a0   :  { %7563 = vst [vmem:[#allocation42_spill] sm:$0xff] %v6212_v16  ;;  %7566 = vst [vmem:[#allocation43_spill] sm:$0xff] %v6218_v43  ;;  %v2671_v3 = vsub.f32 %v5802_v11, %v2604_v4  ;;  %v7578_v11 = vld [vmem:[#allocation157_spill] sm:$0xff] }
 0x3a1   :  { %v2758_v62 = vpop.permute.xlu0 %2757 }
 0x3a2   :  { %v6222_v19 = vmul.f32 %v2758_v62, %v7567_v30  ;;  %v6225_v36 = vmul.f32 %v2758_v62, %v7569_v40  ;;  %v6228_v20 = vmul.f32 %v2758_v62, %v7571_v27  ;;  %v6231_v16 = vmul.f32 %v2758_v62, %v7573_v51  ;;  %3076 = vperm.xlu1 %3924, %v2671_v3   ;;  %v7584_v3 = vld [vmem:[#allocation67_spill] sm:$0xff] }
 0x3a3   :  { %v6234_v53 = vmul.f32 %v2758_v62, %v7575_v63  ;;  %v6237_v43 = vmul.f32 %v2758_v62, %v7577_v52  ;;  %v6240_v4 = vmul.f32 %v2758_v62, %v7578_v11  ;;  %v7586_v63 = vld [vmem:[#allocation68_spill] sm:$0xff]  ;;  %v7590_v11 = vld [vmem:[#allocation158_spill] sm:$0xff] }
 0x3a4   :  { %7568 = vst [vmem:[#allocation44_spill] sm:$0xff] %v6222_v19  ;;  %7570 = vst [vmem:[#allocation138_spill] sm:$0xff] %v6225_v36  ;;  %v7580_v19 = vld [vmem:[#allocation64_spill] sm:$0xff] }
 0x3a5   :  { %7572 = vst [vmem:[#allocation140_spill] sm:$0xff] %v6228_v20  ;;  %7574 = vst [vmem:[#allocation141_spill] sm:$0xff] %v6231_v16  ;;  %v2606_v30 = vpop.permute.xlu0 %2605  ;;  %v7582_v20 = vld [vmem:[#allocation66_spill] sm:$0xff]  ;;  %v7588_v52 = vld [vmem:[#allocation156_spill] sm:$0xff] }
 0x3a6   :  { %7576 = vst [vmem:[#allocation45_spill] sm:$0xff] %v6234_v53  ;;  %7579 = vst [vmem:[#allocation46_spill] sm:$0xff] %v6240_v4  ;;  %v2672_v40 = vsub.f32 %v5810_v31, %v2606_v30  ;;  %v2763_v36 = vpop.permute.xlu1 %2762  ;;  %v7591_v31 = vld [vmem:[#allocation159_spill] sm:$0xff] }
 0x3a7   :  { %v6244_v27 = vmul.f32 %v2763_v36, %v7580_v19  ;;  %v6247_v51 = vmul.f32 %v2763_v36, %v7582_v20  ;;  %v6250_v16 = vmul.f32 %v2763_v36, %v7584_v3  ;;  %v6253_v53 = vmul.f32 %v2763_v36, %v7586_v63 }
 0x3a8   :  { %3081 = vperm.xlu0 %3925, %v2672_v40   ;;  %v6256_v62 = vmul.f32 %v2763_v36, %v7588_v52  ;;  %v6259_v4 = vmul.f32 %v2763_v36, %v7590_v11  ;;  %v6262_v30 = vmul.f32 %v2763_v36, %v7591_v31  ;;  %v7597_v40 = vld [vmem:[#allocation71_spill] sm:$0xff]  ;;  %v7599_v52 = vld [vmem:[#allocation73_spill] sm:$0xff]  ;;  %v7601_v11 = vld [vmem:[#allocation160_spill] sm:$0xff] }
 0x3a9   :  { %7581 = vst [vmem:[#allocation47_spill] sm:$0xff] %v6244_v27  ;;  %7583 = vst [vmem:[#allocation49_spill] sm:$0xff] %v6247_v51  ;;  %v7593_v27 = vld [vmem:[#allocation69_spill] sm:$0xff] }
 0x3aa   :  { %7585 = vst [vmem:[#allocation142_spill] sm:$0xff] %v6250_v16  ;;  %7587 = vst [vmem:[#allocation143_spill] sm:$0xff] %v6253_v53  ;;  %v2608_v19 = vpop.permute.xlu1 %2607  ;;  %v7595_v16 = vld [vmem:[#allocation70_spill] sm:$0xff]  ;;  %v7603_v31 = vld [vmem:[#allocation161_spill] sm:$0xff] }
 0x3ab   :  { %7589 = vst [vmem:[#allocation145_spill] sm:$0xff] %v6256_v62  ;;  %7592 = vst [vmem:[#allocation48_spill] sm:$0xff] %v6262_v30  ;;  %v2673_v20 = vsub.f32 %v5818_v59, %v2608_v19  ;;  %v7604_v59 = vld [vmem:[#allocation163_spill] sm:$0xff] }
 0x3ac   :  { %v2768_v51 = vpop.permute.xlu0 %2767 }
 0x3ad   :  { %v6266_v3 = vmul.f32 %v2768_v51, %v7593_v27  ;;  %v6269_v63 = vmul.f32 %v2768_v51, %v7595_v16  ;;  %v6272_v53 = vmul.f32 %v2768_v51, %v7597_v40  ;;  %v6275_v62 = vmul.f32 %v2768_v51, %v7599_v52  ;;  %3086 = vperm.xlu1 %3924, %v2673_v20   ;;  %v7610_v20 = vld [vmem:[#allocation75_spill] sm:$0xff] }
 0x3ae   :  { %v6278_v36 = vmul.f32 %v2768_v51, %v7601_v11  ;;  %v6281_v30 = vmul.f32 %v2768_v51, %v7603_v31  ;;  %v6284_v19 = vmul.f32 %v2768_v51, %v7604_v59  ;;  %v7612_v11 = vld [vmem:[#allocation76_spill] sm:$0xff]  ;;  %v7614_v31 = vld [vmem:[#allocation162_spill] sm:$0xff] }
 0x3af   :  { %7594 = vst [vmem:[#allocation50_spill] sm:$0xff] %v6266_v3  ;;  %7596 = vst [vmem:[#allocation51_spill] sm:$0xff] %v6269_v63  ;;  %v7606_v3 = vld [vmem:[#allocation72_spill] sm:$0xff] }
 0x3b0   :  { %7598 = vst [vmem:[#allocation52_spill] sm:$0xff] %v6272_v53  ;;  %7600 = vst [vmem:[#allocation144_spill] sm:$0xff] %v6275_v62  ;;  %v2610_v27 = vpop.permute.xlu0 %2609  ;;  %v7608_v53 = vld [vmem:[#allocation74_spill] sm:$0xff]  ;;  %v7616_v59 = vld [vmem:[#allocation164_spill] sm:$0xff] }
 0x3b1   :  { %7602 = vst [vmem:[#allocation146_spill] sm:$0xff] %v6278_v36  ;;  %7605 = vst [vmem:[#allocation147_spill] sm:$0xff] %v6284_v19  ;;  %v2674_v16 = vsub.f32 %v5826_v55, %v2610_v27  ;;  %v2773_v63 = vpop.permute.xlu1 %2772  ;;  %v7617_v55 = vld [vmem:[#allocation165_spill] sm:$0xff] }
 0x3b2   :  { %v6288_v40 = vmul.f32 %v2773_v63, %v7606_v3  ;;  %v6291_v52 = vmul.f32 %v2773_v63, %v7608_v53  ;;  %v6294_v62 = vmul.f32 %v2773_v63, %v7610_v20  ;;  %v6297_v36 = vmul.f32 %v2773_v63, %v7612_v11 }
 0x3b3   :  { %3091 = vperm.xlu0 %3925, %v2674_v16   ;;  %v6300_v51 = vmul.f32 %v2773_v63, %v7614_v31  ;;  %v6303_v19 = vmul.f32 %v2773_v63, %v7616_v59  ;;  %v6306_v27 = vmul.f32 %v2773_v63, %v7617_v55  ;;  %v7623_v16 = vld [vmem:[#allocation79_spill] sm:$0xff]  ;;  %v7625_v31 = vld [vmem:[#allocation81_spill] sm:$0xff]  ;;  %v7627_v59 = vld [vmem:[#allocation166_spill] sm:$0xff] }
 0x3b4   :  { %7607 = vst [vmem:[#allocation53_spill] sm:$0xff] %v6288_v40  ;;  %7609 = vst [vmem:[#allocation54_spill] sm:$0xff] %v6291_v52  ;;  %v7619_v40 = vld [vmem:[#allocation77_spill] sm:$0xff]  ;;  %v7629_v55 = vld [vmem:[#allocation167_spill] sm:$0xff] }
 0x3b5   :  { %7611 = vst [vmem:[#allocation55_spill] sm:$0xff] %v6294_v62  ;;  %7613 = vst [vmem:[#allocation57_spill] sm:$0xff] %v6297_v36  ;;  %v2612_v3 = vpop.permute.xlu1 %2611  ;;  %v7621_v62 = vld [vmem:[#allocation78_spill] sm:$0xff] }
 0x3b6   :  { %7615 = vst [vmem:[#allocation148_spill] sm:$0xff] %v6300_v51  ;;  %7618 = vst [vmem:[#allocation149_spill] sm:$0xff] %v6306_v27  ;;  %v2675_v53 = vsub.f32 %v5834_v5, %v2612_v3  ;;  %v7630_v5 = vld [vmem:[#allocation169_spill] sm:$0xff] }
 0x3b7   :  { %v2778_v52 = vpop.permute.xlu0 %2777 }
 0x3b8   :  { %v6310_v20 = vmul.f32 %v2778_v52, %v7619_v40  ;;  %v6313_v11 = vmul.f32 %v2778_v52, %v7621_v62  ;;  %v6316_v36 = vmul.f32 %v2778_v52, %v7623_v16  ;;  %v6319_v51 = vmul.f32 %v2778_v52, %v7625_v31  ;;  %3096 = vperm.xlu1 %3924, %v2675_v53   ;;  %v7636_v53 = vld [vmem:[#allocation83_spill] sm:$0xff] }
 0x3b9   :  { %v6322_v63 = vmul.f32 %v2778_v52, %v7627_v59  ;;  %v6325_v27 = vmul.f32 %v2778_v52, %v7629_v55  ;;  %v6328_v3 = vmul.f32 %v2778_v52, %v7630_v5  ;;  %v7638_v59 = vld [vmem:[#allocation84_spill] sm:$0xff]  ;;  %v7642_v5 = vld [vmem:[#allocation170_spill] sm:$0xff] }
 0x3ba   :  { %7620 = vst [vmem:[#allocation151_spill] sm:$0xff] %v6310_v20  ;;  %7622 = vst [vmem:[#allocation56_spill] sm:$0xff] %v6313_v11  ;;  %v7632_v20 = vld [vmem:[#allocation80_spill] sm:$0xff] }
 0x3bb   :  { %7624 = vst [vmem:[#allocation58_spill] sm:$0xff] %v6316_v36  ;;  %7626 = vst [vmem:[#allocation59_spill] sm:$0xff] %v6319_v51  ;;  %v2614_v40 = vpop.permute.xlu0 %2613  ;;  %v7634_v36 = vld [vmem:[#allocation82_spill] sm:$0xff]  ;;  %v7640_v55 = vld [vmem:[#allocation168_spill] sm:$0xff] }
 0x3bc   :  { %7628 = vst [vmem:[#allocation60_spill] sm:$0xff] %v6322_v63  ;;  %7631 = vst [vmem:[#allocation150_spill] sm:$0xff] %v6328_v3  ;;  %v2676_v62 = vsub.f32 %v5842_v9, %v2614_v40  ;;  %v2783_v11 = vpop.permute.xlu1 %2782  ;;  %v7643_v9 = vld [vmem:[#allocation171_spill] sm:$0xff] }
 0x3bd   :  { %v6332_v16 = vmul.f32 %v2783_v11, %v7632_v20  ;;  %v6335_v31 = vmul.f32 %v2783_v11, %v7634_v36  ;;  %v6338_v51 = vmul.f32 %v2783_v11, %v7636_v53  ;;  %v6341_v63 = vmul.f32 %v2783_v11, %v7638_v59 }
 0x3be   :  { %3101 = vperm.xlu0 %3925, %v2676_v62   ;;  %v6344_v52 = vmul.f32 %v2783_v11, %v7640_v55  ;;  %v6347_v3 = vmul.f32 %v2783_v11, %v7642_v5  ;;  %v6350_v40 = vmul.f32 %v2783_v11, %v7643_v9  ;;  %v7649_v62 = vld [vmem:[#allocation87_spill] sm:$0xff]  ;;  %v7651_v55 = vld [vmem:[#allocation89_spill] sm:$0xff]  ;;  %v7652_v5 = vld [vmem:[#allocation172_spill] sm:$0xff] }
 0x3bf   :  { %7633 = vst [vmem:[#allocation152_spill] sm:$0xff] %v6332_v16  ;;  %7635 = vst [vmem:[#allocation153_spill] sm:$0xff] %v6335_v31  ;;  %v7645_v16 = vld [vmem:[#allocation85_spill] sm:$0xff] }
 0x3c0   :  { %7637 = vst [vmem:[#allocation61_spill] sm:$0xff] %v6338_v51  ;;  %7639 = vst [vmem:[#allocation62_spill] sm:$0xff] %v6341_v63  ;;  %v2616_v20 = vpop.permute.xlu1 %2615  ;;  %v7647_v51 = vld [vmem:[#allocation86_spill] sm:$0xff]  ;;  %v7654_v9 = vld [vmem:[#allocation173_spill] sm:$0xff] }
 0x3c1   :  { %7641 = vst [vmem:[#allocation63_spill] sm:$0xff] %v6344_v52  ;;  %7644 = vst [vmem:[#allocation65_spill] sm:$0xff] %v6350_v40  ;;  %v2677_v36 = vsub.f32 %v5850_v44, %v2616_v20  ;;  %v7655_v44 = vld [vmem:[#allocation175_spill] sm:$0xff] }
 0x3c2   :  { %v2788_v31 = vpop.permute.xlu0 %2787 }
 0x3c3   :  { %v6354_v53 = vmul.f32 %v2788_v31, %v7645_v16  ;;  %v6357_v59 = vmul.f32 %v2788_v31, %v7647_v51  ;;  %v6360_v63 = vmul.f32 %v2788_v31, %v7649_v62  ;;  %v6363_v52 = vmul.f32 %v2788_v31, %v7651_v55  ;;  %3106 = vperm.xlu1 %3924, %v2677_v36  }
 0x3c4   :  { %v6366_v11 = vmul.f32 %v2788_v31, %v7652_v5  ;;  %v6369_v40 = vmul.f32 %v2788_v31, %v7654_v9  ;;  %v6372_v20 = vmul.f32 %v2788_v31, %v7655_v44  ;;  %v7662_v5 = vld [vmem:[#allocation92_spill] sm:$0xff]  ;;  %v7664_v9 = vld [vmem:[#allocation174_spill] sm:$0xff] }
 0x3c5   :  { %7646 = vst [vmem:[#allocation154_spill] sm:$0xff] %v6354_v53  ;;  %7648 = vst [vmem:[#allocation155_spill] sm:$0xff] %v6357_v59  ;;  %v7657_v53 = vld [vmem:[#allocation88_spill] sm:$0xff] }
 0x3c6   :  { %7650 = vst [vmem:[#allocation157_spill] sm:$0xff] %v6360_v63  ;;  %7653 = vst [vmem:[#allocation64_spill] sm:$0xff] %v6366_v11  ;;  %v2618_v16 = vpop.permute.xlu0 %2617  ;;  %v7659_v63 = vld [vmem:[#allocation90_spill] sm:$0xff]  ;;  %v7666_v44 = vld [vmem:[#allocation176_spill] sm:$0xff] }
 0x3c7   :  { %7656 = vst [vmem:[#allocation66_spill] sm:$0xff] %v6372_v20  ;;  %v2678_v51 = vsub.f32 %v5858_v39, %v2618_v16  ;;  %v2793_v59 = vpop.permute.xlu1 %2792  ;;  %v7667_v39 = vld [vmem:[#allocation177_spill] sm:$0xff] }
 0x3c8   :  { %v6376_v62 = vmul.f32 %v2793_v59, %v7657_v53  ;;  %v6379_v55 = vmul.f32 %v2793_v59, %v7659_v63  ;;  %v6382_v36 = vmul.f32 %v2793_v59, %v7372_v46  ;;  %v6385_v11 = vmul.f32 %v2793_v59, %v7662_v5 }
 0x3c9   :  { %3111 = vperm.xlu0 %3925, %v2678_v51   ;;  %v6388_v31 = vmul.f32 %v2793_v59, %v7664_v9  ;;  %v6391_v20 = vmul.f32 %v2793_v59, %v7666_v44  ;;  %v6394_v16 = vmul.f32 %v2793_v59, %v7667_v39  ;;  %v7673_v51 = vld [vmem:[#allocation95_spill] sm:$0xff]  ;;  %v7675_v9 = vld [vmem:[#allocation97_spill] sm:$0xff]  ;;  %v7677_v44 = vld [vmem:[#allocation178_spill] sm:$0xff] }
 0x3ca   :  { %7658 = vst [vmem:[#allocation67_spill] sm:$0xff] %v6376_v62  ;;  %7660 = vst [vmem:[#allocation68_spill] sm:$0xff] %v6379_v55  ;;  %v7669_v62 = vld [vmem:[#allocation93_spill] sm:$0xff]  ;;  %v7678_v39 = vld [vmem:[#allocation179_spill] sm:$0xff] }
 0x3cb   :  { %7661 = vst [vmem:[#allocation156_spill] sm:$0xff] %v6382_v36  ;;  %7663 = vst [vmem:[#allocation158_spill] sm:$0xff] %v6385_v11  ;;  %v2620_v53 = vpop.permute.xlu1 %2619  ;;  %v7671_v36 = vld [vmem:[#allocation94_spill] sm:$0xff] }
 0x3cc   :  { %7665 = vst [vmem:[#allocation159_spill] sm:$0xff] %v6388_v31  ;;  %7668 = vst [vmem:[#allocation69_spill] sm:$0xff] %v6394_v16  ;;  %v2679_v63 = vsub.f32 %v5866_v15, %v2620_v53  ;;  %v7679_v15 = vld [vmem:[#allocation181_spill] sm:$0xff] }
 0x3cd   :  { %v2798_v55 = vpop.permute.xlu0 %2797 }
 0x3ce   :  { %v6398_v46 = vmul.f32 %v2798_v55, %v7669_v62  ;;  %v6401_v5 = vmul.f32 %v2798_v55, %v7671_v36  ;;  %v6404_v11 = vmul.f32 %v2798_v55, %v7673_v51  ;;  %v6407_v31 = vmul.f32 %v2798_v55, %v7675_v9  ;;  %3116 = vperm.xlu1 %3924, %v2679_v63   ;;  %v7685_v63 = vld [vmem:[#allocation99_spill] sm:$0xff] }
 0x3cf   :  { %v6410_v59 = vmul.f32 %v2798_v55, %v7677_v44  ;;  %v6413_v16 = vmul.f32 %v2798_v55, %v7678_v39  ;;  %v6416_v53 = vmul.f32 %v2798_v55, %v7679_v15  ;;  %v7688_v39 = vld [vmem:[#allocation180_spill] sm:$0xff]  ;;  %v7690_v15 = vld [vmem:[#allocation182_spill] sm:$0xff] }
 0x3d0   :  { %7670 = vst [vmem:[#allocation70_spill] sm:$0xff] %v6398_v46  ;;  %7672 = vst [vmem:[#allocation71_spill] sm:$0xff] %v6401_v5  ;;  %v7681_v46 = vld [vmem:[#allocation96_spill] sm:$0xff] }
 0x3d1   :  { %7674 = vst [vmem:[#allocation73_spill] sm:$0xff] %v6404_v11  ;;  %7676 = vst [vmem:[#allocation160_spill] sm:$0xff] %v6407_v31  ;;  %v2622_v62 = vpop.permute.xlu0 %2621  ;;  %v7683_v11 = vld [vmem:[#allocation98_spill] sm:$0xff] }
 0x3d2   :  { %7680 = vst [vmem:[#allocation161_spill] sm:$0xff] %v6416_v53  ;;  %v2680_v36 = vsub.f32 %v5874_v50, %v2622_v62  ;;  %v2803_v5 = vpop.permute.xlu1 %2802  ;;  %v7692_v50 = vld [vmem:[#allocation183_spill] sm:$0xff] }
 0x3d3   :  { %v6420_v51 = vmul.f32 %v2803_v5, %v7681_v46  ;;  %v6423_v9 = vmul.f32 %v2803_v5, %v7683_v11  ;;  %v6426_v31 = vmul.f32 %v2803_v5, %v7685_v63  ;;  %v6429_v44 = vmul.f32 %v2803_v5, %v7385_v61 }
 0x3d4   :  { %3121 = vperm.xlu0 %3925, %v2680_v36   ;;  %v6432_v55 = vmul.f32 %v2803_v5, %v7688_v39  ;;  %v6435_v53 = vmul.f32 %v2803_v5, %v7690_v15  ;;  %v6438_v62 = vmul.f32 %v2803_v5, %v7692_v50  ;;  %v7698_v36 = vld [vmem:[#allocation103_spill] sm:$0xff]  ;;  %v7700_v39 = vld [vmem:[#allocation105_spill] sm:$0xff]  ;;  %v7702_v15 = vld [vmem:[#allocation184_spill] sm:$0xff] }
 0x3d5   :  { %7682 = vst [vmem:[#allocation163_spill] sm:$0xff] %v6420_v51  ;;  %7684 = vst [vmem:[#allocation72_spill] sm:$0xff] %v6423_v9  ;;  %v7694_v9 = vld [vmem:[#allocation101_spill] sm:$0xff] }
 0x3d6   :  { %7686 = vst [vmem:[#allocation74_spill] sm:$0xff] %v6426_v31  ;;  %7687 = vst [vmem:[#allocation75_spill] sm:$0xff] %v6429_v44  ;;  %v2624_v46 = vpop.permute.xlu1 %2623  ;;  %v7696_v31 = vld [vmem:[#allocation102_spill] sm:$0xff]  ;;  %v7704_v5 = vld [vmem:[#allocation185_spill] sm:$0xff] }
 0x3d7   :  { %7689 = vst [vmem:[#allocation76_spill] sm:$0xff] %v6432_v55  ;;  %7691 = vst [vmem:[#allocation162_spill] sm:$0xff] %v6435_v53  ;;  %v2808_v51 = vpop.permute.xlu0 %2807  ;;  %v2681_v11 = vsub.f32 %v5882_v45, %v2624_v46 }
 0x3d8   :  { %7693 = vst [vmem:[#allocation164_spill] sm:$0xff] %v6438_v62  ;;  %v6442_v63 = vmul.f32 %v2808_v51, %v7694_v9  ;;  %v6445_v61 = vmul.f32 %v2808_v51, %v7696_v31  ;;  %v6448_v44 = vmul.f32 %v2808_v51, %v7698_v36  ;;  %v6451_v55 = vmul.f32 %v2808_v51, %v7700_v39  ;;  %v7706_v62 = vld [vmem:[#allocation187_spill] sm:$0xff] }
 0x3d9   :  { %v6454_v53 = vmul.f32 %v2808_v51, %v7702_v15  ;;  %v6457_v50 = vmul.f32 %v2808_v51, %v7704_v5  ;;  %v6460_v45 = vmul.f32 %v2808_v51, %v7706_v62  ;;  %3126 = vperm.xlu1 %3924, %v2681_v11   ;;  %v7710_v62 = vld [vmem:[#allocation107_spill] sm:$0xff] }
 0x3da   :  { %7695 = vst [vmem:[#allocation165_spill] sm:$0xff] %v6442_v63  ;;  %7697 = vst [vmem:[#allocation77_spill] sm:$0xff] %v6445_v61  ;;  %v2628_v9 = vpop.permute.xlu1 %2627  ;;  %v7718_v63 = vld [vmem:[#allocation110_spill] sm:$0xff] }
 0x3db   :  { %7699 = vst [vmem:[#allocation78_spill] sm:$0xff] %v6448_v44  ;;  %7701 = vst [vmem:[#allocation79_spill] sm:$0xff] %v6451_v55  ;;  %v2626_v46 = vpop.permute.xlu0 %2625  ;;  %v2683_v31 = vsub.f32 %v5916_v6, %v2628_v9 }
 0x3dc   :  { %7703 = vst [vmem:[#allocation81_spill] sm:$0xff] %v6454_v53  ;;  %7705 = vst [vmem:[#allocation166_spill] sm:$0xff] %v6457_v50  ;;  %v2682_v36 = vsub.f32 %v5890_v54, %v2626_v46  ;;  %v7708_v53 = vld [vmem:[#allocation104_spill] sm:$0xff]  ;;  %v7709_v50 = vld [vmem:[#allocation106_spill] sm:$0xff] }
 0x3dd   :  { %7707 = vst [vmem:[#allocation167_spill] sm:$0xff] %v6460_v45  ;;  %3136 = vperm.xlu1 %3924, %v2683_v31   ;;  %v7711_v54 = vld [vmem:[#allocation186_spill] sm:$0xff]  ;;  %v7713_v46 = vld [vmem:[#allocation188_spill] sm:$0xff] }
 0x3de   :  { %3131 = vperm.xlu0 %3925, %v2682_v36  }
 0x3df   :  { %v2630_v39 = vpop.permute.xlu0 %2629 }
 0x3e0   :  { %v2684_v55 = vsub.f32 %v5949_v12, %v2630_v39  ;;  %v7715_v12 = vld [vmem:[#allocation189_spill] sm:$0xff] }
 0x3e2   :  { %3141 = vperm.xlu0 %3925, %v2684_v55   ;;  %v2813_v15 = vpop.permute.xlu1 %2812 }
 0x3e3   :  { %v6466_v5 = vmul.f32 %v2813_v15, %v7708_v53  ;;  %v6469_v51 = vmul.f32 %v2813_v15, %v7709_v50  ;;  %v6472_v11 = vmul.f32 %v2813_v15, %v7710_v62  ;;  %v6475_v6 = vmul.f32 %v2813_v15, %v7397_v10 }
 0x3e4   :  { %v6478_v9 = vmul.f32 %v2813_v15, %v7711_v54  ;;  %v6481_v31 = vmul.f32 %v2813_v15, %v7713_v46  ;;  %v6484_v55 = vmul.f32 %v2813_v15, %v7715_v12 }
 0x3e6   :  { %7712 = vst [vmem:[#allocation169_spill] sm:$0xff] %v6478_v9  ;;  %7714 = vst [vmem:[#allocation80_spill] sm:$0xff] %v6481_v31  ;;  %v7717_v31 = vld [vmem:[#allocation109_spill] sm:$0xff] }
 0x3e7   :  { %7716 = vst [vmem:[#allocation82_spill] sm:$0xff] %v6484_v55  ;;  %v3012_v53 = vpop.permute.xlu1 %3011 }
 0x3e8   :  { %v3144_v50 = vadd.f32 %v3012_v53, %v5895_v41  ;;  %v3145_v39 = vadd.f32 %v3012_v53, %v5898_v24  ;;  %v3146_v62 = vadd.f32 %v3012_v53, %v5902_v47  ;;  %v3147_v10 = vadd.f32 %v3012_v53, %v5905_v17 }
 0x3e9   :  { %v6486_v36 = vpop.permute.xlu0 %2817  ;;  %v3148_v54 = vadd.f32 %v3012_v53, %v5908_v34  ;;  %v3149_v9 = vadd.f32 %v3012_v53, %v5911_v0  ;;  %v3150_v46 = vadd.f32 %v3012_v53, %v5919_v14 }
 0x3ea   :  { %v6497_v15 = vmul.f32 %v6486_v36, %v7717_v31  ;;  %v3333_v12 = vmax.f32 %v3144_v50, 0.0  ;;  %v3334_v55 = vmax.f32 %v3145_v39, 0.0  ;;  %v3335_v45 = vmax.f32 %v3146_v62, 0.0  ;;  %v7722_v62 = vld [vmem:[#allocation111_spill] sm:$0xff] }
 0x3eb   :  { %v3336_v41 = vmax.f32 %v3147_v10, 0.0  ;;  %v3337_v44 = vmax.f32 %v3148_v54, 0.0  ;;  %v3338_v24 = vmax.f32 %v3149_v9, 0.0  ;;  %v3339_v61 = vmax.f32 %v3150_v46, 0.0  ;;  %v3022_v47 = vpop.permute.xlu1 %3021  ;;  %v7723_v10 = vld [vmem:[#allocation193_spill] sm:$0xff] }
 0x3ec   :  { %v6501_v17 = vmul.f32 %v6486_v36, %v7718_v63  ;;  %3522 = vst [vmem:[#allocation5] sm:$0xff] %v3333_v12  ;;  %3523 = vst [vmem:[#allocation5 + $0x8] sm:$0xff] %v3334_v55  ;;  %v3158_v34 = vadd.f32 %v3022_v47, %v5953_v7  ;;  %v3159_v0 = vadd.f32 %v3022_v47, %v5956_v56  ;;  %v7720_v55 = vld [vmem:[#allocation100_spill] sm:$0xff] }
 0x3ed   :  { %3524 = vst [vmem:[#allocation5 + $0x10] sm:$0xff] %v3335_v45  ;;  %3525 = vst [vmem:[#allocation5 + $0x18] sm:$0xff] %v3336_v41  ;;  %v3160_v14 = vadd.f32 %v3022_v47, %v5959_v37  ;;  %v3161_v31 = vadd.f32 %v3022_v47, %v5962_v18  ;;  %v3162_v63 = vadd.f32 %v3022_v47, %v5966_v57  ;;  %v7719_v18 = vld [vmem:[#allocation91_spill] sm:$0xff] }
 0x3ee   :  { %3526 = vst [vmem:[#allocation5 + $0x20] sm:$0xff] %v3337_v44  ;;  %3527 = vst [vmem:[#allocation5 + $0x28] sm:$0xff] %v3338_v24  ;;  %v3017_v9 = vpop.permute.xlu0 %3016  ;;  %v3163_v53 = vadd.f32 %v3022_v47, %v5969_v49  ;;  %v3164_v45 = vadd.f32 %v3022_v47, %v5972_v58  ;;  %v6513_v7 = vmul.f32 %v6486_v36, %v7403_v42  ;;  %v3347_v54 = vmax.f32 %v3158_v34, 0.0 }
 0x3ef   :  { %3528 = vst.msk [vmem:[#allocation5 + $0x30] sm:$0xff] %vm1501_vm2, %v3339_v61  ;;  %v3151_v56 = vadd.f32 %v3017_v9, %v5924_v13  ;;  %v3152_v37 = vadd.f32 %v3017_v9, %v5927_v2  ;;  %v3153_v44 = vadd.f32 %v3017_v9, %v7719_v18  ;;  %v3154_v50 = vadd.f32 %v3017_v9, %v7720_v55  ;;  %v7721_v61 = vld [vmem:[#allocation108_spill] sm:$0xff]  ;;  %v3027_v18 = vpop.permute.xlu1 %3026 }
 0x3f0   :  { %v3155_v39 = vadd.f32 %v3017_v9, %v7721_v61  ;;  %v3156_v57 = vadd.f32 %v3017_v9, %v7722_v62  ;;  %v3157_v49 = vadd.f32 %v3017_v9, %v7723_v10  ;;  %v3348_v47 = vmax.f32 %v3159_v0, 0.0  ;;  %3536 = vst [vmem:[#allocation5 + $0x70] sm:$0xff] %v3347_v54 }
 0x3f1   :  { %v3340_v58 = vmax.f32 %v3151_v56, 0.0  ;;  %v3341_v46 = vmax.f32 %v3152_v37, 0.0  ;;  %v3342_v12 = vmax.f32 %v3153_v44, 0.0  ;;  %v3343_v42 = vmax.f32 %v3154_v50, 0.0 }
 0x3f2   :  { %v3344_v41 = vmax.f32 %v3155_v39, 0.0  ;;  %v3345_v24 = vmax.f32 %v3156_v57, 0.0  ;;  %v3346_v13 = vmax.f32 %v3157_v49, 0.0  ;;  %v3032_v2 = vpop.permute.xlu0 %3031  ;;  %v3349_v55 = vmax.f32 %v3160_v14, 0.0  ;;  %3537 = vst [vmem:[#allocation5 + $0x78] sm:$0xff] %v3348_v47  ;;  %v7731_v47 = vld [vmem:[#allocation114_spill] sm:$0xff] }
 0x3f3   :  { %3529 = vst [vmem:[#allocation5 + $0x38] sm:$0xff] %v3340_v58  ;;  %3530 = vst [vmem:[#allocation5 + $0x40] sm:$0xff] %v3341_v46  ;;  %v3350_v61 = vmax.f32 %v3161_v31, 0.0  ;;  %v3351_v62 = vmax.f32 %v3162_v63, 0.0  ;;  %v3352_v9 = vmax.f32 %v3163_v53, 0.0  ;;  %v3353_v34 = vmax.f32 %v3164_v45, 0.0 }
 0x3f4   :  { %3531 = vst [vmem:[#allocation5 + $0x48] sm:$0xff] %v3342_v12  ;;  %3532 = vst [vmem:[#allocation5 + $0x50] sm:$0xff] %v3343_v42  ;;  %v3172_v56 = vadd.f32 %v3032_v2, %v6001_v22  ;;  %v3173_v0 = vadd.f32 %v3032_v2, %v6004_v32  ;;  %v3174_v37 = vadd.f32 %v3032_v2, %v6007_v38  ;;  %v7724_v31 = vld [vmem:[#allocation11_spill] sm:$0xff]  ;;  %v7725_v53 = vld [vmem:[#allocation13_spill] sm:$0xff] }
 0x3f5   :  { %3533 = vst [vmem:[#allocation5 + $0x58] sm:$0xff] %v3344_v41  ;;  %3534 = vst [vmem:[#allocation5 + $0x60] sm:$0xff] %v3345_v24  ;;  %v3175_v14 = vadd.f32 %v3032_v2, %v6010_v48  ;;  %v3176_v63 = vadd.f32 %v3032_v2, %v7724_v31  ;;  %v3177_v44 = vadd.f32 %v3032_v2, %v7725_v53  ;;  %v7726_v32 = vld [vmem:[#allocation8_spill] sm:$0xff]  ;;  %v7727_v48 = vld [vmem:[#allocation9_spill] sm:$0xff] }
 0x3f6   :  { %3535 = vst.msk [vmem:[#allocation5 + $0x68] sm:$0xff] %vm1501_vm2, %v3346_v13  ;;  %3538 = vst [vmem:[#allocation5 + $0x80] sm:$0xff] %v3349_v55  ;;  %v3178_v50 = vadd.f32 %v3032_v2, %v6019_v8  ;;  %v3361_v45 = vmax.f32 %v3172_v56, 0.0  ;;  %v3362_v22 = vmax.f32 %v3173_v0, 0.0  ;;  %v3363_v39 = vmax.f32 %v3174_v37, 0.0  ;;  %v3037_v38 = vpop.permute.xlu1 %3036  ;;  %v7728_v12 = vld [vmem:[#allocation10_spill] sm:$0xff] }
 0x3f7   :  { %3539 = vst [vmem:[#allocation5 + $0x88] sm:$0xff] %v3350_v61  ;;  %3540 = vst [vmem:[#allocation5 + $0x90] sm:$0xff] %v3351_v62  ;;  %v3165_v57 = vadd.f32 %v3027_v18, %v7726_v32  ;;  %v3364_v10 = vmax.f32 %v3175_v14, 0.0  ;;  %v3365_v49 = vmax.f32 %v3176_v63, 0.0  ;;  %v3366_v54 = vmax.f32 %v3177_v44, 0.0  ;;  %v7729_v8 = vld [vmem:[#allocation12_spill] sm:$0xff] }
 0x3f8   :  { %3541 = vst [vmem:[#allocation5 + $0x98] sm:$0xff] %v3352_v9  ;;  %3542 = vst.msk [vmem:[#allocation5 + $0xa0] sm:$0xff] %vm1501_vm2, %v3353_v34  ;;  %v3367_v58 = vmax.f32 %v3178_v50, 0.0  ;;  %v3166_v46 = vadd.f32 %v3027_v18, %v7727_v48  ;;  %v3167_v42 = vadd.f32 %v3027_v18, %v7728_v12  ;;  %v3168_v41 = vadd.f32 %v3027_v18, %v7729_v8  ;;  %v7730_v24 = vld [vmem:[#allocation113_spill] sm:$0xff]  ;;  %v7732_v55 = vld [vmem:[#allocation115_spill] sm:$0xff] }
 0x3f9   :  { %3550 = vst [vmem:[#allocation5 + $0xe0] sm:$0xff] %v3361_v45  ;;  %3551 = vst [vmem:[#allocation5 + $0xe8] sm:$0xff] %v3362_v22  ;;  %v3169_v13 = vadd.f32 %v3027_v18, %v7730_v24  ;;  %v3170_v2 = vadd.f32 %v3027_v18, %v7731_v47  ;;  %v3171_v61 = vadd.f32 %v3027_v18, %v7732_v55  ;;  %v3354_v62 = vmax.f32 %v3165_v57, 0.0  ;;  %v7733_v53 = vld [vmem:[#allocation14_spill] sm:$0xff]  ;;  %v7734_v50 = vld [vmem:[#allocation15_spill] sm:$0xff] }
 0x3fa   :  { %3552 = vst [vmem:[#allocation5 + $0xf0] sm:$0xff] %v3363_v39  ;;  %3553 = vst [vmem:[#allocation5 + $0xf8] sm:$0xff] %v3364_v10  ;;  %v3179_v9 = vadd.f32 %v3037_v38, %v6024_v23  ;;  %v3355_v34 = vmax.f32 %v3166_v46, 0.0  ;;  %v3356_v56 = vmax.f32 %v3167_v42, 0.0  ;;  %v3357_v0 = vmax.f32 %v3168_v41, 0.0  ;;  %v3042_v63 = vpop.permute.xlu0 %3041  ;;  %v7735_v22 = vld [vmem:[#allocation119_spill] sm:$0xff] }
 0x3fb   :  { %3554 = vst [vmem:[#allocation5 + $0x100] sm:$0xff] %v3365_v49  ;;  %3555 = vst [vmem:[#allocation5 + $0x108] sm:$0xff] %v3366_v54  ;;  %v3358_v37 = vmax.f32 %v3169_v13, 0.0  ;;  %v3359_v14 = vmax.f32 %v3170_v2, 0.0  ;;  %v3360_v31 = vmax.f32 %v3171_v61, 0.0  ;;  %v3180_v44 = vadd.f32 %v3037_v38, %v7733_v53  ;;  %v7736_v32 = vld [vmem:[#allocation121_spill] sm:$0xff] }
 0x3fc   :  { %3556 = vst.msk [vmem:[#allocation5 + $0x110] sm:$0xff] %vm1501_vm2, %v3367_v58  ;;  %3543 = vst [vmem:[#allocation5 + $0xa8] sm:$0xff] %v3354_v62  ;;  %v3181_v45 = vadd.f32 %v3037_v38, %v7734_v50  ;;  %v3186_v18 = vadd.f32 %v3042_v63, %v6046_v25  ;;  %v3187_v23 = vadd.f32 %v3042_v63, %v6049_v21  ;;  %v7737_v10 = vld [vmem:[#allocation17_spill] sm:$0xff]  ;;  %v7738_v54 = vld [vmem:[#allocation18_spill] sm:$0xff] }
 0x3fd   :  { %3544 = vst [vmem:[#allocation5 + $0xb0] sm:$0xff] %v3355_v34  ;;  %3545 = vst [vmem:[#allocation5 + $0xb8] sm:$0xff] %v3356_v56  ;;  %v3188_v39 = vadd.f32 %v3042_v63, %v7735_v22  ;;  %v3189_v57 = vadd.f32 %v3042_v63, %v7736_v32  ;;  %v3190_v49 = vadd.f32 %v3042_v63, %v7737_v10  ;;  %v7739_v48 = vld [vmem:[#allocation19_spill] sm:$0xff]  ;;  %v7740_v12 = vld [vmem:[#allocation116_spill] sm:$0xff] }
 0x3fe   :  { %3546 = vst [vmem:[#allocation5 + $0xc0] sm:$0xff] %v3357_v0  ;;  %3547 = vst [vmem:[#allocation5 + $0xc8] sm:$0xff] %v3358_v37  ;;  %v3191_v58 = vadd.f32 %v3042_v63, %v7738_v54  ;;  %v3192_v46 = vadd.f32 %v3042_v63, %v7739_v48  ;;  %v3182_v42 = vadd.f32 %v3037_v38, %v7740_v12  ;;  %v3375_v8 = vmax.f32 %v3186_v18, 0.0  ;;  %v7741_v2 = vld [vmem:[#allocation117_spill] sm:$0xff]  ;;  %v7742_v61 = vld [vmem:[#allocation118_spill] sm:$0xff] }
 0x3ff   :  { %3548 = vst [vmem:[#allocation5 + $0xd0] sm:$0xff] %v3359_v14  ;;  %3549 = vst.msk [vmem:[#allocation5 + $0xd8] sm:$0xff] %vm1501_vm2, %v3360_v31  ;;  %v3376_v41 = vmax.f32 %v3187_v23, 0.0  ;;  %v3377_v25 = vmax.f32 %v3188_v39, 0.0  ;;  %v3378_v24 = vmax.f32 %v3189_v57, 0.0  ;;  %v3379_v21 = vmax.f32 %v3190_v49, 0.0 }
 0x400   :  { %v3380_v13 = vmax.f32 %v3191_v58, 0.0  ;;  %v3381_v47 = vmax.f32 %v3192_v46, 0.0  ;;  %v3183_v55 = vadd.f32 %v3037_v38, %v7741_v2  ;;  %3564 = vst [vmem:[#allocation5 + $0x150] sm:$0xff] %v3375_v8  ;;  %v3184_v62 = vadd.f32 %v3037_v38, %v7742_v61  ;;  %v7743_v34 = vld [vmem:[#allocation16_spill] sm:$0xff]  ;;  %v3047_v53 = vpop.permute.xlu1 %3046  ;;  %v7747_v32 = vld [vmem:[#allocation122_spill] sm:$0xff]  ;;  %v7748_v57 = vld [vmem:[#allocation123_spill] sm:$0xff] }
 0x401   :  { %3565 = vst [vmem:[#allocation5 + $0x158] sm:$0xff] %v3376_v41  ;;  %3566 = vst [vmem:[#allocation5 + $0x160] sm:$0xff] %v3377_v25  ;;  %v3185_v56 = vadd.f32 %v3037_v38, %v7743_v34  ;;  %v3368_v0 = vmax.f32 %v3179_v9, 0.0  ;;  %v3369_v37 = vmax.f32 %v3180_v44, 0.0  ;;  %v3370_v14 = vmax.f32 %v3181_v45, 0.0  ;;  %v7744_v50 = vld [vmem:[#allocation112_spill] sm:$0xff] }
 0x402   :  { %3567 = vst [vmem:[#allocation5 + $0x168] sm:$0xff] %v3378_v24  ;;  %3568 = vst [vmem:[#allocation5 + $0x170] sm:$0xff] %v3379_v21  ;;  %v3371_v31 = vmax.f32 %v3182_v42, 0.0  ;;  %v3372_v63 = vmax.f32 %v3183_v55, 0.0  ;;  %v6557_v18 = vmul.f32 %v6486_v36, %v7744_v50  ;;  %v3373_v23 = vmax.f32 %v3184_v62, 0.0  ;;  %v7745_v39 = vld [vmem:[#allocation20_spill] sm:$0xff] }
 0x403   :  { %3569 = vst [vmem:[#allocation5 + $0x178] sm:$0xff] %v3380_v13  ;;  %3570 = vst.msk [vmem:[#allocation5 + $0x180] sm:$0xff] %vm1501_vm2, %v3381_v47  ;;  %v3374_v22 = vmax.f32 %v3185_v56, 0.0  ;;  %v3193_v38 = vadd.f32 %v3047_v53, %v7745_v39  ;;  %v7746_v9 = vld [vmem:[#allocation120_spill] sm:$0xff]  ;;  %v3195_v45 = vadd.f32 %v3047_v53, %v7747_v32  ;;  %v3196_v10 = vadd.f32 %v3047_v53, %v7748_v57  ;;  %v7749_v49 = vld [vmem:[#allocation21_spill] sm:$0xff] }
 0x404   :  { %3557 = vst [vmem:[#allocation5 + $0x118] sm:$0xff] %v3368_v0  ;;  %3558 = vst [vmem:[#allocation5 + $0x120] sm:$0xff] %v3369_v37  ;;  %v3194_v44 = vadd.f32 %v3047_v53, %v7746_v9  ;;  %v3197_v54 = vadd.f32 %v3047_v53, %v7749_v49  ;;  %v3198_v58 = vadd.f32 %v3047_v53, %v6083_v35  ;;  %v7750_v48 = vld [vmem:[#allocation22_spill] sm:$0xff]  ;;  %v7752_v2 = vld [vmem:[#allocation191_spill] sm:$0xff] }
 0x405   :  { %3559 = vst [vmem:[#allocation5 + $0x128] sm:$0xff] %v3370_v14  ;;  %3560 = vst [vmem:[#allocation5 + $0x130] sm:$0xff] %v3371_v31  ;;  %v3199_v46 = vadd.f32 %v3047_v53, %v7750_v48  ;;  %v3382_v12 = vmax.f32 %v3193_v38, 0.0  ;;  %v7751_v8 = vld [vmem:[#allocation190_spill] sm:$0xff]  ;;  %v3384_v25 = vmax.f32 %v3195_v45, 0.0  ;;  %v3385_v24 = vmax.f32 %v3196_v10, 0.0 }
 0x406   :  { %3561 = vst [vmem:[#allocation5 + $0x138] sm:$0xff] %v3372_v63  ;;  %3562 = vst [vmem:[#allocation5 + $0x140] sm:$0xff] %v3373_v23  ;;  %v3383_v42 = vmax.f32 %v3194_v44, 0.0  ;;  %v6569_v41 = vmul.f32 %v6486_v36, %v7751_v8  ;;  %v3386_v21 = vmax.f32 %v3197_v54, 0.0  ;;  %v3387_v13 = vmax.f32 %v3198_v58, 0.0  ;;  %v7753_v55 = vld [vmem:[#allocation192_spill] sm:$0xff]  ;;  %v3052_v62 = vpop.permute.xlu0 %3051 }
 0x407   :  { %3563 = vst.msk [vmem:[#allocation5 + $0x148] sm:$0xff] %vm1501_vm2, %v3374_v22  ;;  %v3388_v47 = vmax.f32 %v3199_v46, 0.0  ;;  %3571 = vst [vmem:[#allocation5 + $0x188] sm:$0xff] %v3382_v12  ;;  %v6573_v35 = vmul.f32 %v6486_v36, %v7752_v2  ;;  %v6577_v61 = vmul.f32 %v6486_v36, %v7753_v55  ;;  %v7754_v34 = vld [vmem:[#allocation23_spill] sm:$0xff]  ;;  %v7755_v0 = vld [vmem:[#allocation25_spill] sm:$0xff]  ;;  %v3205_v36 = vadd.f32 %v3052_v62, %v6105_v1 }
 0x408   :  { %3572 = vst [vmem:[#allocation5 + $0x190] sm:$0xff] %v3383_v42  ;;  %3573 = vst [vmem:[#allocation5 + $0x198] sm:$0xff] %v3384_v25  ;;  %v3200_v56 = vadd.f32 %v3052_v62, %v7754_v34  ;;  %v3201_v37 = vadd.f32 %v3052_v62, %v7755_v0  ;;  %v7756_v14 = vld [vmem:[#allocation124_spill] sm:$0xff]  ;;  %v7757_v63 = vld [vmem:[#allocation125_spill] sm:$0xff] }
 0x409   :  { %3574 = vst [vmem:[#allocation5 + $0x1a0] sm:$0xff] %v3385_v24  ;;  %3575 = vst [vmem:[#allocation5 + $0x1a8] sm:$0xff] %v3386_v21  ;;  %v3202_v31 = vadd.f32 %v3052_v62, %v7756_v14  ;;  %v3203_v53 = vadd.f32 %v3052_v62, %v7757_v63  ;;  %v7758_v50 = vld [vmem:[#allocation127_spill] sm:$0xff]  ;;  %v7759_v22 = vld [vmem:[#allocation24_spill] sm:$0xff]  ;;  %v3394_v57 = vmax.f32 %v3205_v36, 0.0 }
 0x40a   :  { %3576 = vst [vmem:[#allocation5 + $0x1b0] sm:$0xff] %v3387_v13  ;;  %3577 = vst.msk [vmem:[#allocation5 + $0x1b8] sm:$0xff] %vm1501_vm2, %v3388_v47  ;;  %v3204_v23 = vadd.f32 %v3052_v62, %v7758_v50  ;;  %v3206_v39 = vadd.f32 %v3052_v62, %v7759_v22  ;;  %v3389_v38 = vmax.f32 %v3200_v56, 0.0  ;;  %v3390_v9 = vmax.f32 %v3201_v37, 0.0  ;;  %v7760_v54 = vld [vmem:[#allocation26_spill] sm:$0xff]  ;;  %v7761_v58 = vld [vmem:[#allocation27_spill] sm:$0xff] }
 0x40b   :  { %v3391_v44 = vmax.f32 %v3202_v31, 0.0  ;;  %v3392_v32 = vmax.f32 %v3203_v53, 0.0  ;;  %v3057_v49 = vpop.permute.xlu1 %3056  ;;  %3583 = vst [vmem:[#allocation5 + $0x1e8] sm:$0xff] %v3394_v57  ;;  %v7762_v46 = vld [vmem:[#allocation28_spill] sm:$0xff]  ;;  %v7763_v42 = vld [vmem:[#allocation126_spill] sm:$0xff]  ;;  %v7765_v13 = vld [vmem:[#allocation129_spill] sm:$0xff] }
 0x40c   :  { %v3393_v45 = vmax.f32 %v3204_v23, 0.0  ;;  %v3395_v10 = vmax.f32 %v3206_v39, 0.0  ;;  %3578 = vst [vmem:[#allocation5 + $0x1c0] sm:$0xff] %v3389_v38  ;;  %3579 = vst [vmem:[#allocation5 + $0x1c8] sm:$0xff] %v3390_v9  ;;  %v3207_v1 = vadd.f32 %v3057_v49, %v7760_v54  ;;  %v3208_v48 = vadd.f32 %v3057_v49, %v7761_v58  ;;  %v7764_v25 = vld [vmem:[#allocation128_spill] sm:$0xff]  ;;  %v7766_v31 = vld [vmem:[#allocation29_spill] sm:$0xff] }
 0x40d   :  { %3580 = vst [vmem:[#allocation5 + $0x1d0] sm:$0xff] %v3391_v44  ;;  %3581 = vst [vmem:[#allocation5 + $0x1d8] sm:$0xff] %v3392_v32  ;;  %v3209_v12 = vadd.f32 %v3057_v49, %v7762_v46  ;;  %v3210_v8 = vadd.f32 %v3057_v49, %v7763_v42  ;;  %v3211_v24 = vadd.f32 %v3057_v49, %v7764_v25  ;;  %v7767_v63 = vld [vmem:[#allocation30_spill] sm:$0xff]  ;;  %v7768_v50 = vld [vmem:[#allocation31_spill] sm:$0xff] }
 0x40e   :  { %3582 = vst [vmem:[#allocation5 + $0x1e0] sm:$0xff] %v3393_v45  ;;  %3584 = vst.msk [vmem:[#allocation5 + $0x1f0] sm:$0xff] %vm1501_vm2, %v3395_v10  ;;  %v3212_v21 = vadd.f32 %v3057_v49, %v6127_v33  ;;  %v3213_v47 = vadd.f32 %v3057_v49, %v7765_v13  ;;  %v3396_v2 = vmax.f32 %v3207_v1, 0.0  ;;  %v3397_v55 = vmax.f32 %v3208_v48, 0.0  ;;  %v7769_v36 = vld [vmem:[#allocation33_spill] sm:$0xff]  ;;  %v7770_v39 = vld [vmem:[#allocation130_spill] sm:$0xff] }
 0x40f   :  { %v3398_v62 = vmax.f32 %v3209_v12, 0.0  ;;  %v3399_v34 = vmax.f32 %v3210_v8, 0.0  ;;  %v3400_v56 = vmax.f32 %v3211_v24, 0.0  ;;  %v7771_v44 = vld [vmem:[#allocation131_spill] sm:$0xff]  ;;  %v7772_v46 = vld [vmem:[#allocation133_spill] sm:$0xff]  ;;  %v7773_v12 = vld [vmem:[#allocation32_spill] sm:$0xff] }
 0x410   :  { %v3401_v0 = vmax.f32 %v3212_v21, 0.0  ;;  %v3402_v37 = vmax.f32 %v3213_v47, 0.0  ;;  %3585 = vst [vmem:[#allocation5 + $0x1f8] sm:$0xff] %v3396_v2  ;;  %3586 = vst [vmem:[#allocation5 + $0x200] sm:$0xff] %v3397_v55  ;;  %v7774_v8 = vld [vmem:[#allocation34_spill] sm:$0xff]  ;;  %v7775_v24 = vld [vmem:[#allocation35_spill] sm:$0xff] }
 0x411   :  { %3587 = vst [vmem:[#allocation5 + $0x208] sm:$0xff] %v3398_v62  ;;  %3588 = vst [vmem:[#allocation5 + $0x210] sm:$0xff] %v3399_v34  ;;  %v3062_v14 = vpop.permute.xlu0 %3061  ;;  %v7776_v13 = vld [vmem:[#allocation36_spill] sm:$0xff] }
 0x412   :  { %3589 = vst [vmem:[#allocation5 + $0x218] sm:$0xff] %v3400_v56  ;;  %3590 = vst [vmem:[#allocation5 + $0x220] sm:$0xff] %v3401_v0  ;;  %v3214_v33 = vadd.f32 %v3062_v14, %v7766_v31  ;;  %v3215_v53 = vadd.f32 %v3062_v14, %v7767_v63  ;;  %v3216_v23 = vadd.f32 %v3062_v14, %v7768_v50  ;;  %v7777_v55 = vld [vmem:[#allocation132_spill] sm:$0xff]  ;;  %v7779_v50 = vld [vmem:[#allocation135_spill] sm:$0xff] }
 0x413   :  { %3591 = vst.msk [vmem:[#allocation5 + $0x228] sm:$0xff] %vm1501_vm2, %v3402_v37  ;;  %v3217_v22 = vadd.f32 %v3062_v14, %v7769_v36  ;;  %v3218_v38 = vadd.f32 %v3062_v14, %v7770_v39  ;;  %v3219_v9 = vadd.f32 %v3062_v14, %v6149_v28  ;;  %v3220_v32 = vadd.f32 %v3062_v14, %v7771_v44  ;;  %v7780_v36 = vld [vmem:[#allocation37_spill] sm:$0xff]  ;;  %v7781_v39 = vld [vmem:[#allocation38_spill] sm:$0xff] }
 0x414   :  { %v3403_v45 = vmax.f32 %v3214_v33, 0.0  ;;  %v3404_v57 = vmax.f32 %v3215_v53, 0.0  ;;  %v3405_v10 = vmax.f32 %v3216_v23, 0.0  ;;  %v7778_v53 = vld [vmem:[#allocation134_spill] sm:$0xff] }
 0x415   :  { %v3406_v49 = vmax.f32 %v3217_v22, 0.0  ;;  %v3407_v54 = vmax.f32 %v3218_v38, 0.0  ;;  %v3408_v1 = vmax.f32 %v3219_v9, 0.0  ;;  %v3409_v58 = vmax.f32 %v3220_v32, 0.0  ;;  %v7782_v9 = vld [vmem:[#allocation39_spill] sm:$0xff] }
 0x416   :  { %3592 = vst [vmem:[#allocation5 + $0x230] sm:$0xff] %v3403_v45  ;;  %3593 = vst [vmem:[#allocation5 + $0x238] sm:$0xff] %v3404_v57  ;;  %v3067_v48 = vpop.permute.xlu1 %3066  ;;  %v7783_v45 = vld [vmem:[#allocation41_spill] sm:$0xff] }
 0x417   :  { %3594 = vst [vmem:[#allocation5 + $0x240] sm:$0xff] %v3405_v10  ;;  %3595 = vst [vmem:[#allocation5 + $0x248] sm:$0xff] %v3406_v49  ;;  %v3221_v28 = vadd.f32 %v3067_v48, %v7772_v46  ;;  %v3222_v42 = vadd.f32 %v3067_v48, %v7773_v12  ;;  %v3223_v25 = vadd.f32 %v3067_v48, %v7774_v8  ;;  %v7784_v12 = vld [vmem:[#allocation136_spill] sm:$0xff] }
 0x418   :  { %3596 = vst [vmem:[#allocation5 + $0x250] sm:$0xff] %v3407_v54  ;;  %3597 = vst [vmem:[#allocation5 + $0x258] sm:$0xff] %v3408_v1  ;;  %v3224_v21 = vadd.f32 %v3067_v48, %v7775_v24  ;;  %v3225_v47 = vadd.f32 %v3067_v48, %v7776_v13  ;;  %v3226_v2 = vadd.f32 %v3067_v48, %v6171_v26 }
 0x419   :  { %3598 = vst.msk [vmem:[#allocation5 + $0x260] sm:$0xff] %vm1501_vm2, %v3409_v58  ;;  %v3227_v62 = vadd.f32 %v3067_v48, %v7777_v55  ;;  %v3410_v34 = vmax.f32 %v3221_v28, 0.0  ;;  %v3411_v56 = vmax.f32 %v3222_v42, 0.0  ;;  %v3412_v0 = vmax.f32 %v3223_v25, 0.0  ;;  %v7785_v42 = vld [vmem:[#allocation137_spill] sm:$0xff]  ;;  %v7786_v25 = vld [vmem:[#allocation139_spill] sm:$0xff] }
 0x41a   :  { %v3413_v37 = vmax.f32 %v3224_v21, 0.0  ;;  %v3414_v14 = vmax.f32 %v3225_v47, 0.0  ;;  %v3415_v31 = vmax.f32 %v3226_v2, 0.0  ;;  %v7787_v21 = vld [vmem:[#allocation40_spill] sm:$0xff]  ;;  %v7788_v47 = vld [vmem:[#allocation42_spill] sm:$0xff] }
 0x41b   :  { %v3416_v33 = vmax.f32 %v3227_v62, 0.0  ;;  %3599 = vst [vmem:[#allocation5 + $0x268] sm:$0xff] %v3410_v34  ;;  %3600 = vst [vmem:[#allocation5 + $0x270] sm:$0xff] %v3411_v56  ;;  %v7789_v62 = vld [vmem:[#allocation43_spill] sm:$0xff] }
 0x41c   :  { %3601 = vst [vmem:[#allocation5 + $0x278] sm:$0xff] %v3412_v0  ;;  %3602 = vst [vmem:[#allocation5 + $0x280] sm:$0xff] %v3413_v37  ;;  %v3072_v63 = vpop.permute.xlu0 %3071 }
 0x41d   :  { %3603 = vst [vmem:[#allocation5 + $0x288] sm:$0xff] %v3414_v14  ;;  %3604 = vst [vmem:[#allocation5 + $0x290] sm:$0xff] %v3415_v31  ;;  %v3228_v26 = vadd.f32 %v3072_v63, %v7778_v53  ;;  %v3229_v23 = vadd.f32 %v3072_v63, %v7779_v50  ;;  %v3230_v22 = vadd.f32 %v3072_v63, %v7780_v36  ;;  %v7791_v50 = vld [vmem:[#allocation138_spill] sm:$0xff]  ;;  %v7792_v36 = vld [vmem:[#allocation140_spill] sm:$0xff] }
 0x41e   :  { %3605 = vst.msk [vmem:[#allocation5 + $0x298] sm:$0xff] %vm1501_vm2, %v3416_v33  ;;  %v3231_v38 = vadd.f32 %v3072_v63, %v7781_v39  ;;  %v3232_v44 = vadd.f32 %v3072_v63, %v7782_v9  ;;  %v3233_v32 = vadd.f32 %v3072_v63, %v6193_v60  ;;  %v3234_v57 = vadd.f32 %v3072_v63, %v7783_v45  ;;  %v7793_v39 = vld [vmem:[#allocation141_spill] sm:$0xff]  ;;  %v7795_v45 = vld [vmem:[#allocation46_spill] sm:$0xff] }
 0x41f   :  { %v3417_v10 = vmax.f32 %v3228_v26, 0.0  ;;  %v3418_v49 = vmax.f32 %v3229_v23, 0.0  ;;  %v3419_v54 = vmax.f32 %v3230_v22, 0.0  ;;  %v7790_v26 = vld [vmem:[#allocation44_spill] sm:$0xff]  ;;  %v7794_v9 = vld [vmem:[#allocation45_spill] sm:$0xff] }
 0x420   :  { %v3420_v1 = vmax.f32 %v3231_v38, 0.0  ;;  %v3421_v58 = vmax.f32 %v3232_v44, 0.0  ;;  %v3422_v48 = vmax.f32 %v3233_v32, 0.0  ;;  %v3423_v46 = vmax.f32 %v3234_v57, 0.0 }
 0x421   :  { %3606 = vst [vmem:[#allocation5 + $0x2a0] sm:$0xff] %v3417_v10  ;;  %3607 = vst [vmem:[#allocation5 + $0x2a8] sm:$0xff] %v3418_v49  ;;  %v3077_v28 = vpop.permute.xlu1 %3076 }
 0x422   :  { %3608 = vst [vmem:[#allocation5 + $0x2b0] sm:$0xff] %v3419_v54  ;;  %3609 = vst [vmem:[#allocation5 + $0x2b8] sm:$0xff] %v3420_v1  ;;  %v3235_v60 = vadd.f32 %v3077_v28, %v7784_v12  ;;  %v3236_v8 = vadd.f32 %v3077_v28, %v7785_v42  ;;  %v3237_v24 = vadd.f32 %v3077_v28, %v7786_v25  ;;  %v7796_v12 = vld [vmem:[#allocation47_spill] sm:$0xff] }
 0x423   :  { %3610 = vst [vmem:[#allocation5 + $0x2c0] sm:$0xff] %v3421_v58  ;;  %3611 = vst [vmem:[#allocation5 + $0x2c8] sm:$0xff] %v3422_v48  ;;  %v3238_v13 = vadd.f32 %v3077_v28, %v7787_v21  ;;  %v3239_v2 = vadd.f32 %v3077_v28, %v7788_v47  ;;  %v3240_v55 = vadd.f32 %v3077_v28, %v6215_v29 }
 0x424   :  { %3612 = vst.msk [vmem:[#allocation5 + $0x2d0] sm:$0xff] %vm1501_vm2, %v3423_v46  ;;  %v3241_v34 = vadd.f32 %v3077_v28, %v7789_v62  ;;  %v3424_v56 = vmax.f32 %v3235_v60, 0.0  ;;  %v3425_v0 = vmax.f32 %v3236_v8, 0.0  ;;  %v3426_v37 = vmax.f32 %v3237_v24, 0.0  ;;  %v7797_v60 = vld [vmem:[#allocation49_spill] sm:$0xff]  ;;  %v7798_v8 = vld [vmem:[#allocation142_spill] sm:$0xff] }
 0x425   :  { %v3427_v14 = vmax.f32 %v3238_v13, 0.0  ;;  %v3428_v31 = vmax.f32 %v3239_v2, 0.0  ;;  %v3429_v33 = vmax.f32 %v3240_v55, 0.0  ;;  %v7799_v24 = vld [vmem:[#allocation143_spill] sm:$0xff]  ;;  %v7800_v13 = vld [vmem:[#allocation145_spill] sm:$0xff]  ;;  %v7801_v55 = vld [vmem:[#allocation48_spill] sm:$0xff] }
 0x426   :  { %v3430_v63 = vmax.f32 %v3241_v34, 0.0  ;;  %3613 = vst [vmem:[#allocation5 + $0x2d8] sm:$0xff] %v3424_v56  ;;  %3614 = vst [vmem:[#allocation5 + $0x2e0] sm:$0xff] %v3425_v0 }
 0x427   :  { %3615 = vst [vmem:[#allocation5 + $0x2e8] sm:$0xff] %v3426_v37  ;;  %3616 = vst [vmem:[#allocation5 + $0x2f0] sm:$0xff] %v3427_v14  ;;  %v3082_v53 = vpop.permute.xlu0 %3081 }
 0x428   :  { %3617 = vst [vmem:[#allocation5 + $0x2f8] sm:$0xff] %v3428_v31  ;;  %3618 = vst [vmem:[#allocation5 + $0x300] sm:$0xff] %v3429_v33  ;;  %v3242_v29 = vadd.f32 %v3082_v53, %v7790_v26  ;;  %v3243_v23 = vadd.f32 %v3082_v53, %v7791_v50  ;;  %v3244_v22 = vadd.f32 %v3082_v53, %v7792_v36  ;;  %v7803_v26 = vld [vmem:[#allocation51_spill] sm:$0xff]  ;;  %v7804_v50 = vld [vmem:[#allocation52_spill] sm:$0xff] }
 0x429   :  { %3619 = vst.msk [vmem:[#allocation5 + $0x308] sm:$0xff] %vm1501_vm2, %v3430_v63  ;;  %v3245_v38 = vadd.f32 %v3082_v53, %v7793_v39  ;;  %v3246_v44 = vadd.f32 %v3082_v53, %v7794_v9  ;;  %v3247_v32 = vadd.f32 %v3082_v53, %v6237_v43  ;;  %v3248_v57 = vadd.f32 %v3082_v53, %v7795_v45  ;;  %v7802_v53 = vld [vmem:[#allocation50_spill] sm:$0xff]  ;;  %v7805_v36 = vld [vmem:[#allocation144_spill] sm:$0xff] }
 0x42a   :  { %v3431_v10 = vmax.f32 %v3242_v29, 0.0  ;;  %v3432_v49 = vmax.f32 %v3243_v23, 0.0  ;;  %v3433_v54 = vmax.f32 %v3244_v22, 0.0  ;;  %v7806_v39 = vld [vmem:[#allocation146_spill] sm:$0xff] }
 0x42b   :  { %v3434_v1 = vmax.f32 %v3245_v38, 0.0  ;;  %v3435_v58 = vmax.f32 %v3246_v44, 0.0  ;;  %v3436_v48 = vmax.f32 %v3247_v32, 0.0  ;;  %v3437_v46 = vmax.f32 %v3248_v57, 0.0  ;;  %v7807_v44 = vld [vmem:[#allocation147_spill] sm:$0xff] }
 0x42c   :  { %3620 = vst [vmem:[#allocation5 + $0x310] sm:$0xff] %v3431_v10  ;;  %3621 = vst [vmem:[#allocation5 + $0x318] sm:$0xff] %v3432_v49  ;;  %v3087_v28 = vpop.permute.xlu1 %3086 }
 0x42d   :  { %3622 = vst [vmem:[#allocation5 + $0x320] sm:$0xff] %v3433_v54  ;;  %3623 = vst [vmem:[#allocation5 + $0x328] sm:$0xff] %v3434_v1  ;;  %v3249_v43 = vadd.f32 %v3087_v28, %v7796_v12  ;;  %v3250_v42 = vadd.f32 %v3087_v28, %v7797_v60  ;;  %v3251_v25 = vadd.f32 %v3087_v28, %v7798_v8 }
 0x42e   :  { %3624 = vst [vmem:[#allocation5 + $0x330] sm:$0xff] %v3435_v58  ;;  %3625 = vst [vmem:[#allocation5 + $0x338] sm:$0xff] %v3436_v48  ;;  %v3252_v21 = vadd.f32 %v3087_v28, %v7799_v24  ;;  %v3253_v47 = vadd.f32 %v3087_v28, %v7800_v13  ;;  %v3254_v2 = vadd.f32 %v3087_v28, %v6259_v4  ;;  %v7813_v13 = vld [vmem:[#allocation149_spill] sm:$0xff] }
 0x42f   :  { %3626 = vst.msk [vmem:[#allocation5 + $0x340] sm:$0xff] %vm1501_vm2, %v3437_v46  ;;  %v3255_v62 = vadd.f32 %v3087_v28, %v7801_v55  ;;  %v3438_v34 = vmax.f32 %v3249_v43, 0.0  ;;  %v3439_v56 = vmax.f32 %v3250_v42, 0.0  ;;  %v3440_v0 = vmax.f32 %v3251_v25, 0.0  ;;  %v7808_v46 = vld [vmem:[#allocation53_spill] sm:$0xff]  ;;  %v7809_v28 = vld [vmem:[#allocation54_spill] sm:$0xff] }
 0x430   :  { %v3441_v37 = vmax.f32 %v3252_v21, 0.0  ;;  %v3442_v14 = vmax.f32 %v3253_v47, 0.0  ;;  %v3443_v31 = vmax.f32 %v3254_v2, 0.0  ;;  %v7810_v43 = vld [vmem:[#allocation55_spill] sm:$0xff]  ;;  %v7811_v42 = vld [vmem:[#allocation57_spill] sm:$0xff]  ;;  %v7812_v25 = vld [vmem:[#allocation148_spill] sm:$0xff] }
 0x431   :  { %v3444_v33 = vmax.f32 %v3255_v62, 0.0  ;;  %3627 = vst [vmem:[#allocation5 + $0x348] sm:$0xff] %v3438_v34  ;;  %3628 = vst [vmem:[#allocation5 + $0x350] sm:$0xff] %v3439_v56 }
 0x432   :  { %3629 = vst [vmem:[#allocation5 + $0x358] sm:$0xff] %v3440_v0  ;;  %3630 = vst [vmem:[#allocation5 + $0x360] sm:$0xff] %v3441_v37  ;;  %v3092_v63 = vpop.permute.xlu0 %3091 }
 0x433   :  { %3631 = vst [vmem:[#allocation5 + $0x368] sm:$0xff] %v3442_v14  ;;  %3632 = vst [vmem:[#allocation5 + $0x370] sm:$0xff] %v3443_v31  ;;  %v3256_v4 = vadd.f32 %v3092_v63, %v7802_v53  ;;  %v3257_v29 = vadd.f32 %v3092_v63, %v7803_v26  ;;  %v3258_v23 = vadd.f32 %v3092_v63, %v7804_v50  ;;  %v7814_v31 = vld [vmem:[#allocation151_spill] sm:$0xff]  ;;  %v7816_v53 = vld [vmem:[#allocation58_spill] sm:$0xff] }
 0x434   :  { %3633 = vst.msk [vmem:[#allocation5 + $0x378] sm:$0xff] %vm1501_vm2, %v3444_v33  ;;  %v3259_v22 = vadd.f32 %v3092_v63, %v7805_v36  ;;  %v3260_v38 = vadd.f32 %v3092_v63, %v7806_v39  ;;  %v3261_v9 = vadd.f32 %v3092_v63, %v6281_v30  ;;  %v3262_v32 = vadd.f32 %v3092_v63, %v7807_v44  ;;  %v7815_v33 = vld [vmem:[#allocation56_spill] sm:$0xff]  ;;  %v7817_v26 = vld [vmem:[#allocation59_spill] sm:$0xff] }
 0x435   :  { %v3445_v45 = vmax.f32 %v3256_v4, 0.0  ;;  %v3446_v57 = vmax.f32 %v3257_v29, 0.0  ;;  %v3447_v10 = vmax.f32 %v3258_v23, 0.0  ;;  %v7818_v50 = vld [vmem:[#allocation60_spill] sm:$0xff] }
 0x436   :  { %v3448_v49 = vmax.f32 %v3259_v22, 0.0  ;;  %v3449_v54 = vmax.f32 %v3260_v38, 0.0  ;;  %v3450_v1 = vmax.f32 %v3261_v9, 0.0  ;;  %v3451_v58 = vmax.f32 %v3262_v32, 0.0  ;;  %v7819_v22 = vld [vmem:[#allocation150_spill] sm:$0xff] }
 0x437   :  { %3634 = vst [vmem:[#allocation5 + $0x380] sm:$0xff] %v3445_v45  ;;  %3635 = vst [vmem:[#allocation5 + $0x388] sm:$0xff] %v3446_v57  ;;  %v3097_v48 = vpop.permute.xlu1 %3096 }
 0x438   :  { %3636 = vst [vmem:[#allocation5 + $0x390] sm:$0xff] %v3447_v10  ;;  %3637 = vst [vmem:[#allocation5 + $0x398] sm:$0xff] %v3448_v49  ;;  %v3263_v30 = vadd.f32 %v3097_v48, %v7808_v46  ;;  %v3264_v12 = vadd.f32 %v3097_v48, %v7809_v28  ;;  %v3265_v60 = vadd.f32 %v3097_v48, %v7810_v43 }
 0x439   :  { %3638 = vst [vmem:[#allocation5 + $0x3a0] sm:$0xff] %v3449_v54  ;;  %3639 = vst [vmem:[#allocation5 + $0x3a8] sm:$0xff] %v3450_v1  ;;  %v3266_v8 = vadd.f32 %v3097_v48, %v7811_v42  ;;  %v3267_v24 = vadd.f32 %v3097_v48, %v7812_v25  ;;  %v3268_v21 = vadd.f32 %v3097_v48, %v6303_v19  ;;  %v7820_v54 = vld [vmem:[#allocation152_spill] sm:$0xff]  ;;  %v7821_v1 = vld [vmem:[#allocation153_spill] sm:$0xff] }
 0x43a   :  { %3640 = vst.msk [vmem:[#allocation5 + $0x3b0] sm:$0xff] %vm1501_vm2, %v3451_v58  ;;  %v3269_v47 = vadd.f32 %v3097_v48, %v7813_v13  ;;  %v3452_v2 = vmax.f32 %v3263_v30, 0.0  ;;  %v3453_v55 = vmax.f32 %v3264_v12, 0.0  ;;  %v3454_v62 = vmax.f32 %v3265_v60, 0.0  ;;  %v7822_v48 = vld [vmem:[#allocation61_spill] sm:$0xff]  ;;  %v7823_v30 = vld [vmem:[#allocation62_spill] sm:$0xff] }
 0x43b   :  { %v3455_v34 = vmax.f32 %v3266_v8, 0.0  ;;  %v3456_v56 = vmax.f32 %v3267_v24, 0.0  ;;  %v3457_v0 = vmax.f32 %v3268_v21, 0.0  ;;  %v7824_v12 = vld [vmem:[#allocation63_spill] sm:$0xff]  ;;  %v7825_v42 = vld [vmem:[#allocation65_spill] sm:$0xff] }
 0x43c   :  { %v3458_v37 = vmax.f32 %v3269_v47, 0.0  ;;  %3641 = vst [vmem:[#allocation5 + $0x3b8] sm:$0xff] %v3452_v2  ;;  %3642 = vst [vmem:[#allocation5 + $0x3c0] sm:$0xff] %v3453_v55 }
 0x43d   :  { %3643 = vst [vmem:[#allocation5 + $0x3c8] sm:$0xff] %v3454_v62  ;;  %3644 = vst [vmem:[#allocation5 + $0x3d0] sm:$0xff] %v3455_v34  ;;  %v3102_v14 = vpop.permute.xlu0 %3101  ;;  %v7826_v34 = vld [vmem:[#allocation154_spill] sm:$0xff] }
 0x43e   :  { %3645 = vst [vmem:[#allocation5 + $0x3d8] sm:$0xff] %v3456_v56  ;;  %3646 = vst [vmem:[#allocation5 + $0x3e0] sm:$0xff] %v3457_v0  ;;  %v3270_v19 = vadd.f32 %v3102_v14, %v7814_v31  ;;  %v3271_v63 = vadd.f32 %v3102_v14, %v7815_v33  ;;  %v3272_v4 = vadd.f32 %v3102_v14, %v7816_v53  ;;  %v7827_v56 = vld [vmem:[#allocation155_spill] sm:$0xff]  ;;  %v7830_v53 = vld [vmem:[#allocation66_spill] sm:$0xff] }
 0x43f   :  { %3647 = vst.msk [vmem:[#allocation5 + $0x3e8] sm:$0xff] %vm1501_vm2, %v3458_v37  ;;  %v3273_v29 = vadd.f32 %v3102_v14, %v7817_v26  ;;  %v3274_v23 = vadd.f32 %v3102_v14, %v7818_v50  ;;  %v3275_v36 = vadd.f32 %v3102_v14, %v6325_v27  ;;  %v3276_v39 = vadd.f32 %v3102_v14, %v7819_v22  ;;  %v7828_v37 = vld [vmem:[#allocation157_spill] sm:$0xff] }
 0x440   :  { %v3459_v38 = vmax.f32 %v3270_v19, 0.0  ;;  %v3460_v9 = vmax.f32 %v3271_v63, 0.0  ;;  %v3461_v44 = vmax.f32 %v3272_v4, 0.0  ;;  %v7829_v19 = vld [vmem:[#allocation64_spill] sm:$0xff] }
 0x441   :  { %v3462_v32 = vmax.f32 %v3273_v29, 0.0  ;;  %v3463_v45 = vmax.f32 %v3274_v23, 0.0  ;;  %v3464_v57 = vmax.f32 %v3275_v36, 0.0  ;;  %v3465_v10 = vmax.f32 %v3276_v39, 0.0 }
 0x442   :  { %3648 = vst [vmem:[#allocation5 + $0x3f0] sm:$0xff] %v3459_v38  ;;  %3649 = vst [vmem:[#allocation5 + $0x3f8] sm:$0xff] %v3460_v9  ;;  %v3107_v49 = vpop.permute.xlu1 %3106  ;;  %v7832_v9 = vld [vmem:[#allocation68_spill] sm:$0xff] }
 0x443   :  { %3650 = vst [vmem:[#allocation5 + $0x400] sm:$0xff] %v3461_v44  ;;  %3651 = vst [vmem:[#allocation5 + $0x408] sm:$0xff] %v3462_v32  ;;  %v3277_v27 = vadd.f32 %v3107_v49, %v7820_v54  ;;  %v3278_v58 = vadd.f32 %v3107_v49, %v7821_v1  ;;  %v3279_v46 = vadd.f32 %v3107_v49, %v7822_v48  ;;  %v7833_v32 = vld [vmem:[#allocation156_spill] sm:$0xff]  ;;  %v7836_v1 = vld [vmem:[#allocation69_spill] sm:$0xff] }
 0x444   :  { %3652 = vst [vmem:[#allocation5 + $0x410] sm:$0xff] %v3463_v45  ;;  %3653 = vst [vmem:[#allocation5 + $0x418] sm:$0xff] %v3464_v57  ;;  %v3280_v28 = vadd.f32 %v3107_v49, %v7823_v30  ;;  %v3281_v43 = vadd.f32 %v3107_v49, %v7824_v12  ;;  %v3282_v60 = vadd.f32 %v3107_v49, %v6347_v3  ;;  %v7834_v57 = vld [vmem:[#allocation158_spill] sm:$0xff] }
 0x445   :  { %3654 = vst.msk [vmem:[#allocation5 + $0x420] sm:$0xff] %vm1501_vm2, %v3465_v10  ;;  %v3283_v8 = vadd.f32 %v3107_v49, %v7825_v42  ;;  %v3466_v25 = vmax.f32 %v3277_v27, 0.0  ;;  %v3467_v24 = vmax.f32 %v3278_v58, 0.0  ;;  %v3468_v21 = vmax.f32 %v3279_v46, 0.0  ;;  %v7835_v49 = vld [vmem:[#allocation159_spill] sm:$0xff] }
 0x446   :  { %v3469_v13 = vmax.f32 %v3280_v28, 0.0  ;;  %v3470_v47 = vmax.f32 %v3281_v43, 0.0  ;;  %v3471_v2 = vmax.f32 %v3282_v60, 0.0 }
 0x447   :  { %v3472_v55 = vmax.f32 %v3283_v8, 0.0  ;;  %3655 = vst [vmem:[#allocation5 + $0x428] sm:$0xff] %v3466_v25  ;;  %3656 = vst [vmem:[#allocation5 + $0x430] sm:$0xff] %v3467_v24  ;;  %v7837_v8 = vld [vmem:[#allocation70_spill] sm:$0xff]  ;;  %v7838_v25 = vld [vmem:[#allocation71_spill] sm:$0xff] }
 0x448   :  { %3657 = vst [vmem:[#allocation5 + $0x438] sm:$0xff] %v3468_v21  ;;  %3658 = vst [vmem:[#allocation5 + $0x440] sm:$0xff] %v3469_v13  ;;  %v3112_v62 = vpop.permute.xlu0 %3111  ;;  %v7839_v21 = vld [vmem:[#allocation73_spill] sm:$0xff] }
 0x449   :  { %3659 = vst [vmem:[#allocation5 + $0x448] sm:$0xff] %v3470_v47  ;;  %3660 = vst [vmem:[#allocation5 + $0x450] sm:$0xff] %v3471_v2  ;;  %v3284_v3 = vadd.f32 %v3112_v62, %v7826_v34  ;;  %v3285_v0 = vadd.f32 %v3112_v62, %v7827_v56  ;;  %v3286_v14 = vadd.f32 %v3112_v62, %v7828_v37  ;;  %v7840_v47 = vld [vmem:[#allocation160_spill] sm:$0xff]  ;;  %v7841_v34 = vld [vmem:[#allocation161_spill] sm:$0xff] }
 0x44a   :  { %3661 = vst.msk [vmem:[#allocation5 + $0x458] sm:$0xff] %vm1501_vm2, %v3472_v55  ;;  %v3287_v31 = vadd.f32 %v3112_v62, %v6363_v52  ;;  %v3288_v33 = vadd.f32 %v3112_v62, %v7829_v19  ;;  %v3289_v63 = vadd.f32 %v3112_v62, %v6369_v40  ;;  %v3290_v4 = vadd.f32 %v3112_v62, %v7830_v53  ;;  %v7831_v52 = vld [vmem:[#allocation67_spill] sm:$0xff]  ;;  %v7843_v53 = vld [vmem:[#allocation72_spill] sm:$0xff] }
 0x44b   :  { %v3473_v26 = vmax.f32 %v3284_v3, 0.0  ;;  %v3474_v29 = vmax.f32 %v3285_v0, 0.0  ;;  %v3475_v50 = vmax.f32 %v3286_v14, 0.0 }
 0x44c   :  { %v3476_v23 = vmax.f32 %v3287_v31, 0.0  ;;  %v3477_v36 = vmax.f32 %v3288_v33, 0.0  ;;  %v3478_v22 = vmax.f32 %v3289_v63, 0.0  ;;  %v3479_v39 = vmax.f32 %v3290_v4, 0.0 }
 0x44d   :  { %3662 = vst [vmem:[#allocation5 + $0x460] sm:$0xff] %v3473_v26  ;;  %3663 = vst [vmem:[#allocation5 + $0x468] sm:$0xff] %v3474_v29  ;;  %v3117_v38 = vpop.permute.xlu1 %3116  ;;  %v7844_v26 = vld [vmem:[#allocation74_spill] sm:$0xff] }
 0x44e   :  { %3664 = vst [vmem:[#allocation5 + $0x470] sm:$0xff] %v3475_v50  ;;  %3665 = vst [vmem:[#allocation5 + $0x478] sm:$0xff] %v3476_v23  ;;  %v3291_v40 = vadd.f32 %v3117_v38, %v7831_v52  ;;  %v3292_v44 = vadd.f32 %v3117_v38, %v7832_v9  ;;  %v3293_v45 = vadd.f32 %v3117_v38, %v7833_v32  ;;  %v7845_v50 = vld [vmem:[#allocation75_spill] sm:$0xff]  ;;  %v7848_v52 = vld [vmem:[#allocation164_spill] sm:$0xff] }
 0x44f   :  { %3666 = vst [vmem:[#allocation5 + $0x480] sm:$0xff] %v3477_v36  ;;  %3667 = vst [vmem:[#allocation5 + $0x488] sm:$0xff] %v3478_v22  ;;  %v3294_v10 = vadd.f32 %v3117_v38, %v7834_v57  ;;  %v3295_v54 = vadd.f32 %v3117_v38, %v7835_v49  ;;  %v3296_v27 = vadd.f32 %v3117_v38, %v6391_v20  ;;  %v7846_v36 = vld [vmem:[#allocation76_spill] sm:$0xff] }
 0x450   :  { %3668 = vst.msk [vmem:[#allocation5 + $0x490] sm:$0xff] %vm1501_vm2, %v3479_v39  ;;  %v3297_v58 = vadd.f32 %v3117_v38, %v7836_v1  ;;  %v3480_v48 = vmax.f32 %v3291_v40, 0.0  ;;  %v3481_v46 = vmax.f32 %v3292_v44, 0.0  ;;  %v3482_v30 = vmax.f32 %v3293_v45, 0.0  ;;  %v7847_v39 = vld [vmem:[#allocation162_spill] sm:$0xff] }
 0x451   :  { %v3483_v28 = vmax.f32 %v3294_v10, 0.0  ;;  %v3484_v12 = vmax.f32 %v3295_v54, 0.0  ;;  %v3485_v43 = vmax.f32 %v3296_v27, 0.0 }
 0x452   :  { %v3486_v60 = vmax.f32 %v3297_v58, 0.0  ;;  %3669 = vst [vmem:[#allocation5 + $0x498] sm:$0xff] %v3480_v48  ;;  %3670 = vst [vmem:[#allocation5 + $0x4a0] sm:$0xff] %v3481_v46 }
 0x453   :  { %3671 = vst [vmem:[#allocation5 + $0x4a8] sm:$0xff] %v3482_v30  ;;  %3672 = vst [vmem:[#allocation5 + $0x4b0] sm:$0xff] %v3483_v28  ;;  %v3122_v42 = vpop.permute.xlu0 %3121  ;;  %v7849_v30 = vld [vmem:[#allocation165_spill] sm:$0xff] }
 0x454   :  { %3673 = vst [vmem:[#allocation5 + $0x4b8] sm:$0xff] %v3484_v12  ;;  %3674 = vst [vmem:[#allocation5 + $0x4c0] sm:$0xff] %v3485_v43  ;;  %v3298_v20 = vadd.f32 %v3122_v42, %v7837_v8  ;;  %v3299_v24 = vadd.f32 %v3122_v42, %v7838_v25  ;;  %v3300_v13 = vadd.f32 %v3122_v42, %v7839_v21  ;;  %v7850_v12 = vld [vmem:[#allocation77_spill] sm:$0xff]  ;;  %v7852_v8 = vld [vmem:[#allocation79_spill] sm:$0xff] }
 0x455   :  { %3675 = vst.msk [vmem:[#allocation5 + $0x4c8] sm:$0xff] %vm1501_vm2, %v3486_v60  ;;  %v3301_v2 = vadd.f32 %v3122_v42, %v7840_v47  ;;  %v3302_v55 = vadd.f32 %v3122_v42, %v6410_v59  ;;  %v3303_v62 = vadd.f32 %v3122_v42, %v6413_v16  ;;  %v3304_v3 = vadd.f32 %v3122_v42, %v7841_v34  ;;  %v7842_v59 = vld [vmem:[#allocation163_spill] sm:$0xff]  ;;  %v7851_v60 = vld [vmem:[#allocation78_spill] sm:$0xff] }
 0x456   :  { %v3487_v56 = vmax.f32 %v3298_v20, 0.0  ;;  %v3488_v0 = vmax.f32 %v3299_v24, 0.0  ;;  %v3489_v37 = vmax.f32 %v3300_v13, 0.0  ;;  %v7854_v25 = vld [vmem:[#allocation166_spill] sm:$0xff]  ;;  %v7855_v24 = vld [vmem:[#allocation167_spill] sm:$0xff] }
 0x457   :  { %v3490_v14 = vmax.f32 %v3301_v2, 0.0  ;;  %v3491_v31 = vmax.f32 %v3302_v55, 0.0  ;;  %v3492_v19 = vmax.f32 %v3303_v62, 0.0  ;;  %v3493_v33 = vmax.f32 %v3304_v3, 0.0 }
 0x458   :  { %3676 = vst [vmem:[#allocation5 + $0x4d0] sm:$0xff] %v3487_v56  ;;  %3677 = vst [vmem:[#allocation5 + $0x4d8] sm:$0xff] %v3488_v0  ;;  %v3127_v63 = vpop.permute.xlu1 %3126 }
 0x459   :  { %3678 = vst [vmem:[#allocation5 + $0x4e0] sm:$0xff] %v3489_v37  ;;  %3679 = vst [vmem:[#allocation5 + $0x4e8] sm:$0xff] %v3490_v14  ;;  %v3305_v16 = vadd.f32 %v3127_v63, %v7842_v59  ;;  %v3306_v4 = vadd.f32 %v3127_v63, %v7843_v53  ;;  %v3307_v29 = vadd.f32 %v3127_v63, %v7844_v26  ;;  %v7857_v37 = vld [vmem:[#allocation80_spill] sm:$0xff] }
 0x45a   :  { %3680 = vst [vmem:[#allocation5 + $0x4f0] sm:$0xff] %v3491_v31  ;;  %3681 = vst [vmem:[#allocation5 + $0x4f8] sm:$0xff] %v3492_v19  ;;  %v3308_v23 = vadd.f32 %v3127_v63, %v7845_v50  ;;  %v3309_v22 = vadd.f32 %v3127_v63, %v7846_v36  ;;  %v3310_v38 = vadd.f32 %v3127_v63, %v7847_v39 }
 0x45b   :  { %3682 = vst.msk [vmem:[#allocation5 + $0x500] sm:$0xff] %vm1501_vm2, %v3493_v33  ;;  %v3311_v40 = vadd.f32 %v3127_v63, %v7848_v52  ;;  %v3494_v9 = vmax.f32 %v3305_v16, 0.0  ;;  %v3495_v44 = vmax.f32 %v3306_v4, 0.0  ;;  %v3496_v32 = vmax.f32 %v3307_v29, 0.0  ;;  %v7858_v4 = vld [vmem:[#allocation82_spill] sm:$0xff] }
 0x45c   :  { %v3497_v45 = vmax.f32 %v3308_v23, 0.0  ;;  %v3498_v57 = vmax.f32 %v3309_v22, 0.0  ;;  %v3499_v10 = vmax.f32 %v3310_v38, 0.0  ;;  %v3137_v54 = vpop.permute.xlu1 %3136 }
 0x45d   :  { %v3500_v49 = vmax.f32 %v3311_v40, 0.0  ;;  %v3132_v27 = vpop.permute.xlu0 %3131  ;;  %3683 = vst [vmem:[#allocation5 + $0x508] sm:$0xff] %v3494_v9  ;;  %3684 = vst [vmem:[#allocation5 + $0x510] sm:$0xff] %v3495_v44  ;;  %v3319_v1 = vadd.f32 %v3137_v54, %v6466_v5  ;;  %v6709_v58 = vadd.f32 %v3137_v54, %v6469_v51  ;;  %v6712_v48 = vadd.f32 %v3137_v54, %v6472_v11  ;;  %v7853_v5 = vld [vmem:[#allocation81_spill] sm:$0xff] }
 0x45e   :  { %3685 = vst [vmem:[#allocation5 + $0x518] sm:$0xff] %v3496_v32  ;;  %3686 = vst [vmem:[#allocation5 + $0x520] sm:$0xff] %v3497_v45  ;;  %v6715_v46 = vadd.f32 %v3137_v54, %v6475_v6  ;;  %v3312_v28 = vadd.f32 %v3132_v27, %v7849_v30  ;;  %v3313_v43 = vadd.f32 %v3132_v27, %v7850_v12  ;;  %v7856_v6 = vld [vmem:[#allocation169_spill] sm:$0xff] }
 0x45f   :  { %v3314_v42 = vadd.f32 %v3132_v27, %v7851_v60  ;;  %v3315_v20 = vadd.f32 %v3132_v27, %v7852_v8  ;;  %3687 = vst [vmem:[#allocation5 + $0x528] sm:$0xff] %v3498_v57  ;;  %3688 = vst [vmem:[#allocation5 + $0x530] sm:$0xff] %v3499_v10  ;;  %v3316_v51 = vadd.f32 %v3132_v27, %v7853_v5  ;;  %v3508_v36 = vmax.f32 %v3319_v1, 0.0 }
 0x460   :  { %3689 = vst.msk [vmem:[#allocation5 + $0x538] sm:$0xff] %vm1501_vm2, %v3500_v49  ;;  %v3317_v11 = vadd.f32 %v3132_v27, %v7854_v25  ;;  %v3318_v21 = vadd.f32 %v3132_v27, %v7855_v24  ;;  %v3323_v13 = vadd.f32 %v3137_v54, %v7856_v6  ;;  %v3501_v47 = vmax.f32 %v3312_v28, 0.0 }
 0x461   :  { %v3502_v2 = vmax.f32 %v3313_v43, 0.0  ;;  %v3503_v55 = vmax.f32 %v3314_v42, 0.0  ;;  %v3504_v62 = vmax.f32 %v3315_v20, 0.0  ;;  %v3505_v34 = vmax.f32 %v3316_v51, 0.0  ;;  %v3142_v0 = vpop.permute.xlu0 %3141  ;;  %3697 = vst [vmem:[#allocation5 + $0x578] sm:$0xff] %v3508_v36 }
 0x462   :  { %v3506_v3 = vmax.f32 %v3317_v11, 0.0  ;;  %v3507_v56 = vmax.f32 %v3318_v21, 0.0  ;;  %v3324_v14 = vadd.f32 %v3137_v54, %v7857_v37  ;;  %3690 = vst [vmem:[#allocation5 + $0x540] sm:$0xff] %v3501_v47  ;;  %v3326_v31 = vadd.f32 %v3142_v0, %v6497_v15 }
 0x463   :  { %3691 = vst [vmem:[#allocation5 + $0x548] sm:$0xff] %v3502_v2  ;;  %3692 = vst [vmem:[#allocation5 + $0x550] sm:$0xff] %v3503_v55  ;;  %v3327_v19 = vadd.f32 %v3142_v0, %v6501_v17  ;;  %v3328_v33 = vadd.f32 %v3142_v0, %v6513_v7  ;;  %v3329_v63 = vadd.f32 %v3142_v0, %v6557_v18  ;;  %v3512_v22 = vmax.f32 %v3323_v13, 0.0 }
 0x464   :  { %3693 = vst [vmem:[#allocation5 + $0x558] sm:$0xff] %v3504_v62  ;;  %3694 = vst [vmem:[#allocation5 + $0x560] sm:$0xff] %v3505_v34  ;;  %v3330_v59 = vadd.f32 %v3142_v0, %v6569_v41  ;;  %v3331_v16 = vadd.f32 %v3142_v0, %v6573_v35  ;;  %v3332_v53 = vadd.f32 %v3142_v0, %v6577_v61  ;;  %v3515_v29 = vmax.f32 %v3326_v31, 0.0 }
 0x465   :  { %3695 = vst [vmem:[#allocation5 + $0x568] sm:$0xff] %v3506_v3  ;;  %3696 = vst.msk [vmem:[#allocation5 + $0x570] sm:$0xff] %vm1501_vm2, %v3507_v56  ;;  %v3325_v26 = vadd.f32 %v3137_v54, %v7858_v4  ;;  %v3516_v15 = vmax.f32 %v3327_v19, 0.0  ;;  %v3517_v50 = vmax.f32 %v3328_v33, 0.0  ;;  %v3518_v17 = vmax.f32 %v3329_v63, 0.0 }
 0x466   :  { %v3519_v7 = vmax.f32 %v3330_v59, 0.0  ;;  %v3520_v18 = vmax.f32 %v3331_v16, 0.0  ;;  %v3521_v23 = vmax.f32 %v3332_v53, 0.0  ;;  %3704 = vst [vmem:[#allocation5 + $0x5b0] sm:$0xff] %v3515_v29  ;;  %v3509_v41 = vmax.f32 %v6709_v58, 0.0  ;;  %3701 = vst [vmem:[#allocation5 + $0x598] sm:$0xff] %v3512_v22 }
 0x467   :  { %3705 = vst [vmem:[#allocation5 + $0x5b8] sm:$0xff] %v3516_v15  ;;  %3706 = vst [vmem:[#allocation5 + $0x5c0] sm:$0xff] %v3517_v50  ;;  %v3510_v35 = vmax.f32 %v6712_v48, 0.0  ;;  %v3511_v61 = vmax.f32 %v6715_v46, 0.0  ;;  %v3513_v39 = vmax.f32 %v3324_v14, 0.0  ;;  %v3514_v38 = vmax.f32 %v3325_v26, 0.0 }
 0x468   :  { %3707 = vst [vmem:[#allocation5 + $0x5c8] sm:$0xff] %v3518_v17  ;;  %3708 = vst [vmem:[#allocation5 + $0x5d0] sm:$0xff] %v3519_v7 }
 0x469   :  { %3709 = vst [vmem:[#allocation5 + $0x5d8] sm:$0xff] %v3520_v18  ;;  %3710 = vst.msk [vmem:[#allocation5 + $0x5e0] sm:$0xff] %vm1501_vm2, %v3521_v23 }
 0x46a   :  { %3698 = vst [vmem:[#allocation5 + $0x580] sm:$0xff] %v3509_v41  ;;  %3699 = vst [vmem:[#allocation5 + $0x588] sm:$0xff] %v3510_v35 }
 0x46b   :  { %3700 = vst [vmem:[#allocation5 + $0x590] sm:$0xff] %v3511_v61  ;;  %3702 = vst [vmem:[#allocation5 + $0x5a0] sm:$0xff] %v3513_v39 }
 0x46c   :  { %3703 = vst.msk [vmem:[#allocation5 + $0x5a8] sm:$0xff] %vm1501_vm2, %v3514_v38 }
 0x46d   :  { %4191 = shalt.err (!%p4188_p12)
}
 0x46e   :  { %s4192_s24 = scalar_lea.hbm %s6756_s3, 24192 }
 0x46f   :  { %p4193_p13 = scmp.ne.s32.totalorder %s6756_s3, %s4192_s24  ;;  %p4196_p0 = scmp.lt.u32.totalorder %s4192_s24, %s6756_s3 }
 0x471   :  { %p4198_p1 = pnand %p4196_p0, %p4193_p13 }
 0x473   :  { %4201 = shalt.err (!%p4198_p1)
}
 0x474   :  { %s4213_s29 = smov 896   ;;  %s4214_s30 = smov 56  }
 0x475   :  { %3722 = dma.vmem_to_hbm [thread:$0]  %s3717_s26, 24192, %s6756_s3, [#allocation4], %s4213_s29, %s4213_s29, %s4214_s30  }
 0x476   :  { %4204 = dma.done.wait [#allocation4], 24192  }
 0x477   :  { %4205 = vsyncadd [#allocation4], 4294943104 }
 0x478   :  { %3726 = vsyncpa [#allocation3], 1 }
 0x479   :  { %3727 = vsyncpa [#allocation4], 1 }

</bundles_post_ra>
